<compile_context>
chip_gen: v5e
topology: v5e:2x2
jax: 0.10.0
libtpu: 0.0.40
codegen_flags: <defaults>
</compile_context>

<pallas_src>
import functools

import jax
import jax.numpy as jnp
from jax.experimental import pallas as pl
from jax.experimental.pallas import tpu as pltpu


def _recursive_block_kernel(xp_ref, w_ref, b_ref, mask_ref, o_ref, act_ref,
                            *, width, top_pad):
    """One (batch, layer) grid step: LeakyReLU(0.2) followed by a 3x3 same conv.

    xp_ref  : (1, Rp, C) bf16  zero-padded input image, flattened rows (layer 0)
    w_ref   : (d, 9*C, C) bf16 all layer weights, rows ordered (ky, kx, cin)
    b_ref   : (d, 1, C)  f32   all layer biases
    mask_ref: (M, C)     bf16  1 for real columns, 0 for the 2 halo cols per row
    o_ref   : (1, M, C)  f32   raw conv output of the LAST layer (M = H*(W+2);
                               the two halo columns per row are cropped outside)
    act_ref : (Rp, C)    bf16  VMEM-resident zero-padded activation; pixel (i, j)
                               lives at flat row (top_pad + i)*(W+2) + j.
    """
    layer = pl.program_id(1)
    n_layers = pl.num_programs(1)

    C = act_ref.shape[1]
    M = o_ref.shape[1]                 # H * (W + 2)
    Wp = width + 2

    # Layer 0: load the padded input and apply LeakyReLU.  leaky(0) == 0, so the
    # zero halo stays zero.  Later layers find their input already in act_ref.
    @pl.when(layer == 0)
    def _():
        x = xp_ref[0]                                   # (Rp, C) bf16
        act_ref[...] = jnp.where(x > 0, x, 0.2 * x)

    # 3x3 conv as 9 accumulating MXU matmuls.  Output pixel (i, j) <-> operand
    # row i*(W+2) + j; tap (ky, kx) starts at flat row
    # (top_pad + ky - 1)*(W+2) + (kx - 1).  Rows with j in {W, W+1} are junk and
    # never reach valid output (masked on write-back, cropped in the wrapper).
    w_l = w_ref[layer]                                  # (9*C, C) bf16
    acc = None
    for k in range(9):
        ky, kx = divmod(k, 3)
        off = (top_pad + ky - 1) * Wp + (kx - 1)        # static offset
        tap = act_ref[pl.ds(off, M), :]                 # (M, C) bf16
        wk = w_l[k * C:(k + 1) * C, :]                  # (C, C) bf16
        dk = jnp.dot(tap, wk, preferred_element_type=jnp.float32)
        acc = dk if acc is None else acc + dk
    acc = acc + b_ref[layer]                            # (M, C) f32

    # Not the last layer: next activation = LeakyReLU(conv out), with the halo
    # columns forced back to zero via the precomputed 0/1 mask (single vmul).
    @pl.when(layer < n_layers - 1)
    def _():
        nxt = jnp.where(acc > 0, acc, 0.2 * acc).astype(jnp.bfloat16)
        act_ref[pl.ds(top_pad * Wp, M), :] = nxt * mask_ref[...]

    # Last layer: emit the raw conv output (junk halo columns cropped outside).
    @pl.when(layer == n_layers - 1)
    def _():
        o_ref[0] = acc


def recursive_block_forward(x_nchw, weights, biases):
    """RecursiveBlock.forward: d x (LeakyReLU(0.2) -> Conv2d(64, 64, 3, p=1))."""
    d = len(weights)
    x = jnp.transpose(x_nchw, (0, 2, 3, 1)).astype(jnp.float32)   # NCHW -> NHWC
    N, H, W, C = x.shape
    Wp = W + 2

    # Top padding rows: >= 2 (so all tap offsets are non-negative) and chosen so
    # the interior starts on a 16-aligned sublane row (bf16 packs 16 sublanes),
    # giving aligned, unmasked write-back stores.
    r0 = 2
    while (r0 * Wp) % 16 != 0:
        r0 += 1
    Rp = (r0 + H + 2) * Wp
    M = H * Wp

    # Zero-pad ONCE for the whole d-layer stack: r0 rows on top, 2 rows at the
    # bottom, 2 columns on the right (the "left" halo of row i is the right halo
    # of row i-1 in the flattened view), then flatten to (rows, C), bf16.
    xp = jnp.pad(x, ((0, 0), (r0, 2), (0, 2), (0, 0)))
    xp = xp.reshape(N, Rp, C).astype(jnp.bfloat16)

    # Stack per-layer parameters; weights as (d, 9*C, C) bf16, rows = (ky,kx,cin).
    w_all = jnp.stack(weights).reshape(d, 9 * C, C).astype(jnp.bfloat16)
    b_all = jnp.stack(biases).reshape(d, 1, C).astype(jnp.float32)

    # Halo-column mask (1 for j < W, 0 for the two junk columns of each row).
    col = jnp.arange(M, dtype=jnp.int32) % Wp
    mask = jnp.broadcast_to((col < W)[:, None], (M, C)).astype(jnp.bfloat16)

    kernel = functools.partial(_recursive_block_kernel, width=W, top_pad=r0)

    flops = 2 * N * d * M * (9 * C) * C
    bytes_accessed = (xp.size * 2 + w_all.size * 2 + b_all.size * 4
                      + mask.size * 2 + N * M * C * 4)

    out = pl.pallas_call(
        kernel,
        out_shape=jax.ShapeDtypeStruct((N, M, C), jnp.float32),
        grid_spec=pltpu.PrefetchScalarGridSpec(
            num_scalar_prefetch=0,
            grid=(N, d),                                   # layer axis innermost
            in_specs=[
                # Padded input image: re-fetched only when the batch index moves.
                pl.BlockSpec((1, Rp, C), lambda n, l: (n, 0, 0)),
                # All layers' weights / biases / mask: constant index map ->
                # DMA'd once, VMEM-resident for the whole call.
                pl.BlockSpec((d, 9 * C, C), lambda n, l: (0, 0, 0)),
                pl.BlockSpec((d, 1, C), lambda n, l: (0, 0, 0)),
                pl.BlockSpec((M, C), lambda n, l: (0, 0)),
            ],
            out_specs=pl.BlockSpec((1, M, C), lambda n, l: (n, 0, 0)),
            scratch_shapes=[pltpu.VMEM((Rp, C), jnp.bfloat16)],
        ),
        compiler_params=pltpu.CompilerParams(
            dimension_semantics=("parallel", "arbitrary")),
        cost_estimate=pl.CostEstimate(
            flops=flops, transcendentals=0, bytes_accessed=bytes_accessed),
    )(xp, w_all, b_all, mask)

    # Drop the 2 junk halo columns per row and return NCHW.
    out = out.reshape(N, H, Wp, C)[:, :, :W, :]
    return jnp.transpose(out, (0, 3, 1, 2))


def init_params(key, d, c=64):
    """Deterministic Conv2d-like init (uniform +/- 1/sqrt(fan_in)), as [ky,kx,Cin,Cout]."""
    weights, biases = [], []
    fan_in = c * 3 * 3
    bound = 1.0 / (fan_in ** 0.5)
    for _ in range(d):
        key, kw, kb = jax.random.split(key, 3)
        w = jax.random.uniform(kw, (3, 3, c, c), jnp.float32, -bound, bound)
        b = jax.random.uniform(kb, (c,), jnp.float32, -bound, bound)
        weights.append(w)
        biases.append(b)
    return weights, biases


def _reference_forward(x_nchw, weights, biases):
    """Pure-JAX f32 reference (lax conv) for correctness checking."""
    x = x_nchw
    for w, b in zip(weights, biases):
        x = jnp.where(x > 0, x, 0.2 * x)
        x_nhwc = jnp.transpose(x, (0, 2, 3, 1))
        y = jax.lax.conv_general_dilated(
            x_nhwc, w, window_strides=(1, 1), padding="SAME",
            dimension_numbers=("NHWC", "HWIO", "NHWC"))
        y = y + b[None, None, None, :]
        x = jnp.transpose(y, (0, 3, 1, 2))
    return x


if __name__ == "__main__":
    d = 3                         # recursion depth
    N, C, H, W = 2, 64, 16, 16    # channels are fixed to 64 by the module

    key = jax.random.PRNGKey(0)
    key, kx = jax.random.split(key)
    x = jax.random.normal(kx, (N, C, H, W), jnp.float32)

    weights, biases = init_params(key, d, C)

    out = jax.block_until_ready(recursive_block_forward(x, weights, biases))

    # Sanity check against a pure-JAX f32 reference.  The kernel uses bf16
    # activations / weights with f32 accumulation, so the tolerance is looser
    # than pure f32.
    ref = jax.block_until_ready(_reference_forward(x, weights, biases))
    assert out.shape == (N, C, H, W)
    assert jnp.allclose(out, ref, atol=5e-2, rtol=5e-2), (
        float(jnp.max(jnp.abs(out - ref))))

    print("KERNEL_OK")
</pallas_src>

<mosaic_0001>
module attributes {stable_mosaic.version = 11 : i64} {
  func.func @_recursive_block_kernel(%arg0: i32, %arg1: i32, %arg2: memref<1x468x64xbf16, #tpu.memory_space<vmem>>, %arg3: memref<3x576x64xbf16, #tpu.memory_space<vmem>>, %arg4: memref<3x1x64xf32, #tpu.memory_space<vmem>>, %arg5: memref<288x64xbf16, #tpu.memory_space<vmem>>, %arg6: memref<1x288x64xf32, #tpu.memory_space<vmem>>, %arg7: memref<468x64xbf16, #tpu.memory_space<vmem>>) attributes {dimension_semantics = [#tpu.dimension_semantics<parallel>, #tpu.dimension_semantics<arbitrary>], iteration_bounds = array<i64: 2, 3>, scalar_prefetch = 0 : i64, scratch_operands = 1 : i64, tpu.core_type = #tpu.core_type<tc>, window_params = [{transform_indices = @transform_0, window_bounds = array<i64: 1, 468, 64>}, {pipeline_mode = #tpu.pipeline_mode<synchronous>, transform_indices = @transform_1, window_bounds = array<i64: 3, 576, 64>}, {pipeline_mode = #tpu.pipeline_mode<synchronous>, transform_indices = @transform_2, window_bounds = array<i64: 3, 1, 64>}, {pipeline_mode = #tpu.pipeline_mode<synchronous>, transform_indices = @transform_3, window_bounds = array<i64: 288, 64>}, {transform_indices = @transform_4, window_bounds = array<i64: 1, 288, 64>}]} {
    %c0_i32 = arith.constant 0 : i32
    %0 = arith.cmpi eq, %arg1, %c0_i32 : i32
    %1 = arith.extui %0 : i1 to i32
    %c0_i32_0 = arith.constant 0 : i32
    %2 = arith.cmpi ne, %1, %c0_i32_0 : i32
    scf.if %2 {
      %c0_24 = arith.constant 0 : index
      %c0_25 = arith.constant 0 : index
      %c0_26 = arith.constant 0 : index
      %52 = vector.load %arg2[%c0_24, %c0_25, %c0_26] : memref<1x468x64xbf16, #tpu.memory_space<vmem>>, vector<1x468x64xbf16>
      %53 = vector.shape_cast %52 : vector<1x468x64xbf16> to vector<468x64xbf16>
      %cst_27 = arith.constant 0.000000e+00 : bf16
      %54 = vector.broadcast %cst_27 : bf16 to vector<468x64xbf16>
      %55 = arith.cmpf ogt, %53, %54 : vector<468x64xbf16>
      %cst_28 = arith.constant 2.001950e-01 : bf16
      %56 = vector.broadcast %cst_28 : bf16 to vector<468x64xbf16>
      %57 = arith.mulf %56, %53 : vector<468x64xbf16>
      %58 = arith.select %55, %53, %57 : vector<468x64xi1>, vector<468x64xbf16>
      %c0_29 = arith.constant 0 : index
      %c0_30 = arith.constant 0 : index
      %59 = vector.load %arg7[%c0_29, %c0_30] : memref<468x64xbf16, #tpu.memory_space<vmem>>, vector<468x64xbf16>
      tpu.vector_store %arg7[%c0_29, %c0_30], %58 {strides = array<i32>} : memref<468x64xbf16, #tpu.memory_space<vmem>>, vector<468x64xbf16>,
    } else {
    }
    %3 = arith.index_cast %arg1 : i32 to index
    %c0 = arith.constant 0 : index
    %c0_1 = arith.constant 0 : index
    %4 = vector.load %arg3[%3, %c0, %c0_1] : memref<3x576x64xbf16, #tpu.memory_space<vmem>>, vector<1x576x64xbf16>
    %5 = vector.shape_cast %4 : vector<1x576x64xbf16> to vector<576x64xbf16>
    %c125 = arith.constant 125 : index
    %c0_2 = arith.constant 0 : index
    %6 = vector.load %arg7[%c125, %c0_2] : memref<468x64xbf16, #tpu.memory_space<vmem>>, vector<288x64xbf16>
    %7 = vector.extract_strided_slice %5 {offsets = [0, 0], sizes = [64, 64], strides = [1, 1]} : vector<576x64xbf16> to vector<64x64xbf16>
    %cst = arith.constant dense<0.000000e+00> : vector<288x64xf32>
    %8 = tpu.matmul %6, %7, %cst {dimension_numbers = #tpu.dot_dimension_numbers<[1], [0], [0], [1], [0, 0, 1, 1], [], []>} : vector<288x64xbf16>, vector<64x64xbf16>, vector<288x64xf32> -> vector<288x64xf32>
    %c126 = arith.constant 126 : index
    %c0_3 = arith.constant 0 : index
    %9 = vector.load %arg7[%c126, %c0_3] : memref<468x64xbf16, #tpu.memory_space<vmem>>, vector<288x64xbf16>
    %10 = vector.extract_strided_slice %5 {offsets = [64, 0], sizes = [64, 64], strides = [1, 1]} : vector<576x64xbf16> to vector<64x64xbf16>
    %cst_4 = arith.constant dense<0.000000e+00> : vector<288x64xf32>
    %11 = tpu.matmul %9, %10, %cst_4 {dimension_numbers = #tpu.dot_dimension_numbers<[1], [0], [0], [1], [0, 0, 1, 1], [], []>} : vector<288x64xbf16>, vector<64x64xbf16>, vector<288x64xf32> -> vector<288x64xf32>
    %12 = arith.addf %8, %11 : vector<288x64xf32>
    %c127 = arith.constant 127 : index
    %c0_5 = arith.constant 0 : index
    %13 = vector.load %arg7[%c127, %c0_5] : memref<468x64xbf16, #tpu.memory_space<vmem>>, vector<288x64xbf16>
    %14 = vector.extract_strided_slice %5 {offsets = [128, 0], sizes = [64, 64], strides = [1, 1]} : vector<576x64xbf16> to vector<64x64xbf16>
    %cst_6 = arith.constant dense<0.000000e+00> : vector<288x64xf32>
    %15 = tpu.matmul %13, %14, %cst_6 {dimension_numbers = #tpu.dot_dimension_numbers<[1], [0], [0], [1], [0, 0, 1, 1], [], []>} : vector<288x64xbf16>, vector<64x64xbf16>, vector<288x64xf32> -> vector<288x64xf32>
    %16 = arith.addf %12, %15 : vector<288x64xf32>
    %c143 = arith.constant 143 : index
    %c0_7 = arith.constant 0 : index
    %17 = vector.load %arg7[%c143, %c0_7] : memref<468x64xbf16, #tpu.memory_space<vmem>>, vector<288x64xbf16>
    %18 = vector.extract_strided_slice %5 {offsets = [192, 0], sizes = [64, 64], strides = [1, 1]} : vector<576x64xbf16> to vector<64x64xbf16>
    %cst_8 = arith.constant dense<0.000000e+00> : vector<288x64xf32>
    %19 = tpu.matmul %17, %18, %cst_8 {dimension_numbers = #tpu.dot_dimension_numbers<[1], [0], [0], [1], [0, 0, 1, 1], [], []>} : vector<288x64xbf16>, vector<64x64xbf16>, vector<288x64xf32> -> vector<288x64xf32>
    %20 = arith.addf %16, %19 : vector<288x64xf32>
    %c144 = arith.constant 144 : index
    %c0_9 = arith.constant 0 : index
    %21 = vector.load %arg7[%c144, %c0_9] : memref<468x64xbf16, #tpu.memory_space<vmem>>, vector<288x64xbf16>
    %22 = vector.extract_strided_slice %5 {offsets = [256, 0], sizes = [64, 64], strides = [1, 1]} : vector<576x64xbf16> to vector<64x64xbf16>
    %cst_10 = arith.constant dense<0.000000e+00> : vector<288x64xf32>
    %23 = tpu.matmul %21, %22, %cst_10 {dimension_numbers = #tpu.dot_dimension_numbers<[1], [0], [0], [1], [0, 0, 1, 1], [], []>} : vector<288x64xbf16>, vector<64x64xbf16>, vector<288x64xf32> -> vector<288x64xf32>
    %24 = arith.addf %20, %23 : vector<288x64xf32>
    %c145 = arith.constant 145 : index
    %c0_11 = arith.constant 0 : index
    %25 = vector.load %arg7[%c145, %c0_11] : memref<468x64xbf16, #tpu.memory_space<vmem>>, vector<288x64xbf16>
    %26 = vector.extract_strided_slice %5 {offsets = [320, 0], sizes = [64, 64], strides = [1, 1]} : vector<576x64xbf16> to vector<64x64xbf16>
    %cst_12 = arith.constant dense<0.000000e+00> : vector<288x64xf32>
    %27 = tpu.matmul %25, %26, %cst_12 {dimension_numbers = #tpu.dot_dimension_numbers<[1], [0], [0], [1], [0, 0, 1, 1], [], []>} : vector<288x64xbf16>, vector<64x64xbf16>, vector<288x64xf32> -> vector<288x64xf32>
    %28 = arith.addf %24, %27 : vector<288x64xf32>
    %c161 = arith.constant 161 : index
    %c0_13 = arith.constant 0 : index
    %29 = vector.load %arg7[%c161, %c0_13] : memref<468x64xbf16, #tpu.memory_space<vmem>>, vector<288x64xbf16>
    %30 = vector.extract_strided_slice %5 {offsets = [384, 0], sizes = [64, 64], strides = [1, 1]} : vector<576x64xbf16> to vector<64x64xbf16>
    %cst_14 = arith.constant dense<0.000000e+00> : vector<288x64xf32>
    %31 = tpu.matmul %29, %30, %cst_14 {dimension_numbers = #tpu.dot_dimension_numbers<[1], [0], [0], [1], [0, 0, 1, 1], [], []>} : vector<288x64xbf16>, vector<64x64xbf16>, vector<288x64xf32> -> vector<288x64xf32>
    %32 = arith.addf %28, %31 : vector<288x64xf32>
    %c162 = arith.constant 162 : index
    %c0_15 = arith.constant 0 : index
    %33 = vector.load %arg7[%c162, %c0_15] : memref<468x64xbf16, #tpu.memory_space<vmem>>, vector<288x64xbf16>
    %34 = vector.extract_strided_slice %5 {offsets = [448, 0], sizes = [64, 64], strides = [1, 1]} : vector<576x64xbf16> to vector<64x64xbf16>
    %cst_16 = arith.constant dense<0.000000e+00> : vector<288x64xf32>
    %35 = tpu.matmul %33, %34, %cst_16 {dimension_numbers = #tpu.dot_dimension_numbers<[1], [0], [0], [1], [0, 0, 1, 1], [], []>} : vector<288x64xbf16>, vector<64x64xbf16>, vector<288x64xf32> -> vector<288x64xf32>
    %36 = arith.addf %32, %35 : vector<288x64xf32>
    %c163 = arith.constant 163 : index
    %c0_17 = arith.constant 0 : index
    %37 = vector.load %arg7[%c163, %c0_17] : memref<468x64xbf16, #tpu.memory_space<vmem>>, vector<288x64xbf16>
    %38 = vector.extract_strided_slice %5 {offsets = [512, 0], sizes = [64, 64], strides = [1, 1]} : vector<576x64xbf16> to vector<64x64xbf16>
    %cst_18 = arith.constant dense<0.000000e+00> : vector<288x64xf32>
    %39 = tpu.matmul %37, %38, %cst_18 {dimension_numbers = #tpu.dot_dimension_numbers<[1], [0], [0], [1], [0, 0, 1, 1], [], []>} : vector<288x64xbf16>, vector<64x64xbf16>, vector<288x64xf32> -> vector<288x64xf32>
    %40 = arith.addf %36, %39 : vector<288x64xf32>
    %41 = arith.index_cast %arg1 : i32 to index
    %c0_19 = arith.constant 0 : index
    %c0_20 = arith.constant 0 : index
    %42 = vector.load %arg4[%41, %c0_19, %c0_20] : memref<3x1x64xf32, #tpu.memory_space<vmem>>, vector<1x1x64xf32>
    %43 = vector.shape_cast %42 : vector<1x1x64xf32> to vector<1x64xf32>
    %44 = vector.broadcast %43 : vector<1x64xf32> to vector<288x64xf32>
    %45 = arith.addf %40, %44 : vector<288x64xf32>
    %c2_i32 = arith.constant 2 : i32
    %46 = arith.cmpi slt, %arg1, %c2_i32 : i32
    %47 = arith.extui %46 : i1 to i32
    %c0_i32_21 = arith.constant 0 : i32
    %48 = arith.cmpi ne, %47, %c0_i32_21 : i32
    scf.if %48 {
      %cst_24 = arith.constant 0.000000e+00 : f32
      %52 = vector.broadcast %cst_24 : f32 to vector<288x64xf32>
      %53 = arith.cmpf ogt, %45, %52 : vector<288x64xf32>
      %cst_25 = arith.constant 2.000000e-01 : f32
      %54 = vector.broadcast %cst_25 : f32 to vector<288x64xf32>
      %55 = arith.mulf %54, %45 : vector<288x64xf32>
      %56 = arith.select %53, %45, %55 : vector<288x64xi1>, vector<288x64xf32>
      %57 = arith.truncf %56 : vector<288x64xf32> to vector<288x64xbf16>
      %c0_26 = arith.constant 0 : index
      %c0_27 = arith.constant 0 : index
      %58 = vector.load %arg5[%c0_26, %c0_27] : memref<288x64xbf16, #tpu.memory_space<vmem>>, vector<288x64xbf16>
      %59 = arith.mulf %57, %58 : vector<288x64xbf16>
      %c144_28 = arith.constant 144 : index
      %c0_29 = arith.constant 0 : index
      %60 = vector.load %arg7[%c144_28, %c0_29] : memref<468x64xbf16, #tpu.memory_space<vmem>>, vector<288x64xbf16>
      tpu.vector_store %arg7[%c144_28, %c0_29], %59 {strides = array<i32>} : memref<468x64xbf16, #tpu.memory_space<vmem>>, vector<288x64xbf16>,
    } else {
    }
    %c2_i32_22 = arith.constant 2 : i32
    %49 = arith.cmpi eq, %arg1, %c2_i32_22 : i32
    %50 = arith.extui %49 : i1 to i32
    %c0_i32_23 = arith.constant 0 : i32
    %51 = arith.cmpi ne, %50, %c0_i32_23 : i32
    scf.if %51 {
      %c0_24 = arith.constant 0 : index
      %c0_25 = arith.constant 0 : index
      %c0_26 = arith.constant 0 : index
      %52 = vector.load %arg6[%c0_24, %c0_25, %c0_26] : memref<1x288x64xf32, #tpu.memory_space<vmem>>, vector<1x288x64xf32>
      %53 = vector.shape_cast %52 : vector<1x288x64xf32> to vector<288x64xf32>
      %54 = vector.shape_cast %45 : vector<288x64xf32> to vector<1x288x64xf32>
      tpu.vector_store %arg6[%c0_24, %c0_25, %c0_26], %54 {strides = array<i32>} : memref<1x288x64xf32, #tpu.memory_space<vmem>>, vector<1x288x64xf32>,
    } else {
    }
    return
  }
  func.func @transform_0(%arg0: i32, %arg1: i32) -> (i32, i32, i32) {
    %c0_i32 = arith.constant 0 : i32
    %c0_i32_0 = arith.constant 0 : i32
    %c0_i32_1 = arith.constant 0 : i32
    return %arg0, %c0_i32, %c0_i32_0 : i32, i32, i32
  }
  func.func @transform_1(%arg0: i32, %arg1: i32) -> (i32, i32, i32) {
    %c0_i32 = arith.constant 0 : i32
    %c0_i32_0 = arith.constant 0 : i32
    %c0_i32_1 = arith.constant 0 : i32
    %c0_i32_2 = arith.constant 0 : i32
    return %c0_i32, %c0_i32_0, %c0_i32_1 : i32, i32, i32
  }
  func.func @transform_2(%arg0: i32, %arg1: i32) -> (i32, i32, i32) {
    %c0_i32 = arith.constant 0 : i32
    %c0_i32_0 = arith.constant 0 : i32
    %c0_i32_1 = arith.constant 0 : i32
    %c0_i32_2 = arith.constant 0 : i32
    return %c0_i32, %c0_i32_0, %c0_i32_1 : i32, i32, i32
  }
  func.func @transform_3(%arg0: i32, %arg1: i32) -> (i32, i32) {
    %c0_i32 = arith.constant 0 : i32
    %c0_i32_0 = arith.constant 0 : i32
    %c0_i32_1 = arith.constant 0 : i32
    return %c0_i32, %c0_i32_0 : i32, i32
  }
  func.func @transform_4(%arg0: i32, %arg1: i32) -> (i32, i32, i32) {
    %c0_i32 = arith.constant 0 : i32
    %c0_i32_0 = arith.constant 0 : i32
    %c0_i32_1 = arith.constant 0 : i32
    return %arg0, %c0_i32, %c0_i32_0 : i32, i32, i32
  }
}

</mosaic_0001>

<bundles_post_ra>
// kernel: tpu_custom_call.1
= control target key start
LH: loop header
LB: loop body
LE: loop exit
PB: predicated region body
PF: predicated region fallthrough
CT: control target
= control target key end

     0   :  { %s5615_s15 = smov 0   ;;  %s5617_s16 = smov 0   ;;  %s7660_s0 = inlined_call_operand.vmem [shape: bf16[2,468,64], index: 0, kind: input, shape index: {}]   ;;  %s7661_s1 = inlined_call_operand.vmem [shape: bf16[3,576,64], index: 1, kind: input, shape index: {}]   ;;  %s7662_s2 = inlined_call_operand.vmem [shape: f32[3,1,64], index: 2, kind: input, shape index: {}]   ;;  %s7663_s3 = inlined_call_operand.vmem [shape: bf16[288,64], index: 3, kind: input, shape index: {}]   ;;  %s7664_s4 = inlined_call_operand.vmem [shape: f32[2,288,64], index: 4, kind: output, shape index: {}]  }
   0x1   :  { %s5619_s17 = smov 0   ;;  %s5621_s18 = smov 0  }
   0x2   :  { %s5623_s19 = smov 0  }
   0x3 LB: > { %s23_s20 = sadd.s32 1, %s5580_s17  ;;  %s26_s21 = sadd.s32 1, %s5584_s18  ;;  %s5588_s19 = sphi %s5623_s19, %s14_s19   ;;  %s5584_s18 = sphi %s5621_s18, %s7782_s18   ;;  %s5580_s17 = sphi %s5619_s17, %s7781_s17   ;;  %s5576_s16 = sphi %s5617_s16, %s7780_s16   ;;  %s5572_s15 = sphi %s5615_s15, %s7779_s15  }
   0x4   : > { %p24_p0 = scmp.ge.s32.totalorder %s23_s20, 3  ;;  %p4569_p1 = scmp.ge.s32.totalorder %s5588_s19, 1 }
   0x5   : > { %p174_p2 = scmp.lt.s32.totalorder %s5588_s19, 7 }
   0x6   : > { %s7784_s20 = smov (%p24_p0, %s23_s20), 0  ;;  %s7786_s21 = smov (!%p24_p0, %s26_s21), %s5584_s18 }
   0x7   : > { %p175_p3 = pnand %p4569_p1, %p174_p2  ;;  %p28_p4 = scmp.ge.s32.totalorder %s7786_s21, 2 }
   0x9   : > { %s7788_s21 = smov (%p28_p4, %s7786_s21), 0  ;;  %178 = sbr.rel (%p175_p3) target bundleno = 1008 (0x3f0), region = 36 }
   0xe   : > { %p200_p5 = scmp.lt.s32.totalorder %s5576_s16, 1  ;;  %p4572_p6 = scmp.ne.s32.totalorder %s5572_s15, 0 }
  0x10   : > { %s7790_s16 = smov (!%p200_p5, %s5576_s16), 1  ;;  %214 = sbr.rel (%p4572_p6) target bundleno = 80 (0x50), region = 40 }
  0x11   : > { %s5504_s22 = smul.u32 236, %s7790_s16 }
  0x12   : > { %s5505_s23 = smul.u32 288, %s7790_s16 }
  0x13   : > { %s5650_s26 = scalar_lea.vmem %s7660_s0, %s5504_s22 }
  0x14   : > { %s5655_s29 = scalar_lea.vmem %s7664_s4, %s5505_s23 }
  0x15   : > { %vm628_vm0 = vcmask 519168   ;;  %v230_v0 = vld [vmem:[%s5650_s26 + $0x3c] sm:$0xf]  ;;  %v231_v1 = vld [vmem:[%s5650_s26 + $0x40] sm:$0xf] }
  0x16   : > { %v232_v2 = vld [vmem:[%s5650_s26 + $0x44] sm:$0xf]  ;;  %v233_v3 = vld [vmem:[%s5650_s26 + $0x48] sm:$0xf]  ;;  %v289_v4 = vunpack.c.l.bf16 %v230_v0  ;;  %v234_v5 = vld [vmem:[%s5650_s26 + $0x4c] sm:$0xf]  ;;  %v290_v9 = vunpack.c.l.bf16 %v231_v1 }
  0x17   : > { %v235_v6 = vld [vmem:[%s5650_s26 + $0x50] sm:$0xf]  ;;  %v291_v10 = vunpack.c.l.bf16 %v232_v2  ;;  %v292_v11 = vunpack.c.l.bf16 %v233_v3  ;;  %v293_v12 = vunpack.c.l.bf16 %v234_v5  ;;  %v236_v17 = vld [vmem:[%s5650_s26 + $0x54] sm:$0xf]  ;;  %v5677_v18 = vld [vmem:[%s5650_s26 + $0x58] sm:$0xf] }
  0x18   : > { %vm5664_vm1 = vcmp.gt.f32.partialorder %v289_v4, 0.0  ;;  %v407_v8 = vmul.f32 0.20019531, %v289_v4  ;;  %v294_v13 = vunpack.c.l.bf16 %v235_v6  ;;  %vm5671_vm3 = vcmp.gt.f32.partialorder %v290_v9, 0.0  ;;  %v238_v26 = vld [vmem:[%s5650_s26 + $0x5c] sm:$0xf] }
  0x19   : > { %vm525_vm2 = vmpackc.low %vm5664_vm1, %vm5664_vm1  ;;  %v408_v16 = vmul.f32 0.20019531, %v290_v9  ;;  %vm5682_vm5 = vcmp.gt.f32.partialorder %v291_v10, 0.0  ;;  %v409_v20 = vmul.f32 0.20019531, %v291_v10  ;;  %vm5686_vm6 = vcmp.gt.f32.partialorder %v292_v11, 0.0  ;;  %v5707_v31 = vld [vmem:[%s5650_s26 + $0x60] sm:$0xf] }
  0x1a   : > { %v466_v14 = vpack.c.bf16 %v407_v8, %v407_v8  ;;  %vm526_vm4 = vmpackc.low %vm5671_vm3, %vm5671_vm3  ;;  %v410_v24 = vmul.f32 0.20019531, %v292_v11  ;;  %vm5693_vm8 = vcmp.gt.f32.partialorder %v293_v12, 0.0  ;;  %v411_v28 = vmul.f32 0.20019531, %v293_v12  ;;  %v5719_v36 = vld [vmem:[%s5650_s26 + $0x64] sm:$0xf] }
  0x1b   : > { %v467_v23 = vpack.c.bf16 %v408_v16, %v408_v16  ;;  %vm527_vm7 = vmpackc.low %vm5682_vm5, %vm5682_vm5  ;;  %v468_v27 = vpack.c.bf16 %v409_v20, %v409_v20  ;;  %vm5702_vm10 = vcmp.gt.f32.partialorder %v294_v13, 0.0  ;;  %v412_v30 = vmul.f32 0.20019531, %v294_v13  ;;  %v5722_v37 = vld [vmem:[%s5650_s26 + $0x68] sm:$0xf]  ;;  %v5734_v42 = vld [vmem:[%s5650_s26 + $0x6c] sm:$0xf] }
  0x1c   : > { %v584_v22 = vsel %vm525_vm2, %v230_v0, %v466_v14  ;;  %vm528_vm9 = vmpackc.low %vm5686_vm6, %vm5686_vm6  ;;  %v469_v33 = vpack.c.bf16 %v410_v24, %v410_v24  ;;  %v295_v34 = vunpack.c.l.bf16 %v236_v17  ;;  %v296_v35 = vunpack.c.l.bf16 %v5677_v18  ;;  %v5737_v43 = vld [vmem:[%s5650_s26 + $0x70] sm:$0xf]  ;;  %v244_v0 = vld [vmem:[%s5650_s26 + $0x74] sm:$0xf] }
  0x1d   : > { %644 = vst.msk [vmem:[#allocation2 + $0x3c] sm:$0xf] %vm628_vm0, %v584_v22  ;;  %v585_v32 = vsel %vm526_vm4, %v231_v1, %v467_v23  ;;  %vm529_vm11 = vmpackc.low %vm5693_vm8, %vm5693_vm8  ;;  %v586_v38 = vsel %vm527_vm7, %v232_v2, %v468_v27  ;;  %v470_v39 = vpack.c.bf16 %v411_v28, %v411_v28  ;;  %v471_v40 = vpack.c.bf16 %v412_v30, %v412_v30  ;;  %v5785_v1 = vld [vmem:[%s5650_s26 + $0x78] sm:$0xf]  ;;  %v246_v10 = vld [vmem:[%s5650_s26 + $0x7c] sm:$0xf] }
  0x1e   : > { %645 = vst.msk [vmem:[#allocation2 + $0x40] sm:$0xf] %vm628_vm0, %v585_v32  ;;  %vm530_vm12 = vmpackc.low %vm5702_vm10, %vm5702_vm10  ;;  %v297_v41 = vunpack.c.l.bf16 %v238_v26  ;;  %v587_v44 = vsel %vm528_vm9, %v233_v3, %v469_v33  ;;  %vm5745_vm13 = vcmp.gt.f32.partialorder %v295_v34, 0.0  ;;  %v413_v46 = vmul.f32 0.20019531, %v295_v34  ;;  %v5828_v15 = vld [vmem:[%s5650_s26 + $0x80] sm:$0xf] }
  0x1f   : > { %646 = vst.msk [vmem:[#allocation2 + $0x44] sm:$0xf] %vm628_vm0, %v586_v38  ;;  %vm5749_vm14 = vcmp.gt.f32.partialorder %v296_v35, 0.0  ;;  %v588_v48 = vsel %vm529_vm11, %v234_v5, %v470_v39  ;;  %v589_v49 = vsel %vm530_vm12, %v235_v6, %v471_v40  ;;  %vm531_vm15 = vmpackc.low %vm5745_vm13, %vm5745_vm13  ;;  %v414_v50 = vmul.f32 0.20019531, %v296_v35  ;;  %v5841_v20 = vld [vmem:[%s5650_s26 + $0x84] sm:$0xf] }
  0x20   : > { %647 = vst.msk [vmem:[#allocation2 + $0x48] sm:$0xf] %vm628_vm0, %v587_v44  ;;  %vm5762_vm1 = vcmp.gt.f32.partialorder %v297_v41, 0.0  ;;  %v472_v52 = vpack.c.bf16 %v413_v46, %v413_v46  ;;  %vm532_vm2 = vmpackc.low %vm5749_vm14, %vm5749_vm14  ;;  %v415_v53 = vmul.f32 0.20019531, %v297_v41  ;;  %v298_v54 = vunpack.c.l.bf16 %v5707_v31  ;;  %v5844_v21 = vld [vmem:[%s5650_s26 + $0x88] sm:$0xf] }
  0x21   : > { %648 = vst.msk [vmem:[#allocation2 + $0x4c] sm:$0xf] %vm628_vm0, %v588_v48  ;;  %v299_v55 = vunpack.c.l.bf16 %v5719_v36  ;;  %v473_v56 = vpack.c.bf16 %v414_v50, %v414_v50  ;;  %vm533_vm3 = vmpackc.low %vm5762_vm1, %vm5762_vm1  ;;  %v300_v57 = vunpack.c.l.bf16 %v5722_v37  ;;  %v301_v58 = vunpack.c.l.bf16 %v5734_v42  ;;  %v5860_v27 = vld [vmem:[%s5650_s26 + $0x90] sm:$0xf]  ;;  %v252_v48 = vld [vmem:[%s5650_s26 + $0x94] sm:$0xf] }
  0x22   : > { %649 = vst.msk [vmem:[#allocation2 + $0x50] sm:$0xf] %vm628_vm0, %v589_v49  ;;  %v302_v59 = vunpack.c.l.bf16 %v5737_v43  ;;  %v590_v60 = vsel %vm531_vm15, %v236_v17, %v472_v52  ;;  %v474_v61 = vpack.c.bf16 %v415_v53, %v415_v53  ;;  %vm5779_vm4 = vcmp.gt.f32.partialorder %v298_v54, 0.0  ;;  %v5911_v49 = vld [vmem:[%s5650_s26 + $0x98] sm:$0xf] }
  0x23   : > { %v416_v63 = vmul.f32 0.20019531, %v298_v54  ;;  %650 = vst.msk [vmem:[#allocation2 + $0x54] sm:$0xf] %vm628_vm0, %v590_v60  ;;  %v591_v2 = vsel %vm532_vm2, %v5677_v18, %v473_v56  ;;  %vm534_vm5 = vmpackc.low %vm5779_vm4, %vm5779_vm4  ;;  %vm5797_vm6 = vcmp.gt.f32.partialorder %v299_v55, 0.0  ;;  %v417_v4 = vmul.f32 0.20019531, %v299_v55 }
  0x24   : > { %vm5801_vm7 = vcmp.gt.f32.partialorder %v300_v57, 0.0  ;;  %651 = vst.msk [vmem:[#allocation2 + $0x58] sm:$0xf] %vm628_vm0, %v591_v2  ;;  %v592_v6 = vsel %vm533_vm3, %v238_v26, %v474_v61  ;;  %vm535_vm8 = vmpackc.low %vm5797_vm6, %vm5797_vm6  ;;  %v418_v8 = vmul.f32 0.20019531, %v300_v57  ;;  %vm5814_vm9 = vcmp.gt.f32.partialorder %v301_v58, 0.0 }
  0x25   : > { %v475_v7 = vpack.c.bf16 %v416_v63, %v416_v63  ;;  %652 = vst.msk [vmem:[#allocation2 + $0x5c] sm:$0xf] %vm628_vm0, %v592_v6  ;;  %v476_v11 = vpack.c.bf16 %v417_v4, %v417_v4  ;;  %vm536_vm10 = vmpackc.low %vm5801_vm7, %vm5801_vm7  ;;  %v419_v12 = vmul.f32 0.20019531, %v301_v58  ;;  %vm5823_vm11 = vcmp.gt.f32.partialorder %v302_v59, 0.0  ;;  %v5857_v26 = vld [vmem:[%s5650_s26 + $0x8c] sm:$0xf] }
  0x26   : > { %v420_v14 = vmul.f32 0.20019531, %v302_v59  ;;  %v477_v17 = vpack.c.bf16 %v418_v8, %v418_v8  ;;  %vm537_vm12 = vmpackc.low %vm5814_vm9, %vm5814_vm9  ;;  %v303_v18 = vunpack.c.l.bf16 %v244_v0  ;;  %v304_v19 = vunpack.c.l.bf16 %v5785_v1  ;;  %v254_v58 = vld [vmem:[%s5650_s26 + $0x9c] sm:$0xf]  ;;  %v5954_v63 = vld [vmem:[%s5650_s26 + $0xa0] sm:$0xf] }
  0x27   : > { %v593_v16 = vsel %vm534_vm5, %v5707_v31, %v475_v7  ;;  %v594_v22 = vsel %vm535_vm8, %v5719_v36, %v476_v11  ;;  %v478_v23 = vpack.c.bf16 %v419_v12, %v419_v12  ;;  %vm538_vm13 = vmpackc.low %vm5823_vm11, %vm5823_vm11  ;;  %v305_v25 = vunpack.c.l.bf16 %v246_v10  ;;  %v5967_v4 = vld [vmem:[%s5650_s26 + $0xa4] sm:$0xf]  ;;  %v5970_v5 = vld [vmem:[%s5650_s26 + $0xa8] sm:$0xf] }
  0x28   : > { %653 = vst.msk [vmem:[#allocation2 + $0x60] sm:$0xf] %vm628_vm0, %v593_v16  ;;  %v479_v24 = vpack.c.bf16 %v420_v14, %v420_v14  ;;  %v595_v28 = vsel %vm536_vm10, %v5722_v37, %v477_v17  ;;  %vm5869_vm14 = vcmp.gt.f32.partialorder %v303_v18, 0.0  ;;  %v421_v30 = vmul.f32 0.20019531, %v303_v18  ;;  %v5986_v11 = vld [vmem:[%s5650_s26 + $0xb0] sm:$0xf] }
  0x29   : > { %654 = vst.msk [vmem:[#allocation2 + $0x64] sm:$0xf] %vm628_vm0, %v594_v22  ;;  %vm5873_vm15 = vcmp.gt.f32.partialorder %v304_v19, 0.0  ;;  %v596_v32 = vsel %vm537_vm12, %v5734_v42, %v478_v23  ;;  %vm539_vm1 = vmpackc.low %vm5869_vm14, %vm5869_vm14  ;;  %v422_v34 = vmul.f32 0.20019531, %v304_v19  ;;  %vm5888_vm2 = vcmp.gt.f32.partialorder %v305_v25, 0.0 }
  0x2a   : > { %655 = vst.msk [vmem:[#allocation2 + $0x68] sm:$0xf] %vm628_vm0, %v595_v28  ;;  %v597_v33 = vsel %vm538_vm13, %v5737_v43, %v479_v24  ;;  %v480_v36 = vpack.c.bf16 %v421_v30, %v421_v30  ;;  %vm540_vm3 = vmpackc.low %vm5873_vm15, %vm5873_vm15  ;;  %v423_v37 = vmul.f32 0.20019531, %v305_v25  ;;  %v306_v38 = vunpack.c.l.bf16 %v5828_v15  ;;  %v6096_v53 = vld [vmem:[%s5650_s26 + $0xc8] sm:$0xf] }
  0x2b   : > { %656 = vst.msk [vmem:[#allocation2 + $0x6c] sm:$0xf] %vm628_vm0, %v596_v32  ;;  %v307_v39 = vunpack.c.l.bf16 %v5841_v20  ;;  %v481_v40 = vpack.c.bf16 %v422_v34, %v422_v34  ;;  %vm541_vm4 = vmpackc.low %vm5888_vm2, %vm5888_vm2  ;;  %v308_v41 = vunpack.c.l.bf16 %v5844_v21  ;;  %v309_v42 = vunpack.c.l.bf16 %v5857_v26  ;;  %v260_v32 = vld [vmem:[%s5650_s26 + $0xb4] sm:$0xf]  ;;  %v271_v35 = vld [vmem:[%s5650_s26 + $0xe0] sm:$0xf] }
  0x2c   : > { %657 = vst.msk [vmem:[#allocation2 + $0x70] sm:$0xf] %vm628_vm0, %v597_v33  ;;  %v310_v43 = vunpack.c.l.bf16 %v5860_v27  ;;  %v598_v44 = vsel %vm539_vm1, %v244_v0, %v480_v36  ;;  %v482_v45 = vpack.c.bf16 %v423_v37, %v423_v37  ;;  %vm5905_vm5 = vcmp.gt.f32.partialorder %v306_v38, 0.0  ;;  %v6037_v33 = vld [vmem:[%s5650_s26 + $0xb8] sm:$0xf] }
  0x2d   : > { %v424_v47 = vmul.f32 0.20019531, %v306_v38  ;;  %658 = vst.msk [vmem:[#allocation2 + $0x74] sm:$0xf] %vm628_vm0, %v598_v44  ;;  %v599_v50 = vsel %vm540_vm3, %v5785_v1, %v481_v40  ;;  %vm542_vm6 = vmpackc.low %vm5905_vm5, %vm5905_vm5  ;;  %vm5923_vm7 = vcmp.gt.f32.partialorder %v307_v39, 0.0  ;;  %v425_v52 = vmul.f32 0.20019531, %v307_v39 }
  0x2e   : > { %vm5927_vm8 = vcmp.gt.f32.partialorder %v308_v41, 0.0  ;;  %659 = vst.msk [vmem:[#allocation2 + $0x78] sm:$0xf] %vm628_vm0, %v599_v50  ;;  %v600_v54 = vsel %vm541_vm4, %v246_v10, %v482_v45  ;;  %vm543_vm9 = vmpackc.low %vm5923_vm7, %vm5923_vm7  ;;  %v426_v56 = vmul.f32 0.20019531, %v308_v41  ;;  %vm5940_vm10 = vcmp.gt.f32.partialorder %v309_v42, 0.0 }
  0x2f   : > { %v483_v55 = vpack.c.bf16 %v424_v47, %v424_v47  ;;  %660 = vst.msk [vmem:[#allocation2 + $0x7c] sm:$0xf] %vm628_vm0, %v600_v54  ;;  %v484_v59 = vpack.c.bf16 %v425_v52, %v425_v52  ;;  %vm544_vm11 = vmpackc.low %vm5927_vm8, %vm5927_vm8  ;;  %v427_v60 = vmul.f32 0.20019531, %v309_v42  ;;  %vm5949_vm12 = vcmp.gt.f32.partialorder %v310_v43, 0.0  ;;  %v5983_v10 = vld [vmem:[%s5650_s26 + $0xac] sm:$0xf] }
  0x30   : > { %v428_v62 = vmul.f32 0.20019531, %v310_v43  ;;  %v485_v1 = vpack.c.bf16 %v426_v56, %v426_v56  ;;  %vm545_vm13 = vmpackc.low %vm5940_vm10, %vm5940_vm10  ;;  %v311_v2 = vunpack.c.l.bf16 %v252_v48  ;;  %v312_v3 = vunpack.c.l.bf16 %v5911_v49  ;;  %v262_v42 = vld [vmem:[%s5650_s26 + $0xbc] sm:$0xf]  ;;  %v6080_v47 = vld [vmem:[%s5650_s26 + $0xc0] sm:$0xf] }
  0x31   : > { %v601_v0 = vsel %vm542_vm6, %v5828_v15, %v483_v55  ;;  %v602_v6 = vsel %vm543_vm9, %v5841_v20, %v484_v59  ;;  %v486_v7 = vpack.c.bf16 %v427_v60, %v427_v60  ;;  %vm546_vm14 = vmpackc.low %vm5949_vm12, %vm5949_vm12  ;;  %v313_v9 = vunpack.c.l.bf16 %v254_v58  ;;  %v6093_v52 = vld [vmem:[%s5650_s26 + $0xc4] sm:$0xf]  ;;  %v6112_v59 = vld [vmem:[%s5650_s26 + $0xd0] sm:$0xf] }
  0x32   : > { %661 = vst.msk [vmem:[#allocation2 + $0x80] sm:$0xf] %vm628_vm0, %v601_v0  ;;  %v487_v8 = vpack.c.bf16 %v428_v62, %v428_v62  ;;  %v603_v12 = vsel %vm544_vm11, %v5844_v21, %v485_v1  ;;  %vm5995_vm15 = vcmp.gt.f32.partialorder %v311_v2, 0.0  ;;  %v429_v14 = vmul.f32 0.20019531, %v311_v2 }
  0x33   : > { %662 = vst.msk [vmem:[#allocation2 + $0x84] sm:$0xf] %vm628_vm0, %v602_v6  ;;  %vm5999_vm1 = vcmp.gt.f32.partialorder %v312_v3, 0.0  ;;  %v604_v16 = vsel %vm545_vm13, %v5857_v26, %v486_v7  ;;  %vm547_vm2 = vmpackc.low %vm5995_vm15, %vm5995_vm15  ;;  %v430_v18 = vmul.f32 0.20019531, %v312_v3  ;;  %vm6014_vm3 = vcmp.gt.f32.partialorder %v313_v9, 0.0 }
  0x34   : > { %663 = vst.msk [vmem:[#allocation2 + $0x88] sm:$0xf] %vm628_vm0, %v603_v12  ;;  %v605_v17 = vsel %vm546_vm14, %v5860_v27, %v487_v8  ;;  %v488_v20 = vpack.c.bf16 %v429_v14, %v429_v14  ;;  %vm548_vm4 = vmpackc.low %vm5999_vm1, %vm5999_vm1  ;;  %v431_v21 = vmul.f32 0.20019531, %v313_v9  ;;  %v314_v22 = vunpack.c.l.bf16 %v5954_v63 }
  0x35   : > { %664 = vst.msk [vmem:[#allocation2 + $0x8c] sm:$0xf] %vm628_vm0, %v604_v16  ;;  %v315_v23 = vunpack.c.l.bf16 %v5967_v4  ;;  %v489_v24 = vpack.c.bf16 %v430_v18, %v430_v18  ;;  %vm549_vm5 = vmpackc.low %vm6014_vm3, %vm6014_vm3  ;;  %v316_v25 = vunpack.c.l.bf16 %v5970_v5  ;;  %v317_v26 = vunpack.c.l.bf16 %v5983_v10  ;;  %v268_v16 = vld [vmem:[%s5650_s26 + $0xd4] sm:$0xf] }
  0x36   : > { %665 = vst.msk [vmem:[#allocation2 + $0x90] sm:$0xf] %vm628_vm0, %v605_v17  ;;  %v318_v27 = vunpack.c.l.bf16 %v5986_v11  ;;  %v606_v28 = vsel %vm547_vm2, %v252_v48, %v488_v20  ;;  %v490_v29 = vpack.c.bf16 %v431_v21, %v431_v21  ;;  %vm6031_vm6 = vcmp.gt.f32.partialorder %v314_v22, 0.0  ;;  %v269_v17 = vld [vmem:[%s5650_s26 + $0xd8] sm:$0xf] }
  0x37   : > { %v432_v31 = vmul.f32 0.20019531, %v314_v22  ;;  %666 = vst.msk [vmem:[#allocation2 + $0x94] sm:$0xf] %vm628_vm0, %v606_v28  ;;  %v607_v34 = vsel %vm548_vm4, %v5911_v49, %v489_v24  ;;  %vm550_vm7 = vmpackc.low %vm6031_vm6, %vm6031_vm6  ;;  %vm6049_vm8 = vcmp.gt.f32.partialorder %v315_v23, 0.0  ;;  %v433_v36 = vmul.f32 0.20019531, %v315_v23 }
  0x38   : > { %vm6053_vm9 = vcmp.gt.f32.partialorder %v316_v25, 0.0  ;;  %667 = vst.msk [vmem:[#allocation2 + $0x98] sm:$0xf] %vm628_vm0, %v607_v34  ;;  %v608_v38 = vsel %vm549_vm5, %v254_v58, %v490_v29  ;;  %vm551_vm10 = vmpackc.low %vm6049_vm8, %vm6049_vm8  ;;  %v434_v40 = vmul.f32 0.20019531, %v316_v25  ;;  %vm6066_vm11 = vcmp.gt.f32.partialorder %v317_v26, 0.0 }
  0x39   : > { %v491_v39 = vpack.c.bf16 %v432_v31, %v432_v31  ;;  %668 = vst.msk [vmem:[#allocation2 + $0x9c] sm:$0xf] %vm628_vm0, %v608_v38  ;;  %v492_v43 = vpack.c.bf16 %v433_v36, %v433_v36  ;;  %vm552_vm12 = vmpackc.low %vm6053_vm9, %vm6053_vm9  ;;  %v435_v44 = vmul.f32 0.20019531, %v317_v26  ;;  %vm6075_vm13 = vcmp.gt.f32.partialorder %v318_v27, 0.0  ;;  %v6109_v58 = vld [vmem:[%s5650_s26 + $0xcc] sm:$0xf] }
  0x3a   : > { %v436_v46 = vmul.f32 0.20019531, %v318_v27  ;;  %v493_v49 = vpack.c.bf16 %v434_v40, %v434_v40  ;;  %vm553_vm14 = vmpackc.low %vm6066_vm11, %vm6066_vm11  ;;  %v319_v50 = vunpack.c.l.bf16 %v260_v32  ;;  %v320_v51 = vunpack.c.l.bf16 %v6037_v33  ;;  %v270_v26 = vld [vmem:[%s5650_s26 + $0xdc] sm:$0xf] }
  0x3b   : > { %v609_v48 = vsel %vm550_vm7, %v5954_v63, %v491_v39  ;;  %v610_v54 = vsel %vm551_vm10, %v5967_v4, %v492_v43  ;;  %v494_v55 = vpack.c.bf16 %v435_v44, %v435_v44  ;;  %vm554_vm15 = vmpackc.low %vm6075_vm13, %vm6075_vm13  ;;  %v321_v57 = vunpack.c.l.bf16 %v262_v42 }
  0x3c   : > { %669 = vst.msk [vmem:[#allocation2 + $0xa0] sm:$0xf] %vm628_vm0, %v609_v48  ;;  %v495_v56 = vpack.c.bf16 %v436_v46, %v436_v46  ;;  %v611_v60 = vsel %vm552_vm12, %v5970_v5, %v493_v49  ;;  %vm6121_vm1 = vcmp.gt.f32.partialorder %v319_v50, 0.0  ;;  %v437_v62 = vmul.f32 0.20019531, %v319_v50 }
  0x3d   : > { %670 = vst.msk [vmem:[#allocation2 + $0xa4] sm:$0xf] %vm628_vm0, %v610_v54  ;;  %vm6125_vm2 = vcmp.gt.f32.partialorder %v320_v51, 0.0  ;;  %v612_v0 = vsel %vm553_vm14, %v5983_v10, %v494_v55  ;;  %vm555_vm3 = vmpackc.low %vm6121_vm1, %vm6121_vm1  ;;  %v438_v2 = vmul.f32 0.20019531, %v320_v51  ;;  %vm6140_vm4 = vcmp.gt.f32.partialorder %v321_v57, 0.0 }
  0x3e   : > { %671 = vst.msk [vmem:[#allocation2 + $0xa8] sm:$0xf] %vm628_vm0, %v611_v60  ;;  %v613_v1 = vsel %vm554_vm15, %v5986_v11, %v495_v56  ;;  %v496_v4 = vpack.c.bf16 %v437_v62, %v437_v62  ;;  %vm556_vm5 = vmpackc.low %vm6125_vm2, %vm6125_vm2  ;;  %v439_v5 = vmul.f32 0.20019531, %v321_v57  ;;  %v322_v6 = vunpack.c.l.bf16 %v6080_v47 }
  0x3f   : > { %672 = vst.msk [vmem:[#allocation2 + $0xac] sm:$0xf] %vm628_vm0, %v612_v0  ;;  %v323_v7 = vunpack.c.l.bf16 %v6093_v52  ;;  %v497_v8 = vpack.c.bf16 %v438_v2, %v438_v2  ;;  %vm557_vm6 = vmpackc.low %vm6140_vm4, %vm6140_vm4  ;;  %v324_v9 = vunpack.c.l.bf16 %v6096_v53  ;;  %v325_v10 = vunpack.c.l.bf16 %v6109_v58 }
  0x40   : > { %673 = vst.msk [vmem:[#allocation2 + $0xb0] sm:$0xf] %vm628_vm0, %v613_v1  ;;  %v326_v11 = vunpack.c.l.bf16 %v6112_v59  ;;  %v614_v12 = vsel %vm555_vm3, %v260_v32, %v496_v4  ;;  %v498_v13 = vpack.c.bf16 %v439_v5, %v439_v5  ;;  %vm6157_vm7 = vcmp.gt.f32.partialorder %v322_v6, 0.0 }
  0x41   : > { %v440_v15 = vmul.f32 0.20019531, %v322_v6  ;;  %674 = vst.msk [vmem:[#allocation2 + $0xb4] sm:$0xf] %vm628_vm0, %v614_v12  ;;  %v615_v18 = vsel %vm556_vm5, %v6037_v33, %v497_v8  ;;  %vm558_vm8 = vmpackc.low %vm6157_vm7, %vm6157_vm7  ;;  %vm6173_vm9 = vcmp.gt.f32.partialorder %v323_v7, 0.0  ;;  %v441_v20 = vmul.f32 0.20019531, %v323_v7 }
  0x42   : > { %vm6177_vm10 = vcmp.gt.f32.partialorder %v324_v9, 0.0  ;;  %675 = vst.msk [vmem:[#allocation2 + $0xb8] sm:$0xf] %vm628_vm0, %v615_v18  ;;  %v616_v22 = vsel %vm557_vm6, %v262_v42, %v498_v13  ;;  %vm559_vm11 = vmpackc.low %vm6173_vm9, %vm6173_vm9  ;;  %v442_v24 = vmul.f32 0.20019531, %v324_v9  ;;  %vm6190_vm12 = vcmp.gt.f32.partialorder %v325_v10, 0.0 }
  0x43   : > { %v499_v23 = vpack.c.bf16 %v440_v15, %v440_v15  ;;  %676 = vst.msk [vmem:[#allocation2 + $0xbc] sm:$0xf] %vm628_vm0, %v616_v22  ;;  %v500_v27 = vpack.c.bf16 %v441_v20, %v441_v20  ;;  %vm560_vm13 = vmpackc.low %vm6177_vm10, %vm6177_vm10  ;;  %v443_v28 = vmul.f32 0.20019531, %v325_v10  ;;  %vm6199_vm14 = vcmp.gt.f32.partialorder %v326_v11, 0.0 }
  0x44   : > { %v444_v30 = vmul.f32 0.20019531, %v326_v11  ;;  %v501_v32 = vpack.c.bf16 %v442_v24, %v442_v24  ;;  %vm561_vm15 = vmpackc.low %vm6190_vm12, %vm6190_vm12  ;;  %v327_v33 = vunpack.c.l.bf16 %v268_v16  ;;  %v328_v34 = vunpack.c.l.bf16 %v269_v17 }
  0x45   : > { %v617_v31 = vsel %vm558_vm8, %v6080_v47, %v499_v23  ;;  %v618_v36 = vsel %vm559_vm11, %v6093_v52, %v500_v27  ;;  %v502_v37 = vpack.c.bf16 %v443_v28, %v443_v28  ;;  %vm562_vm1 = vmpackc.low %vm6199_vm14, %vm6199_vm14  ;;  %v329_v39 = vunpack.c.l.bf16 %v270_v26 }
  0x46   : > { %677 = vst.msk [vmem:[#allocation2 + $0xc0] sm:$0xf] %vm628_vm0, %v617_v31  ;;  %v503_v38 = vpack.c.bf16 %v444_v30, %v444_v30  ;;  %v619_v40 = vsel %vm560_vm13, %v6096_v53, %v501_v32  ;;  %vm6230_vm2 = vcmp.gt.f32.partialorder %v327_v33, 0.0  ;;  %v445_v42 = vmul.f32 0.20019531, %v327_v33 }
  0x47   : > { %678 = vst.msk [vmem:[#allocation2 + $0xc4] sm:$0xf] %vm628_vm0, %v618_v36  ;;  %vm6234_vm3 = vcmp.gt.f32.partialorder %v328_v34, 0.0  ;;  %v620_v44 = vsel %vm561_vm15, %v6109_v58, %v502_v37  ;;  %vm563_vm4 = vmpackc.low %vm6230_vm2, %vm6230_vm2  ;;  %v446_v46 = vmul.f32 0.20019531, %v328_v34  ;;  %vm6249_vm5 = vcmp.gt.f32.partialorder %v329_v39, 0.0 }
  0x48   : > { %679 = vst.msk [vmem:[#allocation2 + $0xc8] sm:$0xf] %vm628_vm0, %v619_v40  ;;  %v621_v45 = vsel %vm562_vm1, %v6112_v59, %v503_v38  ;;  %v504_v48 = vpack.c.bf16 %v445_v42, %v445_v42  ;;  %vm564_vm6 = vmpackc.low %vm6234_vm3, %vm6234_vm3  ;;  %v447_v49 = vmul.f32 0.20019531, %v329_v39  ;;  %v330_v50 = vunpack.c.l.bf16 %v271_v35 }
  0x49   : > { %680 = vst.msk [vmem:[#allocation2 + $0xcc] sm:$0xf] %vm628_vm0, %v620_v44  ;;  %v505_v51 = vpack.c.bf16 %v446_v46, %v446_v46  ;;  %vm565_vm7 = vmpackc.low %vm6249_vm5, %vm6249_vm5 }
  0x4a   : > { %681 = vst.msk [vmem:[#allocation2 + $0xd0] sm:$0xf] %vm628_vm0, %v621_v45  ;;  %v622_v52 = vsel %vm563_vm4, %v268_v16, %v504_v48  ;;  %v506_v53 = vpack.c.bf16 %v447_v49, %v447_v49  ;;  %vm389_vm8 = vcmp.gt.f32.partialorder %v330_v50, 0.0  ;;  %v448_v54 = vmul.f32 0.20019531, %v330_v50 }
  0x4b   : > { %682 = vst.msk [vmem:[#allocation2 + $0xd4] sm:$0xf] %vm628_vm0, %v622_v52  ;;  %v623_v55 = vsel %vm564_vm6, %v269_v17, %v505_v51  ;;  %vm566_vm9 = vmpackc.low %vm389_vm8, %vm389_vm8 }
  0x4c   : > { %683 = vst.msk [vmem:[#allocation2 + $0xd8] sm:$0xf] %vm628_vm0, %v623_v55  ;;  %v624_v56 = vsel %vm565_vm7, %v270_v26, %v506_v53  ;;  %v507_v57 = vpack.c.bf16 %v448_v54, %v448_v54 }
  0x4d   : > { %684 = vst.msk [vmem:[#allocation2 + $0xdc] sm:$0xf] %vm628_vm0, %v624_v56 }
  0x4e   : > { %v625_v58 = vsel %vm566_vm9, %v271_v35, %v507_v57 }
  0x4f   : > { %685 = vst.msk [vmem:[#allocation2 + $0xe0] sm:$0xf] %vm628_vm0, %v625_v58 }
  0x50 PF: > { %s5092_s30 = smul.u32 288, %s5572_s15  ;;  %v6272_v60 = vld [vmem:[#allocation2 + $0x40] sm:$0xf]  ;;  %v801_v61 = vld [vmem:[#allocation2 + $0x3c] sm:$0x8]  ;;  %v6276_v1 = vld [vmem:[#allocation2 + $0x64] sm:$0xff]  ;;  %s4050_s10 = scalar_lea.vmem %s7662_s2, %s5572_s15 }
  0x51   : > { %v839_v63 = vunpack.c.l.b16 %v801_v61  ;;  %v840_v0 = vunpack.c.l.b16 %v6272_v60  ;;  %v6278_v2 = vld [vmem:[#allocation2 + $0x6c] sm:$0xff]  ;;  %v6283_v5 = vld [vmem:[#allocation2 + $0x94] sm:$0xff]  ;;  %v6285_v6 = vld [vmem:[#allocation2 + $0x44] sm:$0xff]  ;;  %v905_v8 = vrot.slane %v6276_v1, 3  ;;  %vm895_vm0 = vcmask 1044480   ;;  %p5088_p7 = scmp.ge.s32.totalorder %s5572_s15, 2 }
  0x52   : > { %s6269_s7 = scalar_lea.vmem %s7661_s1, %s5092_s30  ;;  %v6281_v4 = vld [vmem:[#allocation2 + $0x8c] sm:$0xff]  ;;  %v907_v10 = vrot.slane %v6278_v2, 3  ;;  %v917_v12 = vrot.slane %v6283_v5, 3  ;;  %v6296_v13 = vld [vmem:[#allocation2 + $0xb4] sm:$0xff]  ;;  %v5144_v14 = vld [vmem:[#allocation2 + $0xbc] sm:$0xff]  ;;  %v897_v17 = vrot.slane %v6285_v6, 3 }
  0x53   : > { %v5100_v59 = vld [vmem:[%s6269_s7 + $0x38] sm:$0xff]  ;;  %v5099_v62 = vld [vmem:[%s6269_s7 + $0x30] sm:$0xff]  ;;  %v5098_v3 = vld [vmem:[%s6269_s7 + $0x28] sm:$0xff]  ;;  %v6289_v7 = vpack.c.b16 %v840_v0, %v839_v63  ;;  %v915_v11 = vrot.slane %v6281_v4, 3  ;;  %vm957_vm10 = vcmask 523264   ;;  %v925_v22 = vrot.slane %v6296_v13, 3 }
  0x54   : > { %5457 = vmatpush.bf16.msra.mxu1 %v5100_v59  ;;  %5458 = vmatpush.bf16.msra.mxu2 %v5100_v59  ;;  %v5097_v9 = vld [vmem:[%s6269_s7 + $0x20] sm:$0xff]  ;;  %v5104_v15 = vld [vmem:[%s6269_s7 + $0x58] sm:$0xff]  ;;  %v908_v20 = vsel %vm895_vm0, %v905_v8, %v907_v10  ;;  %v927_v23 = vrot.slane %v5144_v14, 3  ;;  %v5103_v25 = vld [vmem:[%s6269_s7 + $0x50] sm:$0xff]  ;;  %vm1114_vm11 = vsmask.f32 5376 }
  0x55   : > { %1016 = vmatpush.bf16.msra.mxu0 %v5100_v59  ;;  %5459 = vmatpush.bf16.msra.mxu3 %v5100_v59  ;;  %v896_v16 = vrot.slane %v6289_v7, 3  ;;  %v5096_v18 = vld [vmem:[%s6269_s7 + $0x18] sm:$0xff]  ;;  %v918_v21 = vsel %vm895_vm0, %v915_v11, %v917_v12  ;;  %v5095_v26 = vld [vmem:[%s6269_s7 + $0x10] sm:$0xff]  ;;  %v5102_v30 = vld [vmem:[%s6269_s7 + $0x48] sm:$0xff]  ;;  %vm1466_vm12 = vsmask.f32 4352 }
  0x56   : > { %v5112_v19 = vld [vmem:[%s6269_s7 + $0x98] sm:$0xff]  ;;  %v5111_v27 = vld [vmem:[%s6269_s7 + $0x90] sm:$0xff]  ;;  %v928_v28 = vsel %vm895_vm0, %v925_v22, %v927_v23  ;;  %v5094_v31 = vld [vmem:[%s6269_s7 + $0x8] sm:$0xff]  ;;  %vm3496_vm13 = vcmask 1046528   ;;  %vm2639_vm14 = vsmask.f32 7424 }
  0x57   : > { %v898_v24 = vsel %vm895_vm0, %v896_v16, %v897_v17  ;;  %v5108_v29 = vld [vmem:[%s6269_s7 + $0x78] sm:$0xff]  ;;  %v5107_v34 = vld [vmem:[%s6269_s7 + $0x70] sm:$0xff]  ;;  %v5145_v38 = vld [vmem:[#allocation2 + $0xc4] sm:$0xff]  ;;  %vm3751_vm15 = vsmask.f32 6400 }
  0x58   : > { %5460 = vmatpush.bf16.msra.mxu1 %v5099_v62  ;;  %5461 = vmatpush.bf16.msra.mxu2 %v5099_v62  ;;  %v6324_v32 = vld [vmem:[#allocation2 + $0x74] sm:$0xff]  ;;  %v6326_v33 = vld [vmem:[#allocation2 + $0x9c] sm:$0xff]  ;;  %v6329_v35 = vld [vmem:[#allocation2 + $0x4c] sm:$0xff]  ;;  %v929_v43 = vrot.slane %v5145_v38, 3 }
  0x59   : > { %1017 = vmatpush.bf16.msra.mxu0 %v5099_v62  ;;  %5462 = vmatpush.bf16.msra.mxu3 %v5099_v62  ;;  %v909_v36 = vrot.slane %v6324_v32, 3  ;;  %v919_v37 = vrot.slane %v6326_v33, 3  ;;  %v899_v39 = vrot.slane %v6329_v35, 3  ;;  %v6334_v40 = vld [vmem:[#allocation2 + $0x84] sm:$0xff]  ;;  %v800_v50 = vld [vmem:[#allocation2 + $0xcc] sm:$0x7] }
  0x5a   : > { %v913_v45 = vrot.slane %v6334_v40, 3  ;;  %v930_v46 = vsel %vm895_vm0, %v927_v23, %v929_v43  ;;  %v5110_v47 = vld [vmem:[%s6269_s7 + $0x88] sm:$0xff]  ;;  %v5101_v51 = vld [vmem:[%s6269_s7 + $0x40] sm:$0xff]  ;;  %v875_v54 = vunpack.c.l.b16 %v800_v50  ;;  %v6359_v55 = vld [vmem:[#allocation2 + $0x54] sm:$0xff]  ;;  %v1124_v23 = vshrl.u32 %v6285_v6, 16 }
  0x5b   : > { %v910_v41 = vsel %vm895_vm0, %v907_v10, %v909_v36  ;;  %v920_v42 = vsel %vm895_vm0, %v917_v12, %v919_v37  ;;  %v900_v44 = vsel %vm895_vm0, %v897_v17, %v899_v39  ;;  %v5106_v48 = vld [vmem:[%s6269_s7 + $0x68] sm:$0xff]  ;;  %v6355_v52 = vld [vmem:[#allocation2 + $0x7c] sm:$0xff]  ;;  %v901_v59 = vrot.slane %v6359_v55, 3  ;;  %v5370_v14 = vld [vmem:[#allocation2 + $0x44] sm:$0x8] }
  0x5c   : > { %5463 = vmatpush.bf16.msra.mxu1 %v5098_v3  ;;  %5464 = vmatpush.bf16.msra.mxu2 %v5098_v3  ;;  %v6351_v49 = vsel %vm895_vm0, %v913_v45, %v915_v11  ;;  %v6357_v53 = vld [vmem:[#allocation2 + $0xa4] sm:$0xff]  ;;  %v911_v56 = vrot.slane %v6355_v52, 3  ;;  %v6363_v58 = vpack.c.b16 %v875_v54, %v875_v54  ;;  %v6366_v61 = vld [vmem:[#allocation2 + $0x5c] sm:$0xff]  ;;  %v1475_v50 = vrot.slane %v1124_v23, 3 }
  0x5d   : > { %1018 = vmatpush.bf16.msra.mxu0 %v5098_v3  ;;  %5465 = vmatpush.bf16.msra.mxu3 %v5098_v3  ;;  %v921_v57 = vrot.slane %v6357_v53, 3  ;;  %v903_v10 = vrot.slane %v6366_v61, 3  ;;  %v5093_v11 = vld [vmem:[%s6269_s7] sm:$0xff] }
  0x5e   : > { %v912_v62 = vsel %vm895_vm0, %v909_v36, %v911_v56  ;;  %v931_v3 = vrot.slane %v6363_v58, 3  ;;  %v5105_v17 = vld [vmem:[%s6269_s7 + $0x60] sm:$0xff]  ;;  %v914_v54 = vsel %vm895_vm0, %v911_v56, %v913_v45  ;;  %v5120_v45 = vld [vmem:[%s6269_s7 + $0xd8] sm:$0xff] }
  0x5f   : > { %v922_v63 = vsel %vm895_vm0, %v919_v37, %v921_v57  ;;  %v6379_v12 = vsel %vm895_vm0, %v903_v10, %v905_v8 }
  0x60   : > { %5466 = vmatpush.bf16.msra.mxu1 %v5097_v9  ;;  %5467 = vmatpush.bf16.msra.mxu2 %v5097_v9  ;;  %v932_v16 = vsel %vm895_vm0, %v929_v43, %v931_v3  ;;  %v1468_v43 = vshrl.u32 %v6289_v7, 16 }
  0x61   : > { %1019 = vmatpush.bf16.msra.mxu0 %v5097_v9  ;;  %5468 = vmatpush.bf16.msra.mxu3 %v5097_v9  ;;  %v902_v9 = vsel %vm895_vm0, %v899_v39, %v901_v59 }
  0x62   : > { %v1470_v60 = vrot.slane %v1468_v43, 3 }
  0x63   : > { %4663 = vmatmul.msk.bf16.vlgmr.msra.gmra.mxu1 %vm957_vm10, %v908_v20  ;;  %4668 = vmatmul.msk.bf16.vlgmr.msra.gmra.mxu2 %vm957_vm10, %v918_v21  ;;  %v764_v21 = vld [vmem:[#allocation2 + $0x3c] sm:$0xc] }
  0x64   : > { %1634 = vmatpush.bf16.msrb.mxu2 %v5104_v15  ;;  %1367 = vmatpush.bf16.msrb.mxu1 %v5096_v18  ;;  %v5470_v15 = vld [vmem:[#allocation2 + $0x44] sm:$0xf0]   ;;  %v5109_v18 = vld [vmem:[%s6269_s7 + $0x80] sm:$0xff] }
  0x65   : > { %2378 = vmatpush.bf16.msrb.mxu0 %v5112_v19  ;;  %4673 = vmatmul.msk.bf16.vlgmr.msra.gmra.mxu3 %vm957_vm10, %v928_v28  ;;  %v5472_v19 = vld [vmem:[#allocation2 + $0x4c] sm:$0xff]   ;;  %v5371_v20 = vor.u32 %v5470_v15, %v5370_v14  ;;  %v904_v14 = vsel %vm895_vm0, %v901_v59, %v903_v10  ;;  %v1136_v59 = vshll.u32 %v6329_v35, 16  ;;  %v5128_v10 = vld [vmem:[%s6269_s7 + $0x118] sm:$0xff] }
  0x66   : > { %4658 = vmatmul.msk.bf16.vlgmr.msra.gmra.mxu0 %vm957_vm10, %v898_v24  ;;  %2147 = vmatpush.bf16.msrb.mxu3 %v5108_v29  ;;  %v1127_v24 = vshll.u32 %v6285_v6, 16  ;;  %v1904_v28 = vshrl.u32 %v5472_v19, 16  ;;  %v1907_v29 = vshll.u32 %v5472_v19, 16  ;;  %v1133_v19 = vshrl.u32 %v6329_v35, 16 }
  0x67   : > { %v1896_v8 = vshrl.u32 %v5371_v20, 16 }
  0x68   : > { %1635 = vmatpush.bf16.msrb.mxu2 %v5103_v25  ;;  %1368 = vmatpush.bf16.msrb.mxu1 %v5095_v26  ;;  %v6387_v25 = vld [vmem:[#allocation2 + $0xac] sm:$0xff]  ;;  %v1899_v26 = vshll.u32 %v5371_v20, 16  ;;  %v1135_v20 = vrot.slane %v1133_v19, 2 }
  0x69   : > { %2379 = vmatpush.bf16.msrb.mxu0 %v5111_v27  ;;  %v1112_v27 = vunpack.c.l.b16 %v764_v21  ;;  %v923_v36 = vrot.slane %v6387_v25, 3  ;;  %v1898_v37 = vrot.slane %v1896_v8, 3  ;;  %v1138_v21 = vrot.slane %v1136_v59, 3 }
  0x6a   : > { %2148 = vmatpush.bf16.msrb.mxu3 %v5107_v34  ;;  %v1129_v34 = vrot.slane %v1127_v24, 3  ;;  %v1901_v6 = vrot.slane %v1899_v26, 4 }
  0x6b   : > { %v1139_v8 = vor.u32 %v1138_v21, %v1135_v20  ;;  %v926_v35 = vsel %vm895_vm0, %v923_v36, %v925_v22 }
  0x6c   : > { %1636 = vmatpush.bf16.msrb.mxu2 %v5102_v30  ;;  %1369 = vmatpush.bf16.msrb.mxu1 %v5094_v31  ;;  %v1113_v30 = vpack.c.b16 %v840_v0, %v1112_v27  ;;  %v1126_v31 = vrot.slane %v1124_v23, 2  ;;  %v1902_v3 = vor.u32 %v1901_v6, %v1898_v37 }
  0x6d   : > { %2380 = vmatpush.bf16.msrb.mxu0 %v5110_v47 }
  0x6e   : > { %2149 = vmatpush.bf16.msrb.mxu3 %v5106_v48  ;;  %v1116_v38 = vshrl.u32 %v1113_v30, 16  ;;  %v1119_v39 = vshll.u32 %v1113_v30, 16  ;;  %v1130_v48 = vor.u32 %v1129_v34, %v1126_v31  ;;  %v1480_v30 = vrot.slane %v1136_v59, 4 }
  0x70   : > { %1637 = vmatpush.bf16.msrb.mxu2 %v5101_v51  ;;  %1370 = vmatpush.bf16.msrb.mxu1 %v5093_v11  ;;  %v1121_v47 = vrot.slane %v1119_v39, 3  ;;  %v1476_v51 = vrot.slane %v1127_v24, 4  ;;  %v1140_v26 = vsel %vm1114_vm11, %v1130_v48, %v1139_v8 }
  0x71   : > { %2381 = vmatpush.bf16.msrb.mxu0 %v5109_v18  ;;  %v5474_v18 = vld [vmem:[#allocation2 + $0x54] sm:$0xff]  }
  0x72   : > { %2150 = vmatpush.bf16.msrb.mxu3 %v5105_v17  ;;  %v1477_v11 = vor.u32 %v1476_v51, %v1475_v50  ;;  %v5116_v17 = vld [vmem:[%s6269_s7 + $0xb8] sm:$0xff]  ;;  %v1913_v23 = vshrl.u32 %v5474_v18, 16  ;;  %v1916_v24 = vshll.u32 %v5474_v18, 16  ;;  %v1145_v50 = vshll.u32 %v6359_v55, 16 }
  0x73   : > { %4664 = vmatmul.msk.bf16.gmra.mxu1 %vm957_vm10, %v910_v41  ;;  %4669 = vmatmul.msk.bf16.gmra.mxu2 %vm957_vm10, %v920_v42  ;;  %v1906_v41 = vrot.slane %v1904_v28, 3  ;;  %v1909_v42 = vrot.slane %v1907_v29, 4  ;;  %v1479_v29 = vrot.slane %v1133_v19, 3  ;;  %v1151_v18 = vshrl.u32 %v6366_v61, 16 }
  0x74   : > { %3361 = vmatpush.bf16.msra.mxu2 %v5120_v45  ;;  %2870 = vmatpush.bf16.msra.mxu1 %v5116_v17  ;;  %v1915_v27 = vrot.slane %v1913_v23, 3  ;;  %v1918_v28 = vrot.slane %v1916_v24, 4  ;;  %v5331_v17 = vld [vmem:[#allocation2 + $0x58] sm:$0xff]   ;;  %v1154_v19 = vshll.u32 %v6366_v61, 16 }
  0x75   : > { %4674 = vmatmul.msk.bf16.gmra.mxu3 %vm957_vm10, %v930_v46  ;;  %v1118_v46 = vrot.slane %v1116_v38, 2  ;;  %3919 = vmatpush.bf16.msra.mxu0 %v5128_v10  ;;  %v1481_v34 = vor.u32 %v1480_v30, %v1479_v29  ;;  %v5476_v38 = vld [vmem:[#allocation2 + $0x5c] sm:$0xff]   ;;  %v5482_v10 = vld [vmem:[#allocation2 + $0x74] sm:$0xff]   ;;  %v1153_v20 = vrot.slane %v1151_v18, 2  ;;  %v1487_v23 = vrot.slane %v1151_v18, 3 }
  0x76   : > { %4659 = vmatmul.msk.bf16.gmra.mxu0 %vm957_vm10, %v900_v44  ;;  %v1471_v44 = vshll.u32 %v6289_v7, 16  ;;  %v1910_v7 = vor.u32 %v1909_v42, %v1906_v41  ;;  %v1919_v31 = vor.u32 %v1918_v28, %v1915_v27  ;;  %v1922_v13 = vshrl.u32 %v5476_v38, 16  ;;  %v5329_v42 = vld [vmem:[#allocation2 + $0x48] sm:$0xff]   ;;  %v5119_v27 = vld [vmem:[%s6269_s7 + $0xd0] sm:$0xff] }
  0x77   : > { %v1482_v37 = vsel %vm1466_vm12, %v1477_v11, %v1481_v34  ;;  %v1925_v39 = vshll.u32 %v5476_v38, 16  ;;  %v1156_v21 = vrot.slane %v1154_v19, 3  ;;  %v1488_v24 = vrot.slane %v1154_v19, 4  ;;  %v5123_v28 = vld [vmem:[%s6269_s7 + $0xf0] sm:$0xff] }
  0x78   : > { %v1473_v0 = vrot.slane %v1471_v44, 4  ;;  %v1911_v56 = vsel %vm1466_vm12, %v1902_v3, %v1910_v7  ;;  %v1920_v6 = vsel %vm1466_vm12, %v1910_v7, %v1919_v31  ;;  %v1924_v22 = vrot.slane %v1922_v13, 3  ;;  %3362 = vmatpush.bf16.msra.mxu2 %v5119_v27 }
  0x79   : > { %v1484_v7 = vrot.slane %v1145_v50, 4  ;;  %v1157_v29 = vor.u32 %v1156_v21, %v1153_v20  ;;  %v1489_v61 = vor.u32 %v1488_v24, %v1487_v23 }
  0x83   : > { %4665 = vmatmul.msk.bf16.gmra.mxu1 %vm957_vm10, %v912_v62  ;;  %4670 = vmatmul.msk.bf16.gmra.mxu2 %vm957_vm10, %v922_v63  ;;  %v924_v62 = vsel %vm895_vm0, %v921_v57, %v923_v36  ;;  %v1122_v63 = vor.u32 %v1121_v47, %v1118_v46  ;;  %v5124_v57 = vld [vmem:[%s6269_s7 + $0xf8] sm:$0xff]  ;;  %v1927_v36 = vrot.slane %v1925_v39, 4  ;;  %v5332_v39 = vld [vmem:[#allocation2 + $0x60] sm:$0xff]  }
  0x84   : > { %3616 = vmatpush.bf16.msra.mxu3 %v5124_v57 }
  0x85   : > { %4675 = vmatmul.msk.bf16.gmra.mxu3 %vm957_vm10, %v932_v16  ;;  %v1131_v15 = vsel %vm1114_vm11, %v1122_v63, %v1130_v48  ;;  %v1928_v41 = vor.u32 %v1927_v36, %v1924_v22  ;;  %v1147_v63 = vrot.slane %v1145_v50, 3  ;;  %v1160_v22 = vshrl.u32 %v6276_v1, 16 }
  0x86   : > { %4660 = vmatmul.msk.bf16.gmra.mxu0 %vm957_vm10, %v902_v9  ;;  %v1474_v9 = vor.u32 %v1473_v0, %v1470_v60  ;;  %v5330_v60 = vld [vmem:[#allocation2 + $0x50] sm:$0xff]   ;;  %v1142_v0 = vshrl.u32 %v6359_v55, 16  ;;  %v1163_v36 = vshll.u32 %v6276_v1, 16 }
  0x88   : > { %v1478_v16 = vsel %vm1466_vm12, %v1474_v9, %v1477_v11  ;;  %v1483_v3 = vrot.slane %v1142_v0, 3  ;;  %3617 = vmatpush.bf16.msra.mxu3 %v5123_v28 }
  0x93   : > { %4666 = vmatmul.msk.bf16.gmra.mxu1 %vm957_vm10, %v914_v54  ;;  %4671 = vmatmul.msk.bf16.gmra.mxu2 %vm957_vm10, %v924_v62  ;;  %v5480_v54 = vld [vmem:[#allocation2 + $0x6c] sm:$0xff]   ;;  %v1144_v62 = vrot.slane %v1142_v0, 2 }
  0x94   : > { %v1940_v9 = vshrl.u32 %v5480_v54, 16  ;;  %v1943_v11 = vshll.u32 %v5480_v54, 16 }
  0x95   : > { %4760 = vmatmul.msk.bf16.vlgmr.msrb.gmra.mxu3 %vm957_vm10, %v1911_v56 }
  0x96   : > { %4661 = vmatmul.msk.bf16.gmra.mxu0 %vm957_vm10, %v904_v14  ;;  %v1148_v14 = vor.u32 %v1147_v63, %v1144_v62  ;;  %v1945_v45 = vrot.slane %v1943_v11, 4 }
  0x98   : > { %v1149_v56 = vsel %vm1114_vm11, %v1139_v8, %v1148_v14  ;;  %v1949_v8 = vshrl.u32 %v5482_v10, 16 }
  0x9a   : > { %v1951_v30 = vrot.slane %v1949_v8, 3 }
  0xa3   : > { %4667 = vmatmul.msk.bf16.gmra.mxu1 %vm957_vm10, %v6351_v49  ;;  %4672 = vmatmul.msk.bf16.gmra.mxu2 %vm957_vm10, %v926_v35  ;;  %v1929_v49 = vsel %vm1466_vm12, %v1919_v31, %v1928_v41  ;;  %v5115_v31 = vld [vmem:[%s6269_s7 + $0xb0] sm:$0xff] }
  0xa4   : > { %2871 = vmatpush.bf16.msra.mxu1 %v5115_v31 }
  0xa5   : > { %4761 = vmatmul.msk.bf16.gmra.mxu3 %vm957_vm10, %v1920_v6 }
  0xa6   : > { %4662 = vmatmul.msk.bf16.gmra.mxu0 %vm957_vm10, %v6379_v12  ;;  %v5478_v12 = vld [vmem:[#allocation2 + $0x64] sm:$0xff]  }
  0xa7   : > { %v1931_v43 = vshrl.u32 %v5478_v12, 16  ;;  %v1934_v44 = vshll.u32 %v5478_v12, 16 }
  0xa9   : > { %v1933_v46 = vrot.slane %v1931_v43, 3  ;;  %v1936_v47 = vrot.slane %v1934_v44, 4  ;;  %v1162_v43 = vrot.slane %v1160_v22, 2  ;;  %v1165_v44 = vrot.slane %v1163_v36, 3 }
  0xab   : > { %v1937_v48 = vor.u32 %v1936_v47, %v1933_v46  ;;  %v1491_v47 = vrot.slane %v1160_v22, 3  ;;  %v1178_v22 = vshrl.u32 %v6324_v32, 16 }
  0xad   : > { %v1938_v51 = vsel %vm1466_vm12, %v1928_v41, %v1937_v48 }
  0xb3   : > { %4692 = vmatmul.msk.bf16.vlgmr.msrb.gmra.mxu1 %vm957_vm10, %v1131_v15  ;;  %4726 = vmatmul.msk.bf16.vlgmr.msrb.gmra.mxu2 %vm957_vm10, %v1478_v16  ;;  %v1485_v15 = vor.u32 %v1484_v7, %v1483_v3  ;;  %v1942_v16 = vrot.slane %v1940_v9, 3 }
  0xb5   : > { %4762 = vmatmul.msk.bf16.gmra.mxu3 %vm957_vm10, %v1929_v49  ;;  %v1486_v55 = vsel %vm1466_vm12, %v1481_v34, %v1485_v15  ;;  %v1946_v57 = vor.u32 %v1945_v45, %v1942_v16  ;;  %v1490_v6 = vsel %vm1466_vm12, %v1485_v15, %v1489_v61  ;;  %v5484_v49 = vld [vmem:[#allocation2 + $0x7c] sm:$0xff]   ;;  %v5333_v16 = vld [vmem:[#allocation2 + $0x68] sm:$0xff]  }
  0xb6   : > { %4794 = vmatmul.msk.bf16.vlgmr.msrb.gmra.mxu0 %vm957_vm10, %v5329_v42  ;;  %v5127_v42 = vld [vmem:[%s6269_s7 + $0x110] sm:$0xff]  ;;  %v1961_v0 = vshll.u32 %v5484_v49, 16 }
  0xb7   : > { %v1947_v59 = vsel %vm1466_vm12, %v1937_v48, %v1946_v57  ;;  %3920 = vmatpush.bf16.msra.mxu0 %v5127_v42  ;;  %v1492_v48 = vrot.slane %v1163_v36, 4  ;;  %v1181_v36 = vshll.u32 %v6324_v32, 16  ;;  %v5488_v42 = vld [vmem:[#allocation2 + $0x8c] sm:$0xff]  }
  0xb8   : > { %v1963_v63 = vrot.slane %v1961_v0, 4  ;;  %v1976_v0 = vshrl.u32 %v5488_v42, 16 }
  0xb9   : > { %v1493_v54 = vor.u32 %v1492_v48, %v1491_v47  ;;  %v1499_v48 = vrot.slane %v1178_v22, 3 }
  0xbb   : > { %v1494_v11 = vsel %vm1466_vm12, %v1489_v61, %v1493_v54 }
  0xc3   : > { %4693 = vmatmul.msk.bf16.gmra.mxu1 %vm957_vm10, %v1140_v26  ;;  %4727 = vmatmul.msk.bf16.gmra.mxu2 %vm957_vm10, %v1482_v37  ;;  %v1952_v26 = vshll.u32 %v5482_v10, 16  ;;  %v1158_v37 = vsel %vm1114_vm11, %v1148_v14, %v1157_v29 }
  0xc5   : > { %4763 = vmatmul.msk.bf16.gmra.mxu3 %vm957_vm10, %v1938_v51  ;;  %v1954_v35 = vrot.slane %v1952_v26, 4  ;;  %v1166_v51 = vor.u32 %v1165_v44, %v1162_v43  ;;  %v1180_v43 = vrot.slane %v1178_v22, 2  ;;  %v1183_v44 = vrot.slane %v1181_v36, 3 }
  0xc6   : > { %4795 = vmatmul.msk.bf16.gmra.mxu0 %vm957_vm10, %v5330_v60  ;;  %v1958_v60 = vshrl.u32 %v5484_v49, 16 }
  0xc7   : > { %v1955_v38 = vor.u32 %v1954_v35, %v1951_v30  ;;  %v1167_v9 = vsel %vm1114_vm11, %v1157_v29, %v1166_v51 }
  0xc8   : > { %v1960_v62 = vrot.slane %v1958_v60, 3  ;;  %v1500_v60 = vrot.slane %v1181_v36, 4 }
  0xc9   : > { %v1956_v41 = vsel %vm1466_vm12, %v1946_v57, %v1955_v38 }
  0xca   : > { %v1964_v14 = vor.u32 %v1963_v63, %v1960_v62  ;;  %v1184_v62 = vor.u32 %v1183_v44, %v1180_v43  ;;  %v1501_v63 = vor.u32 %v1500_v60, %v1499_v48 }
  0xcc   : > { %v1965_v57 = vsel %vm1466_vm12, %v1955_v38, %v1964_v14  ;;  %v5334_v38 = vld [vmem:[#allocation2 + $0x70] sm:$0xff]  }
  0xd3   : > { %4694 = vmatmul.msk.bf16.gmra.mxu1 %vm957_vm10, %v1149_v56  ;;  %4728 = vmatmul.msk.bf16.gmra.mxu2 %vm957_vm10, %v1486_v55  ;;  %v1169_v56 = vshrl.u32 %v6278_v2, 16  ;;  %v1172_v55 = vshll.u32 %v6278_v2, 16 }
  0xd5   : > { %4764 = vmatmul.msk.bf16.gmra.mxu3 %vm957_vm10, %v1947_v59  ;;  %v1171_v19 = vrot.slane %v1169_v56, 2  ;;  %v1174_v59 = vrot.slane %v1172_v55, 3  ;;  %v1495_v20 = vrot.slane %v1169_v56, 3  ;;  %v1496_v21 = vrot.slane %v1172_v55, 4 }
  0xd6   : > { %4796 = vmatmul.msk.bf16.gmra.mxu0 %vm957_vm10, %v5331_v17  ;;  %v5486_v17 = vld [vmem:[#allocation2 + $0x84] sm:$0xff]  }
  0xd7   : > { %v1967_v23 = vshrl.u32 %v5486_v17, 16  ;;  %v1970_v24 = vshll.u32 %v5486_v17, 16  ;;  %v1175_v26 = vor.u32 %v1174_v59, %v1171_v19  ;;  %v1497_v27 = vor.u32 %v1496_v21, %v1495_v20  ;;  %v5335_v19 = vld [vmem:[#allocation2 + $0x78] sm:$0xff]  }
  0xd8   : > { %v1187_v20 = vshrl.u32 %v6355_v52, 16  ;;  %v1190_v21 = vshll.u32 %v6355_v52, 16 }
  0xd9   : > { %v1969_v28 = vrot.slane %v1967_v23, 3  ;;  %v1972_v29 = vrot.slane %v1970_v24, 4  ;;  %v1176_v35 = vsel %vm1114_vm11, %v1166_v51, %v1175_v26  ;;  %v1498_v31 = vsel %vm1466_vm12, %v1493_v54, %v1497_v27  ;;  %v5490_v24 = vld [vmem:[#allocation2 + $0x94] sm:$0xff]  }
  0xda   : > { %v1979_v51 = vshll.u32 %v5488_v42, 16  ;;  %v1185_v56 = vsel %vm1114_vm11, %v1175_v26, %v1184_v62  ;;  %v1502_v55 = vsel %vm1466_vm12, %v1497_v27, %v1501_v63  ;;  %v1189_v27 = vrot.slane %v1187_v20, 2 }
  0xdb   : > { %v1988_v22 = vshll.u32 %v5490_v24, 16 }
  0xdd   : > { %v1990_v43 = vrot.slane %v1988_v22, 4 }
  0xe0   : > { %v6449_v34 = vpop.f32.mrf.mxu1 }
  0xe3   : > { %v6453_v13 = vpop.f32.mrf.mxu0  ;;  %4695 = vmatmul.msk.bf16.gmra.mxu1 %vm957_vm10, %v1158_v37  ;;  %4729 = vmatmul.msk.bf16.gmra.mxu2 %vm957_vm10, %v1490_v6  ;;  %v1973_v37 = vor.u32 %v1972_v29, %v1969_v28  ;;  %v1192_v28 = vrot.slane %v1190_v21, 3 }
  0xe5   : > { %4765 = vmatmul.msk.bf16.gmra.mxu3 %vm957_vm10, %v1956_v41  ;;  %v1974_v41 = vsel %vm1466_vm12, %v1964_v14, %v1973_v37 }
  0xe6   : > { %4797 = vmatmul.msk.bf16.gmra.mxu0 %vm957_vm10, %v5332_v39  ;;  %v6462_v12 = vpop.f32.mrf.mxu2 }
  0xe8   : > { %v6465_v46 = vpop.f32.mrf.mxu1  ;;  %v6469_v50 = vpop.f32.mrf.mxu3 }
  0xe9   : > { %7748 = vst [vmem:[#allocation3_spill] sm:$0xff] %v6469_v50 }
  0xeb   : > { %v6467_v1 = vpop.f32.mrf.mxu0 }
  0xee   : > { %v6471_v3 = vpop.f32.mrf.mxu2 }
  0xf0   : > { %v6473_v7 = vpop.f32.mrf.mxu1  ;;  %v6479_v45 = vpop.f32.mrf.mxu3 }
  0xf1   : > { %7749 = vst [vmem:[#allocation4_spill] sm:$0xff] %v6479_v45 }
  0xf3   : > { %v6477_v15 = vpop.f32.mrf.mxu0  ;;  %4696 = vmatmul.msk.bf16.gmra.mxu1 %vm957_vm10, %v1167_v9  ;;  %4730 = vmatmul.msk.bf16.gmra.mxu2 %vm957_vm10, %v1494_v11  ;;  %v1978_v9 = vrot.slane %v1976_v0, 3  ;;  %v1981_v11 = vrot.slane %v1979_v51, 4 }
  0xf5   : > { %4766 = vmatmul.msk.bf16.gmra.mxu3 %vm957_vm10, %v1965_v57  ;;  %v1982_v57 = vor.u32 %v1981_v11, %v1978_v9  ;;  %v5336_v11 = vld [vmem:[#allocation2 + $0x80] sm:$0xff]  }
  0xf6   : > { %4798 = vmatmul.msk.bf16.gmra.mxu0 %vm957_vm10, %v5333_v16  ;;  %v6487_v18 = vpop.f32.mrf.mxu2 }
  0xf7   : > { %v1983_v23 = vsel %vm1466_vm12, %v1973_v37, %v1982_v57 }
  0xf8   : > { %v6490_v10 = vpop.f32.mrf.mxu1  ;;  %v6494_v2 = vpop.f32.mrf.mxu3 }
  0xf9   : > { %7750 = vst [vmem:[#allocation5_spill] sm:$0xff] %v6494_v2 }
  0xfb   : > { %v6492_v8 = vpop.f32.mrf.mxu0 }
  0xfe   : > { %v6496_v61 = vpop.f32.mrf.mxu2 }
 0x100   : > { %v6498_v30 = vpop.f32.mrf.mxu1  ;;  %v6504_v39 = vpop.f32.mrf.mxu3 }
 0x101   : > { %7751 = vst [vmem:[#allocation6_spill] sm:$0xff] %v6504_v39 }
 0x103   : > { %v6502_v6 = vpop.f32.mrf.mxu0  ;;  %4697 = vmatmul.msk.bf16.gmra.mxu1 %vm957_vm10, %v1176_v35  ;;  %4731 = vmatmul.msk.bf16.gmra.mxu2 %vm957_vm10, %v1498_v31  ;;  %v1503_v35 = vrot.slane %v1187_v20, 3  ;;  %v1504_v31 = vrot.slane %v1190_v21, 4  ;;  %v5118_v20 = vld [vmem:[%s6269_s7 + $0xc8] sm:$0xff]  ;;  %v5492_v21 = vld [vmem:[#allocation2 + $0x9c] sm:$0xff]  }
 0x104   : > { %3363 = vmatpush.bf16.msra.mxu2 %v5118_v20 }
 0x105   : > { %4767 = vmatmul.msk.bf16.gmra.mxu3 %vm957_vm10, %v1974_v41  ;;  %v1193_v41 = vor.u32 %v1192_v28, %v1189_v27  ;;  %v1505_v37 = vor.u32 %v1504_v31, %v1503_v35  ;;  %v1994_v31 = vshrl.u32 %v5492_v21, 16 }
 0x106   : > { %4799 = vmatmul.msk.bf16.gmra.mxu0 %vm957_vm10, %v5334_v38  ;;  %v6512_v49 = vpop.f32.mrf.mxu2  ;;  %v1985_v38 = vshrl.u32 %v5490_v24, 16 }
 0x107   : > { %v1194_v60 = vsel %vm1114_vm11, %v1184_v62, %v1193_v41  ;;  %v1506_v0 = vsel %vm1466_vm12, %v1501_v63, %v1505_v37  ;;  %v5122_v63 = vld [vmem:[%s6269_s7 + $0xe8] sm:$0xff] }
 0x108   : > { %v6515_v47 = vpop.f32.mrf.mxu1  ;;  %v6519_v32 = vpop.f32.mrf.mxu3  ;;  %v1987_v42 = vrot.slane %v1985_v38, 3  ;;  %3618 = vmatpush.bf16.msra.mxu3 %v5122_v63  ;;  %v1997_v38 = vshll.u32 %v5492_v21, 16 }
 0x109   : > { %7752 = vst [vmem:[#allocation7_spill] sm:$0xff] %v6519_v32  ;;  %v5337_v32 = vld [vmem:[#allocation2 + $0x88] sm:$0xff]  }
 0x10a   : > { %v1991_v51 = vor.u32 %v1990_v43, %v1987_v42  ;;  %v5126_v42 = vld [vmem:[%s6269_s7 + $0x108] sm:$0xff]  ;;  %v1999_v20 = vrot.slane %v1997_v38, 4 }
 0x10b   : > { %v6517_v54 = vpop.f32.mrf.mxu0  ;;  %3921 = vmatpush.bf16.msra.mxu0 %v5126_v42 }
 0x10c   : > { %v1992_v62 = vsel %vm1466_vm12, %v1982_v57, %v1991_v51  ;;  %v5114_v57 = vld [vmem:[%s6269_s7 + $0xa8] sm:$0xff] }
 0x10d   : > { %2872 = vmatpush.bf16.msra.mxu1 %v5114_v57 }
 0x10e   : > { %v6521_v14 = vpop.f32.mrf.mxu2 }
 0x110   : > { %v6523_v16 = vpop.f32.mrf.mxu1  ;;  %v6529_v59 = vpop.f32.mrf.mxu3 }
 0x111   : > { %7753 = vst [vmem:[#allocation8_spill] sm:$0xff] %v6529_v59 }
 0x113   : > { %v6527_v17 = vpop.f32.mrf.mxu0  ;;  %4698 = vmatmul.msk.bf16.gmra.mxu1 %vm957_vm10, %v1185_v56  ;;  %4732 = vmatmul.msk.bf16.gmra.mxu2 %vm957_vm10, %v1502_v55  ;;  %v1196_v55 = vshrl.u32 %v6334_v40, 16 }
 0x115   : > { %4768 = vmatmul.msk.bf16.gmra.mxu3 %vm957_vm10, %v1983_v23  ;;  %v1198_v24 = vrot.slane %v1196_v55, 2 }
 0x116   : > { %4800 = vmatmul.msk.bf16.gmra.mxu0 %vm957_vm10, %v5335_v19  ;;  %v6537_v26 = vpop.f32.mrf.mxu2  ;;  %v1199_v19 = vshll.u32 %v6334_v40, 16  ;;  %v1507_v40 = vrot.slane %v1196_v55, 3 }
 0x118   : > { %v6540_v29 = vpop.f32.mrf.mxu1  ;;  %v6544_v52 = vpop.f32.mrf.mxu3  ;;  %v1201_v27 = vrot.slane %v1199_v19, 3  ;;  %v1508_v35 = vrot.slane %v1199_v19, 4 }
 0x11b   : > { %v6542_v36 = vpop.f32.mrf.mxu0 }
 0x11e   : > { %v6546_v44 = vpop.f32.mrf.mxu2 }
 0x120   : > { %v6548_v48 = vpop.f32.mrf.mxu1  ;;  %v6554_v56 = vpop.f32.mrf.mxu3 }
 0x123   : > { %v6552_v9 = vpop.f32.mrf.mxu0  ;;  %4699 = vmatmul.msk.bf16.gmra.mxu1 %vm957_vm10, %v1194_v60  ;;  %4733 = vmatmul.msk.bf16.gmra.mxu2 %vm957_vm10, %v1506_v0  ;;  %v1202_v60 = vor.u32 %v1201_v27, %v1198_v24  ;;  %v1509_v0 = vor.u32 %v1508_v35, %v1507_v40  ;;  %v1205_v24 = vshrl.u32 %v6281_v4, 16  ;;  %v1208_v27 = vshll.u32 %v6281_v4, 16 }
 0x125   : > { %4769 = vmatmul.msk.bf16.gmra.mxu3 %vm957_vm10, %v1992_v62  ;;  %v1203_v55 = vsel %vm1114_vm11, %v1193_v41, %v1202_v60  ;;  %v1510_v19 = vsel %vm1466_vm12, %v1505_v37, %v1509_v0  ;;  %v5494_v41 = vld [vmem:[#allocation2 + $0xa4] sm:$0xff]   ;;  %v1207_v38 = vrot.slane %v1205_v24, 2  ;;  %v1210_v57 = vrot.slane %v1208_v27, 3 }
 0x126   : > { %4801 = vmatmul.msk.bf16.gmra.mxu0 %vm957_vm10, %v5336_v11  ;;  %v6564_v23 = vpop.f32.mrf.mxu2  ;;  %v1996_v11 = vrot.slane %v1994_v31, 3 }
 0x127   : > { %7754 = vst [vmem:[#allocation9_spill] sm:$0xff] %v6564_v23  ;;  %v1211_v45 = vor.u32 %v1210_v57, %v1207_v38  ;;  %v5338_v23 = vld [vmem:[#allocation2 + $0x90] sm:$0xff]  }
 0x128   : > { %v6567_v28 = vpop.f32.mrf.mxu1  ;;  %v6573_v43 = vpop.f32.mrf.mxu3  ;;  %v2000_v21 = vor.u32 %v1999_v20, %v1996_v11  ;;  %v1511_v11 = vrot.slane %v1205_v24, 3  ;;  %v1512_v20 = vrot.slane %v1208_v27, 4 }
 0x129   : > { %v1212_v24 = vsel %vm1114_vm11, %v1202_v60, %v1211_v45 }
 0x12a   : > { %v2001_v40 = vsel %vm1466_vm12, %v1991_v51, %v2000_v21 }
 0x12b   : > { %v6569_v22 = vpop.f32.mrf.mxu0 }
 0x12e   : > { %v6575_v63 = vpop.f32.mrf.mxu2 }
 0x12f   : > { %7755 = vst [vmem:[#allocation10_spill] sm:$0xff] %v6575_v63 }
 0x130   : > { %v1372_v62 = vpop.f32.mrf.mxu1  ;;  %v6579_v39 = vpop.f32.mrf.mxu3 }
 0x131   : > { %v1373_v37 = vadd.f32 %v1372_v62, %v6453_v13  ;;  %v1513_v13 = vor.u32 %v1512_v20, %v1511_v11 }
 0x133   : > { %v2383_v59 = vpop.f32.mrf.mxu0  ;;  %4700 = vmatmul.msk.bf16.gmra.mxu1 %vm957_vm10, %v1203_v55  ;;  %4734 = vmatmul.msk.bf16.gmra.mxu2 %vm957_vm10, %v1510_v19  ;;  %v2003_v55 = vshrl.u32 %v5494_v41, 16  ;;  %v2006_v19 = vshll.u32 %v5494_v41, 16  ;;  %v1514_v27 = vsel %vm1466_vm12, %v1509_v0, %v1513_v13  ;;  %v5496_v0 = vld [vmem:[#allocation2 + $0xac] sm:$0xff]  }
 0x135   : > { %4770 = vmatmul.msk.bf16.gmra.mxu3 %vm957_vm10, %v2001_v40  ;;  %v2005_v62 = vrot.slane %v2003_v55, 3 }
 0x136   : > { %4802 = vmatmul.msk.bf16.gmra.mxu0 %vm957_vm10, %v5337_v32  ;;  %v1639_v35 = vpop.f32.mrf.mxu2 }
 0x137   : > { %v1729_v31 = vadd.f32 %v1639_v35, %v1373_v37  ;;  %v2008_v37 = vrot.slane %v2006_v19, 4 }
 0x138   : > { %v1374_v42 = vpop.f32.mrf.mxu1  ;;  %v6590_v32 = vpop.f32.mrf.mxu3 }
 0x139   : > { %v2242_v4 = vadd.f32 %v6544_v52, %v1729_v31  ;;  %v1375_v35 = vadd.f32 %v1374_v42, %v6467_v1  ;;  %v2009_v41 = vor.u32 %v2008_v37, %v2005_v62  ;;  %v1214_v1 = vshrl.u32 %v6283_v5, 16 }
 0x13a   : > { %v2012_v62 = vshrl.u32 %v5496_v0, 16 }
 0x13b   : > { %v2385_v2 = vpop.f32.mrf.mxu0  ;;  %v6592_v51 = vadd.f32 %v2383_v59, %v2242_v4  ;;  %v2010_v60 = vsel %vm1466_vm12, %v2000_v21, %v2009_v41  ;;  %v1216_v11 = vrot.slane %v1214_v1, 2  ;;  %v1515_v19 = vrot.slane %v1214_v1, 3 }
 0x13e   : > { %v1641_v50 = vpop.f32.mrf.mxu2 }
 0x13f   : > { %v1730_v40 = vadd.f32 %v1641_v50, %v1375_v35  ;;  %v1217_v50 = vshll.u32 %v6283_v5, 16  ;;  %v2015_v5 = vshll.u32 %v5496_v0, 16 }
 0x140   : > { %v1377_v63 = vpop.f32.mrf.mxu1  ;;  %v6598_v59 = vpop.f32.mrf.mxu3 }
 0x141   : > { %v2243_v52 = vadd.f32 %v6554_v56, %v1730_v40  ;;  %v1378_v56 = vadd.f32 %v1377_v63, %v6477_v15  ;;  %v1219_v20 = vrot.slane %v1217_v50, 3  ;;  %v1516_v4 = vrot.slane %v1217_v50, 4 }
 0x142   : > { %v2014_v63 = vrot.slane %v2012_v62, 3  ;;  %v2017_v40 = vrot.slane %v2015_v5, 4 }
 0x143   : > { %v2388_v31 = vpop.f32.mrf.mxu0  ;;  %4701 = vmatmul.msk.bf16.gmra.mxu1 %vm957_vm10, %v1212_v24  ;;  %4735 = vmatmul.msk.bf16.gmra.mxu2 %vm957_vm10, %v1514_v27  ;;  %v6604_v38 = vadd.f32 %v2385_v2, %v2243_v52  ;;  %v1220_v35 = vor.u32 %v1219_v20, %v1216_v11  ;;  %v1517_v15 = vor.u32 %v1516_v4, %v1515_v19 }
 0x144   : > { %v2018_v0 = vor.u32 %v2017_v40, %v2014_v63 }
 0x145   : > { %4771 = vmatmul.msk.bf16.gmra.mxu3 %vm957_vm10, %v2010_v60  ;;  %v1221_v1 = vsel %vm1114_vm11, %v1211_v45, %v1220_v35  ;;  %v1518_v50 = vsel %vm1466_vm12, %v1513_v13, %v1517_v15  ;;  %v5498_v13 = vld [vmem:[#allocation2 + $0xb4] sm:$0xff]  }
 0x146   : > { %4803 = vmatmul.msk.bf16.gmra.mxu0 %vm957_vm10, %v5338_v23  ;;  %v1644_v57 = vpop.f32.mrf.mxu2  ;;  %v2019_v45 = vsel %vm1466_vm12, %v2009_v41, %v2018_v0  ;;  %v2021_v63 = vshrl.u32 %v5498_v13, 16 }
 0x147   : > { %v1731_v42 = vadd.f32 %v1644_v57, %v1378_v56  ;;  %v5339_v57 = vld [vmem:[#allocation2 + $0x98] sm:$0xff]  }
 0x148   : > { %v1379_v55 = vpop.f32.mrf.mxu1  ;;  %v6611_v23 = vpop.f32.mrf.mxu3 }
 0x149   : > { %v2244_v2 = vadd.f32 %v6573_v43, %v1731_v42  ;;  %v1380_v24 = vadd.f32 %v1379_v55, %v6492_v8  ;;  %v1223_v8 = vshrl.u32 %v6326_v33, 16  ;;  %v1226_v42 = vshll.u32 %v6326_v33, 16 }
 0x14a   : > { %v2024_v33 = vshll.u32 %v5498_v13, 16 }
 0x14b   : > { %v2390_v37 = vpop.f32.mrf.mxu0  ;;  %v6613_v21 = vadd.f32 %v2388_v31, %v2244_v2  ;;  %v1225_v19 = vrot.slane %v1223_v8, 2  ;;  %v1228_v4 = vrot.slane %v1226_v42, 3  ;;  %v1519_v5 = vrot.slane %v1223_v8, 3 }
 0x14c   : > { %v1520_v2 = vrot.slane %v1226_v42, 4 }
 0x14e   : > { %v1646_v27 = vpop.f32.mrf.mxu2 }
 0x14f   : > { %v1732_v52 = vadd.f32 %v1646_v27, %v1380_v24  ;;  %v1229_v27 = vor.u32 %v1228_v4, %v1225_v19 }
 0x150   : > { %v1382_v60 = vpop.f32.mrf.mxu1  ;;  %v6619_v31 = vpop.f32.mrf.mxu3 }
 0x151   : > { %v2245_v43 = vadd.f32 %v6579_v39, %v1732_v52  ;;  %v1383_v39 = vadd.f32 %v1382_v60, %v6502_v6  ;;  %v1521_v6 = vor.u32 %v1520_v2, %v1519_v5  ;;  %v2023_v52 = vrot.slane %v2021_v63, 3 }
 0x152   : > { %v2026_v60 = vrot.slane %v2024_v33, 4  ;;  %v1230_v8 = vsel %vm1114_vm11, %v1220_v35, %v1229_v27 }
 0x153   : > { %v2393_v56 = vpop.f32.mrf.mxu0  ;;  %4702 = vmatmul.msk.bf16.gmra.mxu1 %vm957_vm10, %v1221_v1  ;;  %4736 = vmatmul.msk.bf16.gmra.mxu2 %vm957_vm10, %v1518_v50  ;;  %v6625_v11 = vadd.f32 %v2390_v37, %v2245_v43  ;;  %v1522_v42 = vsel %vm1466_vm12, %v1517_v15, %v1521_v6 }
 0x155   : > { %4772 = vmatmul.msk.bf16.gmra.mxu3 %vm957_vm10, %v2019_v45  ;;  %v2027_v45 = vor.u32 %v2026_v60, %v2023_v52  ;;  %v5117_v60 = vld [vmem:[%s6269_s7 + $0xc0] sm:$0xff] }
 0x156   : > { %4804 = vmatmul.msk.bf16.gmra.mxu0 %vm957_vm10, %v5339_v57  ;;  %v1649_v20 = vpop.f32.mrf.mxu2  ;;  %3364 = vmatpush.bf16.msra.mxu2 %v5117_v60 }
 0x157   : > { %v1733_v55 = vadd.f32 %v1649_v20, %v1383_v39  ;;  %v5340_v39 = vld [vmem:[#allocation2 + $0xa0] sm:$0xff]   ;;  %v1235_v20 = vshll.u32 %v6357_v53, 16  ;;  %v2028_v35 = vsel %vm1466_vm12, %v2018_v0, %v2027_v45 }
 0x158   : > { %v1384_v62 = vpop.f32.mrf.mxu1  ;;  %v6632_v24 = vpop.f32.mrf.mxu3  ;;  %v5121_v0 = vld [vmem:[%s6269_s7 + $0xe0] sm:$0xff] }
 0x159   : > { %v2246_v37 = vadd.f32 %v6590_v32, %v1733_v55  ;;  %v1385_v1 = vadd.f32 %v1384_v62, %v6517_v54  ;;  %v1232_v54 = vshrl.u32 %v6357_v53, 16  ;;  %v1237_v5 = vrot.slane %v1235_v20, 3  ;;  %3619 = vmatpush.bf16.msra.mxu3 %v5121_v0 }
 0x15a   : > { %v1524_v53 = vrot.slane %v1235_v20, 4 }
 0x15b   : > { %v2395_v40 = vpop.f32.mrf.mxu0  ;;  %v6634_v41 = vadd.f32 %v2393_v56, %v2246_v37  ;;  %v1234_v62 = vrot.slane %v1232_v54, 2  ;;  %v1523_v63 = vrot.slane %v1232_v54, 3 }
 0x15e   : > { %v1651_v50 = vpop.f32.mrf.mxu2 }
 0x15f   : > { %v1734_v43 = vadd.f32 %v1651_v50, %v1385_v1  ;;  %v1238_v50 = vor.u32 %v1237_v5, %v1234_v62  ;;  %v1244_v62 = vshll.u32 %v6387_v25, 16  ;;  %v5502_v5 = vld [vmem:[#allocation2 + $0xc4] sm:$0xff]  }
 0x160   : > { %v1387_v57 = vpop.f32.mrf.mxu1  ;;  %v6640_v56 = vpop.f32.mrf.mxu3  ;;  %v2039_v60 = vshrl.u32 %v5502_v5, 16  ;;  %v2042_v0 = vshll.u32 %v5502_v5, 16  ;;  %v5547_v5 = vld [vmem:[#allocation2 + $0xb4] sm:$0xff] }
 0x161   : > { %v2247_v32 = vadd.f32 %v6598_v59, %v1734_v43  ;;  %v5500_v59 = vld [vmem:[#allocation2 + $0xbc] sm:$0xff]   ;;  %v1388_v15 = vadd.f32 %v1387_v57, %v6527_v17  ;;  %v1525_v43 = vor.u32 %v1524_v53, %v1523_v63 }
 0x162   : > { %v2030_v33 = vshrl.u32 %v5500_v59, 16  ;;  %v2033_v37 = vshll.u32 %v5500_v59, 16 }
 0x163   : > { %v2398_v13 = vpop.f32.mrf.mxu0  ;;  %4703 = vmatmul.msk.bf16.gmra.mxu1 %vm957_vm10, %v1230_v8  ;;  %4737 = vmatmul.msk.bf16.gmra.mxu2 %vm957_vm10, %v1522_v42  ;;  %v6646_v55 = vadd.f32 %v2395_v40, %v2247_v32  ;;  %v1526_v20 = vsel %vm1466_vm12, %v1521_v6, %v1525_v43 }
 0x164   : > { %v2032_v57 = vrot.slane %v2030_v33, 3  ;;  %v2035_v8 = vrot.slane %v2033_v37, 4  ;;  %v1246_v37 = vrot.slane %v1244_v62, 3 }
 0x165   : > { %4773 = vmatmul.msk.bf16.gmra.mxu3 %vm957_vm10, %v2028_v35 }
 0x166   : > { %4805 = vmatmul.msk.bf16.gmra.mxu0 %vm957_vm10, %v5340_v39  ;;  %v1654_v19 = vpop.f32.mrf.mxu2  ;;  %v2036_v35 = vor.u32 %v2035_v8, %v2032_v57 }
 0x167   : > { %v1735_v4 = vadd.f32 %v1654_v19, %v1388_v15  ;;  %v5113_v19 = vld [vmem:[%s6269_s7 + $0xa0] sm:$0xff] }
 0x168   : > { %v1389_v2 = vpop.f32.mrf.mxu1  ;;  %v6655_v1 = vpop.f32.mrf.mxu3  ;;  %v2037_v6 = vsel %vm1466_vm12, %v2027_v45, %v2036_v35  ;;  %2873 = vmatpush.bf16.msra.mxu1 %v5113_v19 }
 0x169   : > { %v2248_v40 = vadd.f32 %v6611_v23, %v1735_v4  ;;  %v1390_v42 = vadd.f32 %v1389_v2, %v6542_v36  ;;  %v1239_v23 = vsel %vm1114_vm11, %v1229_v27, %v1238_v50  ;;  %v1241_v36 = vshrl.u32 %v6387_v25, 16 }
 0x16b   : > { %v2400_v52 = vpop.f32.mrf.mxu0  ;;  %v6657_v17 = vadd.f32 %v2398_v13, %v2248_v40  ;;  %v5341_v13 = vld [vmem:[#allocation2 + $0xa8] sm:$0xff]   ;;  %v1243_v33 = vrot.slane %v1241_v36, 2  ;;  %v1527_v25 = vrot.slane %v1241_v36, 3 }
 0x16e   : > { %v1656_v32 = vpop.f32.mrf.mxu2 }
 0x16f   : > { %v1736_v39 = vadd.f32 %v1656_v32, %v1390_v42 }
 0x170   : > { %v1392_v54 = vpop.f32.mrf.mxu1  ;;  %v6664_v4 = vpop.f32.mrf.mxu3 }
 0x171   : > { %v2249_v59 = vadd.f32 %v6619_v31, %v1736_v39  ;;  %v5125_v31 = vld [vmem:[%s6269_s7 + $0x100] sm:$0xff]  ;;  %v1393_v2 = vadd.f32 %v1392_v54, %v6552_v9  ;;  %v1247_v9 = vor.u32 %v1246_v37, %v1243_v33  ;;  %v2041_v39 = vrot.slane %v2039_v60, 3 }
 0x172   : > { %3922 = vmatpush.bf16.msra.mxu0 %v5125_v31  ;;  %v2044_v54 = vrot.slane %v2042_v0, 4  ;;  %v5342_v31 = vld [vmem:[#allocation2 + $0xb0] sm:$0xff]  }
 0x173   : > { %v2403_v15 = vpop.f32.mrf.mxu0  ;;  %4704 = vmatmul.msk.bf16.gmra.mxu1 %vm957_vm10, %v1239_v23  ;;  %4738 = vmatmul.msk.bf16.gmra.mxu2 %vm957_vm10, %v1526_v20  ;;  %v6670_v27 = vadd.f32 %v2400_v52, %v2249_v59  ;;  %v1528_v52 = vrot.slane %v1244_v62, 4  ;;  %v1248_v19 = vsel %vm1114_vm11, %v1238_v50, %v1247_v9 }
 0x174   : > { %v2045_v62 = vor.u32 %v2044_v54, %v2041_v39 }
 0x175   : > { %4774 = vmatmul.msk.bf16.gmra.mxu3 %vm957_vm10, %v2037_v6  ;;  %v1529_v32 = vor.u32 %v1528_v52, %v1527_v25 }
 0x176   : > { %4806 = vmatmul.msk.bf16.gmra.mxu0 %vm957_vm10, %v5341_v13  ;;  %v1659_v63 = vpop.f32.mrf.mxu2  ;;  %v2046_v50 = vsel %vm1466_vm12, %v2036_v35, %v2045_v62 }
 0x177   : > { %v1737_v53 = vadd.f32 %v1659_v63, %v1393_v2  ;;  %v1530_v36 = vsel %vm1466_vm12, %v1525_v43, %v1529_v32  ;;  %v1253_v2 = vshll.u32 %v5547_v5, 16  ;;  %v5503_v43 = vld [vmem:[#allocation2 + $0xcc] sm:$0xff]  }
 0x178   : > { %v1394_v40 = vpop.f32.mrf.mxu1  ;;  %v6678_v8 = vpop.f32.mrf.mxu3  ;;  %v2048_v0 = vshrl.u32 %v5503_v43, 16 }
 0x179   : > { %v2250_v57 = vadd.f32 %v6632_v24, %v1737_v53  ;;  %v1395_v23 = vadd.f32 %v1394_v40, %v6569_v22  ;;  %v1250_v22 = vshrl.u32 %v5547_v5, 16  ;;  %v1255_v40 = vrot.slane %v1253_v2, 3 }
 0x17a   : > { %v1532_v60 = vrot.slane %v1253_v2, 4 }
 0x17b   : > { %v2405_v45 = vpop.f32.mrf.mxu0  ;;  %v6680_v42 = vadd.f32 %v2403_v15, %v2250_v57  ;;  %v1252_v37 = vrot.slane %v1250_v22, 2  ;;  %v1531_v52 = vrot.slane %v1250_v22, 3  ;;  %v2051_v57 = vshll.u32 %v5503_v43, 16 }
 0x17e   : > { %v1661_v20 = vpop.f32.mrf.mxu2 }
 0x17f   : > { %v1738_v59 = vadd.f32 %v1661_v20, %v1395_v23  ;;  %v1256_v23 = vor.u32 %v1255_v40, %v1252_v37  ;;  %v2050_v20 = vrot.slane %v2048_v0, 3 }
 0x180   : > { %v1397_v13 = vpop.f32.mrf.mxu1  ;;  %v6686_v15 = vpop.f32.mrf.mxu3 }
 0x181   : > { %v2251_v24 = vadd.f32 %v6640_v56, %v1738_v59  ;;  %v1398_v56 = vadd.f32 %v1397_v13, %v6449_v34  ;;  %v1533_v34 = vor.u32 %v1532_v60, %v1531_v52  ;;  %v2053_v59 = vrot.slane %v2051_v57, 4 }
 0x183   : > { %v2408_v6 = vpop.f32.mrf.mxu0  ;;  %4705 = vmatmul.msk.bf16.gmra.mxu1 %vm957_vm10, %v1248_v19  ;;  %4739 = vmatmul.msk.bf16.gmra.mxu2 %vm957_vm10, %v1530_v36  ;;  %v6690_v63 = vadd.f32 %v2405_v45, %v2251_v24  ;;  %v1534_v5 = vsel %vm1466_vm12, %v1529_v32, %v1533_v34  ;;  %v2054_v22 = vor.u32 %v2053_v59, %v2050_v20 }
 0x185   : > { %4775 = vmatmul.msk.bf16.gmra.mxu3 %vm957_vm10, %v2046_v50  ;;  %v5343_v50 = vld [vmem:[#allocation2 + $0xb8] sm:$0xff]  }
 0x186   : > { %4807 = vmatmul.msk.bf16.gmra.mxu0 %vm957_vm10, %v5342_v31  ;;  %v1664_v53 = vpop.f32.mrf.mxu2  ;;  %v1257_v31 = vsel %vm1114_vm11, %v1247_v9, %v1256_v23 }
 0x187   : > { %v1739_v33 = vadd.f32 %v1664_v53, %v1398_v56 }
 0x188   : > { %v1399_v25 = vpop.f32.mrf.mxu1  ;;  %v6697_v54 = vpop.f32.mrf.mxu3 }
 0x189   : > { %v2252_v45 = vadd.f32 %v6655_v1, %v1739_v33  ;;  %v1400_v13 = vadd.f32 %v1399_v25, %v6465_v46  ;;  %v5548_v46 = vld [vmem:[#allocation2 + $0xbc] sm:$0xff] }
 0x18a   : > { %v1259_v53 = vshrl.u32 %v5548_v46, 16  ;;  %v1262_v9 = vshll.u32 %v5548_v46, 16 }
 0x18b   : > { %v2410_v39 = vpop.f32.mrf.mxu0  ;;  %v6699_v35 = vadd.f32 %v2408_v6, %v2252_v45  ;;  %v6705_v6 = vld [vmem:[#allocation2 + $0xd0] sm:$0xff]  }
 0x18c   : > { %v5252_v56 = vunpack.c.h.b16 %v6705_v6  ;;  %v1261_v52 = vrot.slane %v1259_v53, 2  ;;  %v1264_v60 = vrot.slane %v1262_v9, 3  ;;  %v1535_v57 = vrot.slane %v1259_v53, 3 }
 0x18d   : > { %v1536_v45 = vrot.slane %v1262_v9, 4 }
 0x18e   : > { %v1666_v19 = vpop.f32.mrf.mxu2  ;;  %v1894_v32 = vpack.c.b16 %v5252_v56, %v5252_v56 }
 0x18f   : > { %v1740_v36 = vadd.f32 %v1666_v19, %v1400_v13 }
 0x190   : > { %v1402_v24 = vpop.f32.mrf.mxu1  ;;  %v6707_v43 = vpop.f32.mrf.mxu3  ;;  %v2057_v20 = vshrl.u32 %v1894_v32, 16  ;;  %v2060_v59 = vshll.u32 %v1894_v32, 16  ;;  %v5344_v32 = vld [vmem:[#allocation2 + $0xc0] sm:$0xff]  }
 0x191   : > { %v2253_v1 = vadd.f32 %v6664_v4, %v1740_v36  ;;  %v2055_v4 = vsel %vm1466_vm12, %v2045_v62, %v2054_v22  ;;  %v1403_v37 = vadd.f32 %v1402_v24, %v6473_v7  ;;  %v1265_v36 = vor.u32 %v1264_v60, %v1261_v52 }
 0x192   : > { %v1537_v7 = vor.u32 %v1536_v45, %v1535_v57  ;;  %v2059_v24 = vrot.slane %v2057_v20, 3 }
 0x193   : > { %v2413_v2 = vpop.f32.mrf.mxu0  ;;  %4706 = vmatmul.msk.bf16.gmra.mxu1 %vm957_vm10, %v1257_v31  ;;  %4740 = vmatmul.msk.bf16.gmra.mxu2 %vm957_vm10, %v1534_v5  ;;  %v6712_v33 = vadd.f32 %v2410_v39, %v2253_v1  ;;  %v2062_v31 = vrot.slane %v2060_v59, 4  ;;  %v1266_v46 = vsel %vm1114_vm11, %v1256_v23, %v1265_v36 }
 0x194   : > { %v1538_v53 = vsel %vm1466_vm12, %v1533_v34, %v1537_v7 }
 0x195   : > { %4776 = vmatmul.msk.bf16.gmra.mxu3 %vm957_vm10, %v2055_v4  ;;  %v2063_v9 = vor.u32 %v2062_v31, %v2059_v24  ;;  %v5348_v24 = vld [vmem:[#allocation2 + $0x50] sm:$0xf0]  ;;  %v5349_v31 = vld [vmem:[#allocation2 + $0x50] sm:$0xe] }
 0x196   : > { %4808 = vmatmul.msk.bf16.gmra.mxu0 %vm957_vm10, %v5343_v50  ;;  %v1669_v40 = vpop.f32.mrf.mxu2 }
 0x197   : > { %v1741_v25 = vadd.f32 %v1669_v40, %v1403_v37  ;;  %v5549_v37 = vld [vmem:[#allocation2 + $0xc4] sm:$0xff]  ;;  %v2064_v23 = vsel %vm1466_vm12, %v2054_v22, %v2063_v9 }
 0x198   : > { %v1404_v0 = vpop.f32.mrf.mxu1  ;;  %v6719_v19 = vpop.f32.mrf.mxu3  ;;  %v1271_v40 = vshll.u32 %v5549_v37, 16 }
 0x199   : > { %v2254_v39 = vadd.f32 %v6678_v8, %v1741_v25  ;;  %v1405_v5 = vadd.f32 %v1404_v0, %v6490_v10  ;;  %v1268_v10 = vshrl.u32 %v5549_v37, 16 }
 0x19a   : > { %v1273_v0 = vrot.slane %v1271_v40, 3  ;;  %v1540_v20 = vrot.slane %v1271_v40, 4 }
 0x19b   : > { %v2415_v13 = vpop.f32.mrf.mxu0  ;;  %v6721_v62 = vadd.f32 %v2413_v2, %v2254_v39  ;;  %v1270_v60 = vrot.slane %v1268_v10, 2  ;;  %v1539_v45 = vrot.slane %v1268_v10, 3 }
 0x19d   : > { %v1274_v22 = vor.u32 %v1273_v0, %v1270_v60 }
 0x19e   : > { %v1671_v1 = vpop.f32.mrf.mxu2 }
 0x19f   : > { %v1742_v50 = vadd.f32 %v1671_v1, %v1405_v5 }
 0x1a0   : > { %v1407_v56 = vpop.f32.mrf.mxu1  ;;  %v6727_v2 = vpop.f32.mrf.mxu3 }
 0x1a1   : > { %v2255_v8 = vadd.f32 %v6686_v15, %v1742_v50  ;;  %v1408_v34 = vadd.f32 %v1407_v56, %v6498_v30  ;;  %v1541_v30 = vor.u32 %v1540_v20, %v1539_v45  ;;  %v6742_v56 = vld [vmem:[#allocation2 + $0x58] sm:$0xff] }
 0x1a3   : > { %v2418_v4 = vpop.f32.mrf.mxu0  ;;  %4707 = vmatmul.msk.bf16.gmra.mxu1 %vm957_vm10, %v1266_v46  ;;  %4741 = vmatmul.msk.bf16.gmra.mxu2 %vm957_vm10, %v1538_v53  ;;  %v6731_v25 = vadd.f32 %v2415_v13, %v2255_v8  ;;  %v1462_v13 = vld [vmem:[#allocation2 + $0xcc] sm:$0xf]  ;;  %v6744_v46 = vor.u32 %v5349_v31, %v5348_v24  ;;  %v1542_v37 = vsel %vm1466_vm12, %v1537_v7, %v1541_v30  ;;  %v1280_v7 = vshll.u32 %v6363_v58, 16 }
 0x1a4   : > { %v1464_v50 = vunpack.c.l.b16 %v1462_v13 }
 0x1a5   : > { %4777 = vmatmul.msk.bf16.gmra.mxu3 %vm957_vm10, %v2064_v23  ;;  %v3497_v40 = vrot.slane %v6744_v46, 1  ;;  %v1282_v24 = vrot.slane %v1280_v7, 3 }
 0x1a6   : > { %4809 = vmatmul.msk.bf16.gmra.mxu0 %vm957_vm10, %v5344_v32  ;;  %v1674_v15 = vpop.f32.mrf.mxu2  ;;  %v1465_v10 = vpack.c.b16 %v1464_v50, %v1464_v50 }
 0x1a7   : > { %v1743_v52 = vadd.f32 %v1674_v15, %v1408_v34  ;;  %v5345_v15 = vld [vmem:[#allocation2 + $0xc8] sm:$0xff]  }
 0x1a8   : > { %v1409_v57 = vpop.f32.mrf.mxu1  ;;  %v6738_v5 = vpop.f32.mrf.mxu3  ;;  %v1544_v60 = vshrl.u32 %v1465_v10, 16  ;;  %v1547_v0 = vshll.u32 %v1465_v10, 16 }
 0x1a9   : > { %v2256_v59 = vadd.f32 %v6697_v54, %v1743_v52  ;;  %v1410_v53 = vadd.f32 %v1409_v57, %v6515_v47  ;;  %v1275_v54 = vsel %vm1114_vm11, %v1265_v36, %v1274_v22  ;;  %v1277_v47 = vshrl.u32 %v6363_v58, 16 }
 0x1aa   : > { %v1546_v31 = vrot.slane %v1544_v60, 3  ;;  %v5347_v60 = vld [vmem:[#allocation2 + $0x50] sm:$0xff]  }
 0x1ab   : > { %v2420_v39 = vpop.f32.mrf.mxu0  ;;  %v6740_v1 = vadd.f32 %v2418_v4, %v2256_v59  ;;  %v3498_v4 = vrot.slane %v6742_v56, 1  ;;  %v1279_v13 = vrot.slane %v1277_v47, 2 }
 0x1ae   : > { %v1676_v9 = vpop.f32.mrf.mxu2 }
 0x1af   : > { %v1744_v8 = vadd.f32 %v1676_v9, %v1410_v53 }
 0x1b0   : > { %v1412_v32 = vpop.f32.mrf.mxu1  ;;  %v6752_v52 = vpop.f32.mrf.mxu3 }
 0x1b1   : > { %v2257_v23 = vadd.f32 %v6707_v43, %v1744_v8  ;;  %v3499_v43 = vsel %vm3496_vm13, %v3497_v40, %v3498_v4  ;;  %v1413_v57 = vadd.f32 %v1412_v32, %v6523_v16  ;;  %v1283_v8 = vor.u32 %v1282_v24, %v1279_v13  ;;  %v5146_v40 = vld [vmem:[#allocation2 + $0x48] sm:$0xff] }
 0x1b2   : > { %v3756_v13 = vshll.u32 %v6744_v46, 16 }
 0x1b3   : > { %v2423_v34 = vpop.f32.mrf.mxu0  ;;  %4708 = vmatmul.msk.bf16.gmra.mxu1 %vm957_vm10, %v1275_v54  ;;  %4742 = vmatmul.msk.bf16.gmra.mxu2 %vm957_vm10, %v1542_v37  ;;  %v6757_v36 = vadd.f32 %v2420_v39, %v2257_v23  ;;  %v1549_v39 = vrot.slane %v1547_v0, 4  ;;  %v6769_v37 = vld [vmem:[#allocation2 + $0x60] sm:$0xff] }
 0x1b5   : > { %5036 = vmatmul.msk.bf16.vlgmr.msra.gmra.mxu3 %vm957_vm10, %v3499_v43  ;;  %v1550_v54 = vor.u32 %v1549_v39, %v1546_v31  ;;  %v2641_v39 = vshrl.u32 %v5146_v40, 16 }
 0x1b6   : > { %4810 = vmatmul.msk.bf16.gmra.mxu0 %vm957_vm10, %v5345_v15  ;;  %v1679_v45 = vpop.f32.mrf.mxu2  ;;  %v1284_v15 = vsel %vm1114_vm11, %v1274_v22, %v1283_v8  ;;  %v6784_v22 = vld [vmem:[#allocation2 + $0x50] sm:$0xff]  ;;  %v3132_v8 = vshrl.u32 %v5347_v60, 16 }
 0x1b7   : > { %v1745_v20 = vadd.f32 %v1679_v45, %v1413_v57  ;;  %v1551_v47 = vsel %vm1466_vm12, %v1541_v30, %v1550_v54  ;;  %v3134_v30 = vshll.u32 %v5347_v60, 16  ;;  %v3753_v57 = vshrl.u32 %v6744_v46, 16 }
 0x1b8   : > { %v1414_v59 = vpop.f32.mrf.mxu1  ;;  %v6765_v9 = vpop.f32.mrf.mxu3 }
 0x1b9   : > { %v2258_v50 = vadd.f32 %v6719_v19, %v1745_v20  ;;  %v1415_v16 = vadd.f32 %v1414_v59, %v6540_v29  ;;  %v3500_v19 = vrot.slane %v6769_v37, 1  ;;  %v2643_v29 = vshll.u32 %v5146_v40, 16 }
 0x1ba   : > { %v3139_v20 = vshll.u32 %v6742_v56, 16  ;;  %v3143_v59 = vshrl.u32 %v6742_v56, 16  ;;  %v3136_v54 = vrot.slane %v3134_v30, 1 }
 0x1bb   : > { %v2425_v53 = vpop.f32.mrf.mxu0  ;;  %v6767_v58 = vadd.f32 %v2423_v34, %v2258_v50  ;;  %v2645_v50 = vrot.slane %v2643_v29, 1 }
 0x1bc   : > { %v3761_v46 = vrot.slane %v3139_v20, 2  ;;  %v3141_v29 = vrot.slane %v3139_v20, 1 }
 0x1be   : > { %v1681_v32 = vpop.f32.mrf.mxu2 }
 0x1bf   : > { %v1746_v10 = vadd.f32 %v1681_v32, %v1415_v16  ;;  %v3758_v32 = vrot.slane %v3756_v13, 2 }
 0x1c0   : > { %v1417_v23 = vpop.f32.mrf.mxu1  ;;  %v6776_v0 = vpop.f32.mrf.mxu3 }
 0x1c1   : > { %v2259_v7 = vadd.f32 %v6727_v2, %v1746_v10  ;;  %v3501_v2 = vsel %vm3496_vm13, %v3498_v4, %v3500_v19  ;;  %v1418_v45 = vadd.f32 %v1417_v23, %v6548_v48  ;;  %v3755_v4 = vrot.slane %v3753_v57, 1 }
 0x1c2   : > { %v3760_v10 = vrot.slane %v3143_v59, 1 }
 0x1c3   : > { %v2428_v34 = vpop.f32.mrf.mxu0  ;;  %4709 = vmatmul.msk.bf16.gmra.mxu1 %vm957_vm10, %v1284_v15  ;;  %4743 = vmatmul.msk.bf16.gmra.mxu2 %vm957_vm10, %v1551_v47  ;;  %v6780_v43 = vadd.f32 %v2425_v53, %v2259_v7  ;;  %v2648_v53 = vshll.u32 %v6784_v22, 16  ;;  %v2646_v15 = vor.u32 %v2645_v50, %v2641_v39  ;;  %v3137_v7 = vor.u32 %v3136_v54, %v3132_v8 }
 0x1c4   : > { %v3762_v30 = vor.u32 %v3761_v46, %v3760_v10 }
 0x1c5   : > { %5037 = vmatmul.msk.bf16.gmra.mxu3 %vm957_vm10, %v3501_v2  ;;  %v2650_v47 = vrot.slane %v2648_v53, 1  ;;  %v6801_v2 = vld [vmem:[#allocation2 + $0x68] sm:$0xff] }
 0x1c6   : > { %4811 = vmatmul.msk.bf16.gmra.mxu0 %vm957_vm10, %v6705_v6  ;;  %v1684_v24 = vpop.f32.mrf.mxu2 }
 0x1c7   : > { %v1747_v31 = vadd.f32 %v1684_v24, %v1418_v45  ;;  %v2651_v24 = vsel %vm2639_vm14, %v2646_v15, %v2650_v47 }
 0x1c8   : > { %v1419_v6 = vpop.f32.mrf.mxu1  ;;  %v6797_v23 = vpop.f32.mrf.mxu3 }
 0x1c9   : > { %v2260_v48 = vadd.f32 %v6738_v5, %v1747_v31  ;;  %v1420_v60 = vadd.f32 %v1419_v6, %v6567_v28  ;;  %v3759_v5 = vor.u32 %v3758_v32, %v3755_v4  ;;  %v3502_v31 = vrot.slane %v6801_v2, 1  ;;  %v5148_v6 = vld [vmem:[#allocation2 + $0x58] sm:$0xff] }
 0x1ca   : > { %v3151_v4 = vshrl.u32 %v6769_v37, 16  ;;  %v2656_v46 = vshll.u32 %v5148_v6, 16 }
 0x1cb   : > { %v2430_v16 = vpop.f32.mrf.mxu0  ;;  %v6799_v40 = vadd.f32 %v2428_v34, %v2260_v48  ;;  %v3142_v34 = vsel %vm2639_vm14, %v3137_v7, %v3141_v29  ;;  %v3763_v50 = vsel %vm3751_vm15, %v3759_v5, %v3762_v30  ;;  %v3503_v8 = vsel %vm3496_vm13, %v3500_v19, %v3502_v31 }
 0x1ce   : > { %v1686_v57 = vpop.f32.mrf.mxu2 }
 0x1cf   : > { %v1748_v45 = vadd.f32 %v1686_v57, %v1420_v60  ;;  %v3764_v60 = vrot.slane %v3151_v4, 1  ;;  %v2658_v57 = vrot.slane %v2656_v46, 1 }
 0x1d0   : > { %v1422_v13 = vpop.f32.mrf.mxu1  ;;  %v6809_v53 = vpop.f32.mrf.mxu3 }
 0x1d1   : > { %v2261_v39 = vadd.f32 %v6752_v52, %v1748_v45  ;;  %v1423_v54 = vadd.f32 %v1422_v13, %v6462_v12  ;;  %v3147_v52 = vshll.u32 %v6769_v37, 16  ;;  %v3145_v45 = vor.u32 %v3143_v59, %v3141_v29  ;;  %v6833_v13 = vld [vmem:[#allocation2 + $0x70] sm:$0xff]  ;;  %v5149_v29 = vld [vmem:[#allocation2 + $0x60] sm:$0xff] }
 0x1d3   : > { %v2433_v20 = vpop.f32.mrf.mxu0  ;;  %4900 = vmatmul.msk.bf16.vlgmr.msra.gmra.mxu1 %vm957_vm10, %v2651_v24  ;;  %5002 = vmatmul.msk.bf16.vlgmr.msra.gmra.mxu2 %vm957_vm10, %v3142_v34  ;;  %v6813_v28 = vadd.f32 %v2430_v16, %v2261_v39  ;;  %v2652_v16 = vshrl.u32 %v6784_v22, 16  ;;  %v3765_v5 = vrot.slane %v3147_v52, 2  ;;  %v3149_v22 = vrot.slane %v3147_v52, 1 }
 0x1d5   : > { %5038 = vmatmul.msk.bf16.gmra.mxu3 %vm957_vm10, %v3503_v8  ;;  %v2654_v37 = vor.u32 %v2652_v16, %v2650_v47  ;;  %v3766_v24 = vor.u32 %v3765_v5, %v3764_v60  ;;  %v2664_v60 = vshll.u32 %v5149_v29, 16 }
 0x1d6   : > { %5070 = vmatmul.msk.bf16.vlgmr.msra.gmra.mxu0 %vm957_vm10, %v3763_v50  ;;  %v1689_v48 = vpop.f32.mrf.mxu2 }
 0x1d7   : > { %v1749_v32 = vadd.f32 %v1689_v48, %v1423_v54  ;;  %v2659_v8 = vsel %vm2639_vm14, %v2654_v37, %v2658_v57  ;;  %v3150_v54 = vsel %vm2639_vm14, %v3145_v45, %v3149_v22  ;;  %v3767_v56 = vsel %vm3751_vm15, %v3762_v30, %v3766_v24 }
 0x1d8   : > { %v1424_v10 = vpop.f32.mrf.mxu1  ;;  %v6823_v19 = vpop.f32.mrf.mxu3 }
 0x1d9   : > { %v2262_v15 = vadd.f32 %v6765_v9, %v1749_v32  ;;  %v1425_v9 = vadd.f32 %v1424_v10, %v6471_v3  ;;  %v3159_v10 = vshrl.u32 %v6801_v2, 16 }
 0x1db   : > { %v2435_v7 = vpop.f32.mrf.mxu0  ;;  %v6829_v12 = vadd.f32 %v2433_v20, %v2262_v15  ;;  %v3504_v20 = vrot.slane %v6833_v13, 1  ;;  %v2660_v15 = vshrl.u32 %v5148_v6, 16  ;;  %v3768_v37 = vrot.slane %v3159_v10, 1 }
 0x1dd   : > { %v3505_v52 = vsel %vm3496_vm13, %v3502_v31, %v3504_v20 }
 0x1de   : > { %v1691_v34 = vpop.f32.mrf.mxu2 }
 0x1df   : > { %v1750_v39 = vadd.f32 %v1691_v34, %v1425_v9  ;;  %v2666_v34 = vrot.slane %v2664_v60, 1 }
 0x1e0   : > { %v1427_v50 = vpop.f32.mrf.mxu1  ;;  %v6841_v59 = vpop.f32.mrf.mxu3 }
 0x1e1   : > { %v2263_v47 = vadd.f32 %v6776_v0, %v1750_v39  ;;  %v1428_v32 = vadd.f32 %v1427_v50, %v6487_v18  ;;  %v3155_v0 = vshll.u32 %v6801_v2, 16  ;;  %v2662_v18 = vor.u32 %v2660_v15, %v2658_v57  ;;  %v6858_v50 = vld [vmem:[#allocation2 + $0x78] sm:$0xff] }
 0x1e2   : > { %v3153_v39 = vor.u32 %v3151_v4, %v3149_v22 }
 0x1e3   : > { %v2438_v48 = vpop.f32.mrf.mxu0  ;;  %4901 = vmatmul.msk.bf16.gmra.mxu1 %vm957_vm10, %v2659_v8  ;;  %5003 = vmatmul.msk.bf16.gmra.mxu2 %vm957_vm10, %v3150_v54  ;;  %v6845_v3 = vadd.f32 %v2435_v7, %v2263_v47  ;;  %v3769_v45 = vrot.slane %v3155_v0, 2  ;;  %v3157_v2 = vrot.slane %v3155_v0, 1  ;;  %v5150_v0 = vld [vmem:[#allocation2 + $0x68] sm:$0xff] }
 0x1e5   : > { %5039 = vmatmul.msk.bf16.gmra.mxu3 %vm957_vm10, %v3505_v52  ;;  %v3770_v54 = vor.u32 %v3769_v45, %v3768_v37  ;;  %v3158_v52 = vsel %vm2639_vm14, %v3153_v39, %v3157_v2  ;;  %v2672_v37 = vshll.u32 %v5150_v0, 16 }
 0x1e6   : > { %5071 = vmatmul.msk.bf16.gmra.mxu0 %vm957_vm10, %v3767_v56  ;;  %v1694_v30 = vpop.f32.mrf.mxu2 }
 0x1e7   : > { %v1751_v16 = vadd.f32 %v1694_v30, %v1428_v32  ;;  %v3506_v32 = vrot.slane %v6858_v50, 1  ;;  %v3771_v4 = vsel %vm3751_vm15, %v3766_v24, %v3770_v54 }
 0x1e8   : > { %v1429_v46 = vpop.f32.mrf.mxu1  ;;  %v6854_v9 = vpop.f32.mrf.mxu3 }
 0x1e9   : > { %v2264_v7 = vadd.f32 %v6797_v23, %v1751_v16  ;;  %v1430_v8 = vadd.f32 %v1429_v46, %v6496_v61  ;;  %v2667_v23 = vsel %vm2639_vm14, %v2662_v18, %v2666_v34  ;;  %v3507_v30 = vsel %vm3496_vm13, %v3504_v20, %v3506_v32 }
 0x1ea   : > { %v3167_v46 = vshrl.u32 %v6833_v13, 16 }
 0x1eb   : > { %v2440_v5 = vpop.f32.mrf.mxu0  ;;  %v6856_v31 = vadd.f32 %v2438_v48, %v2264_v7  ;;  %v2668_v7 = vshrl.u32 %v5149_v29, 16 }
 0x1ec   : > { %v3772_v18 = vrot.slane %v3167_v46, 1 }
 0x1ee   : > { %v1696_v6 = vpop.f32.mrf.mxu2 }
 0x1ef   : > { %v1752_v47 = vadd.f32 %v1696_v6, %v1430_v8  ;;  %v2674_v6 = vrot.slane %v2672_v37, 1 }
 0x1f0   : > { %v1432_v56 = vpop.f32.mrf.mxu1  ;;  %v6866_v22 = vpop.f32.mrf.mxu3 }
 0x1f1   : > { %v2265_v48 = vadd.f32 %v6809_v53, %v1752_v47  ;;  %v1433_v16 = vadd.f32 %v1432_v56, %v6512_v49  ;;  %v3163_v53 = vshll.u32 %v6833_v13, 16  ;;  %v2670_v49 = vor.u32 %v2668_v7, %v2666_v34  ;;  %v6883_v56 = vld [vmem:[#allocation2 + $0x80] sm:$0xff] }
 0x1f2   : > { %v3161_v47 = vor.u32 %v3159_v10, %v3157_v2 }
 0x1f3   : > { %v2443_v57 = vpop.f32.mrf.mxu0  ;;  %4902 = vmatmul.msk.bf16.gmra.mxu1 %vm957_vm10, %v2667_v23  ;;  %5004 = vmatmul.msk.bf16.gmra.mxu2 %vm957_vm10, %v3158_v52  ;;  %v6870_v61 = vadd.f32 %v2440_v5, %v2265_v48  ;;  %v3773_v39 = vrot.slane %v3163_v53, 2  ;;  %v3165_v13 = vrot.slane %v3163_v53, 1  ;;  %v5151_v53 = vld [vmem:[#allocation2 + $0x70] sm:$0xff] }
 0x1f5   : > { %5040 = vmatmul.msk.bf16.gmra.mxu3 %vm957_vm10, %v3507_v30  ;;  %v3774_v52 = vor.u32 %v3773_v39, %v3772_v18  ;;  %v3166_v30 = vsel %vm2639_vm14, %v3161_v47, %v3165_v13  ;;  %v2680_v18 = vshll.u32 %v5151_v53, 16 }
 0x1f6   : > { %5072 = vmatmul.msk.bf16.gmra.mxu0 %vm957_vm10, %v3771_v4  ;;  %v1699_v24 = vpop.f32.mrf.mxu2 }
 0x1f7   : > { %v1753_v15 = vadd.f32 %v1699_v24, %v1433_v16  ;;  %v3508_v16 = vrot.slane %v6883_v56, 1  ;;  %v3775_v10 = vsel %vm3751_vm15, %v3770_v54, %v3774_v52 }
 0x1f8   : > { %v1434_v60 = vpop.f32.mrf.mxu1  ;;  %v6879_v8 = vpop.f32.mrf.mxu3 }
 0x1f9   : > { %v2266_v5 = vadd.f32 %v6823_v19, %v1753_v15  ;;  %v1435_v23 = vadd.f32 %v1434_v60, %v6521_v14  ;;  %v2675_v19 = vsel %vm2639_vm14, %v2670_v49, %v2674_v6  ;;  %v3509_v24 = vsel %vm3496_vm13, %v3506_v32, %v3508_v16 }
 0x1fa   : > { %v3175_v60 = vshrl.u32 %v6858_v50, 16 }
 0x1fb   : > { %v2445_v45 = vpop.f32.mrf.mxu0  ;;  %v6881_v20 = vadd.f32 %v2443_v57, %v2266_v5  ;;  %v2676_v5 = vshrl.u32 %v5150_v0, 16 }
 0x1fc   : > { %v3776_v49 = vrot.slane %v3175_v60, 1 }
 0x1fe   : > { %v1701_v29 = vpop.f32.mrf.mxu2 }
 0x1ff   : > { %v1754_v48 = vadd.f32 %v1701_v29, %v1435_v23  ;;  %v2682_v29 = vrot.slane %v2680_v18, 1 }
 0x200   : > { %v1437_v4 = vpop.f32.mrf.mxu1  ;;  %v6891_v2 = vpop.f32.mrf.mxu3 }
 0x201   : > { %v2267_v57 = vadd.f32 %v6841_v59, %v1754_v48  ;;  %v1438_v15 = vadd.f32 %v1437_v4, %v6537_v26  ;;  %v3171_v59 = vshll.u32 %v6858_v50, 16  ;;  %v2678_v26 = vor.u32 %v2676_v5, %v2674_v6  ;;  %v6908_v4 = vld [vmem:[#allocation2 + $0x88] sm:$0xff] }
 0x202   : > { %v3169_v48 = vor.u32 %v3167_v46, %v3165_v13  ;;  %v3183_v5 = vshrl.u32 %v6883_v56, 16 }
 0x203   : > { %v2448_v34 = vpop.f32.mrf.mxu0  ;;  %4903 = vmatmul.msk.bf16.gmra.mxu1 %vm957_vm10, %v2675_v19  ;;  %5005 = vmatmul.msk.bf16.gmra.mxu2 %vm957_vm10, %v3166_v30  ;;  %v6895_v14 = vadd.f32 %v2445_v45, %v2267_v57  ;;  %v3777_v47 = vrot.slane %v3171_v59, 2  ;;  %v3173_v50 = vrot.slane %v3171_v59, 1  ;;  %v5152_v59 = vld [vmem:[#allocation2 + $0x78] sm:$0xff] }
 0x205   : > { %5041 = vmatmul.msk.bf16.gmra.mxu3 %vm957_vm10, %v3509_v24  ;;  %v3778_v30 = vor.u32 %v3777_v47, %v3776_v49  ;;  %v3174_v24 = vsel %vm2639_vm14, %v3169_v48, %v3173_v50  ;;  %v2684_v49 = vshrl.u32 %v5151_v53, 16  ;;  %v2688_v47 = vshll.u32 %v5152_v59, 16 }
 0x206   : > { %5073 = vmatmul.msk.bf16.gmra.mxu0 %vm957_vm10, %v3775_v10  ;;  %v1704_v54 = vpop.f32.mrf.mxu2  ;;  %v3780_v48 = vrot.slane %v3183_v5, 1 }
 0x207   : > { %v1755_v7 = vadd.f32 %v1704_v54, %v1438_v15  ;;  %v3510_v15 = vrot.slane %v6908_v4, 1  ;;  %v3779_v46 = vsel %vm3751_vm15, %v3774_v52, %v3778_v30 }
 0x208   : > { %v1439_v37 = vpop.f32.mrf.mxu1  ;;  %v6904_v23 = vpop.f32.mrf.mxu3 }
 0x209   : > { %v2268_v45 = vadd.f32 %v6854_v9, %v1755_v7  ;;  %v1440_v19 = vadd.f32 %v1439_v37, %v6546_v44  ;;  %v2683_v9 = vsel %vm2639_vm14, %v2678_v26, %v2682_v29  ;;  %v3511_v54 = vsel %vm3496_vm13, %v3508_v16, %v3510_v15  ;;  %v7756_v7 = vld [vmem:[#allocation9_spill] sm:$0xff] }
 0x20b   : > { %v2450_v39 = vpop.f32.mrf.mxu0  ;;  %v6906_v32 = vadd.f32 %v2448_v34, %v2268_v45 }
 0x20e   : > { %v1706_v0 = vpop.f32.mrf.mxu2 }
 0x20f   : > { %v1756_v57 = vadd.f32 %v1706_v0, %v1440_v19 }
 0x210   : > { %v1442_v10 = vpop.f32.mrf.mxu1  ;;  %v6916_v13 = vpop.f32.mrf.mxu3 }
 0x211   : > { %v2269_v34 = vadd.f32 %v6866_v22, %v1756_v57  ;;  %v1443_v37 = vadd.f32 %v1442_v10, %v7756_v7  ;;  %v3179_v22 = vshll.u32 %v6883_v56, 16  ;;  %v2686_v57 = vor.u32 %v2684_v49, %v2682_v29 }
 0x212   : > { %v2690_v10 = vrot.slane %v2688_v47, 1  ;;  %v7760_v47 = vld [vmem:[#allocation3_spill] sm:$0xff] }
 0x213   : > { %v2453_v6 = vpop.f32.mrf.mxu0  ;;  %4904 = vmatmul.msk.bf16.gmra.mxu1 %vm957_vm10, %v2683_v9  ;;  %5006 = vmatmul.msk.bf16.gmra.mxu2 %vm957_vm10, %v3174_v24  ;;  %v6920_v44 = vadd.f32 %v2450_v39, %v2269_v34  ;;  %v3781_v19 = vrot.slane %v3179_v22, 2  ;;  %v3177_v9 = vor.u32 %v3175_v60, %v3173_v50  ;;  %v3181_v56 = vrot.slane %v3179_v22, 1  ;;  %v6933_v24 = vld [vmem:[#allocation2 + $0x90] sm:$0xff]  ;;  %v7758_v34 = vld [vmem:[#allocation10_spill] sm:$0xff] }
 0x215   : > { %5042 = vmatmul.msk.bf16.gmra.mxu3 %vm957_vm10, %v3511_v54  ;;  %v3782_v54 = vor.u32 %v3781_v19, %v3780_v48  ;;  %v3191_v48 = vshrl.u32 %v6908_v4, 16 }
 0x216   : > { %5074 = vmatmul.msk.bf16.gmra.mxu0 %vm957_vm10, %v3779_v46  ;;  %v1709_v52 = vpop.f32.mrf.mxu2 }
 0x217   : > { %v1757_v18 = vadd.f32 %v1709_v52, %v1443_v37  ;;  %v3182_v52 = vsel %vm2639_vm14, %v3177_v9, %v3181_v56  ;;  %v3783_v60 = vsel %vm3751_vm15, %v3778_v30, %v3782_v54  ;;  %v2692_v9 = vshrl.u32 %v5152_v59, 16 }
 0x218   : > { %v1444_v45 = vpop.f32.mrf.mxu1  ;;  %v6929_v0 = vpop.f32.mrf.mxu3 }
 0x219   : > { %v2270_v39 = vadd.f32 %v6879_v8, %v1757_v18  ;;  %v1445_v46 = vadd.f32 %v1444_v45, %v7758_v34  ;;  %v2691_v8 = vsel %vm2639_vm14, %v2686_v57, %v2690_v10  ;;  %v3512_v18 = vrot.slane %v6933_v24, 1  ;;  %v5153_v45 = vld [vmem:[#allocation2 + $0x80] sm:$0xff] }
 0x21a   : > { %v2696_v34 = vshll.u32 %v5153_v45, 16 }
 0x21b   : > { %v2455_v26 = vpop.f32.mrf.mxu0  ;;  %v6931_v16 = vadd.f32 %v2453_v6, %v2270_v39  ;;  %v3513_v49 = vsel %vm3496_vm13, %v3510_v15, %v3512_v18 }
 0x21d   : > { %7757 = vst [vmem:[#allocation9_spill] sm:$0xff] %v6931_v16 }
 0x21e   : > { %v1711_v53 = vpop.f32.mrf.mxu2 }
 0x21f   : > { %v1758_v7 = vadd.f32 %v1711_v53, %v1445_v46  ;;  %v3784_v53 = vrot.slane %v3191_v48, 1 }
 0x220   : > { %v1447_v37 = vpop.f32.mrf.mxu1  ;;  %v6941_v50 = vpop.f32.mrf.mxu3 }
 0x221   : > { %v2271_v6 = vadd.f32 %v6891_v2, %v1758_v7  ;;  %v1448_v39 = vadd.f32 %v1447_v37, %v7760_v47  ;;  %v3187_v2 = vshll.u32 %v6908_v4, 16  ;;  %v2694_v37 = vor.u32 %v2692_v9, %v2690_v10  ;;  %v7762_v47 = vld [vmem:[#allocation4_spill] sm:$0xff] }
 0x223   : > { %v2458_v29 = vpop.f32.mrf.mxu0  ;;  %4905 = vmatmul.msk.bf16.gmra.mxu1 %vm957_vm10, %v2691_v8  ;;  %5007 = vmatmul.msk.bf16.gmra.mxu2 %vm957_vm10, %v3182_v52  ;;  %v6945_v22 = vadd.f32 %v2455_v26, %v2271_v6  ;;  %v3785_v7 = vrot.slane %v3187_v2, 2  ;;  %v2698_v52 = vrot.slane %v2696_v34, 1  ;;  %v3185_v6 = vor.u32 %v3183_v5, %v3181_v56  ;;  %v7764_v34 = vld [vmem:[#allocation5_spill] sm:$0xff] }
 0x224   : > { %v3189_v4 = vrot.slane %v3187_v2, 1 }
 0x225   : > { %7759 = vst [vmem:[#allocation10_spill] sm:$0xff] %v6945_v22  ;;  %5043 = vmatmul.msk.bf16.gmra.mxu3 %vm957_vm10, %v3513_v49 }
 0x226   : > { %5075 = vmatmul.msk.bf16.gmra.mxu0 %vm957_vm10, %v3783_v60  ;;  %v1714_v30 = vpop.f32.mrf.mxu2  ;;  %v6958_v60 = vld [vmem:[#allocation2 + $0x98] sm:$0xff] }
 0x227   : > { %v1759_v19 = vadd.f32 %v1714_v30, %v1448_v39  ;;  %v3786_v39 = vor.u32 %v3785_v7, %v3784_v53  ;;  %v3514_v16 = vrot.slane %v6958_v60, 1  ;;  %v3199_v53 = vshrl.u32 %v6933_v24, 16 }
 0x228   : > { %v1449_v57 = vpop.f32.mrf.mxu1  ;;  %v6954_v8 = vpop.f32.mrf.mxu3 }
 0x229   : > { %v2272_v26 = vadd.f32 %v6904_v23, %v1759_v19  ;;  %v1450_v49 = vadd.f32 %v1449_v57, %v7762_v47  ;;  %v2699_v23 = vsel %vm2639_vm14, %v2694_v37, %v2698_v52  ;;  %v3190_v19 = vsel %vm2639_vm14, %v3185_v6, %v3189_v4  ;;  %v5154_v57 = vld [vmem:[#allocation2 + $0x88] sm:$0xff] }
 0x22a   : > { %v3787_v5 = vsel %vm3751_vm15, %v3782_v54, %v3786_v39  ;;  %v3515_v9 = vsel %vm3496_vm13, %v3512_v18, %v3514_v16  ;;  %v2700_v6 = vshrl.u32 %v5153_v45, 16  ;;  %v2704_v47 = vshll.u32 %v5154_v57, 16 }
 0x22b   : > { %v2460_v46 = vpop.f32.mrf.mxu0  ;;  %v6956_v15 = vadd.f32 %v2458_v29, %v2272_v26 }
 0x22d   : > { %7761 = vst [vmem:[#allocation3_spill] sm:$0xff] %v6956_v15 }
 0x22e   : > { %v1716_v59 = vpop.f32.mrf.mxu2 }
 0x22f   : > { %v1760_v30 = vadd.f32 %v1716_v59, %v1450_v49  ;;  %v3788_v59 = vrot.slane %v3199_v53, 1 }
 0x230   : > { %v1452_v22 = vpop.f32.mrf.mxu1  ;;  %v6966_v56 = vpop.f32.mrf.mxu3 }
 0x231   : > { %v2273_v29 = vadd.f32 %v6916_v13, %v1760_v30  ;;  %v1453_v26 = vadd.f32 %v1452_v22, %v7764_v34  ;;  %v3195_v13 = vshll.u32 %v6933_v24, 16  ;;  %v2702_v22 = vor.u32 %v2700_v6, %v2698_v52  ;;  %v7766_v34 = vld [vmem:[#allocation6_spill] sm:$0xff] }
 0x233   : > { %v2463_v10 = vpop.f32.mrf.mxu0  ;;  %4906 = vmatmul.msk.bf16.gmra.mxu1 %vm957_vm10, %v2699_v23  ;;  %5008 = vmatmul.msk.bf16.gmra.mxu2 %vm957_vm10, %v3190_v19  ;;  %v6970_v2 = vadd.f32 %v2460_v46, %v2273_v29  ;;  %v3789_v30 = vrot.slane %v3195_v13, 2  ;;  %v2706_v19 = vrot.slane %v2704_v47, 1  ;;  %v3193_v29 = vor.u32 %v3191_v48, %v3189_v4  ;;  %v7768_v47 = vld [vmem:[#allocation7_spill] sm:$0xff] }
 0x234   : > { %v3197_v24 = vrot.slane %v3195_v13, 1 }
 0x235   : > { %7763 = vst [vmem:[#allocation4_spill] sm:$0xff] %v6970_v2  ;;  %5044 = vmatmul.msk.bf16.gmra.mxu3 %vm957_vm10, %v3515_v9 }
 0x236   : > { %5076 = vmatmul.msk.bf16.gmra.mxu0 %vm957_vm10, %v3787_v5  ;;  %v1719_v54 = vpop.f32.mrf.mxu2  ;;  %v6983_v5 = vld [vmem:[#allocation2 + $0xa0] sm:$0xff] }
 0x237   : > { %v1761_v7 = vadd.f32 %v1719_v54, %v1453_v26  ;;  %v3790_v26 = vor.u32 %v3789_v30, %v3788_v59  ;;  %v3516_v15 = vrot.slane %v6983_v5, 1  ;;  %v3207_v59 = vshrl.u32 %v6958_v60, 16 }
 0x238   : > { %v1454_v37 = vpop.f32.mrf.mxu1  ;;  %v6979_v23 = vpop.f32.mrf.mxu3 }
 0x239   : > { %v2274_v46 = vadd.f32 %v6929_v0, %v1761_v7  ;;  %v1455_v9 = vadd.f32 %v1454_v37, %v7766_v34  ;;  %v2707_v0 = vsel %vm2639_vm14, %v2702_v22, %v2706_v19  ;;  %v3198_v7 = vsel %vm2639_vm14, %v3193_v29, %v3197_v24  ;;  %v5155_v37 = vld [vmem:[#allocation2 + $0x90] sm:$0xff] }
 0x23a   : > { %v3791_v48 = vsel %vm3751_vm15, %v3786_v39, %v3790_v26  ;;  %v3517_v6 = vsel %vm3496_vm13, %v3514_v16, %v3516_v15  ;;  %v2708_v29 = vshrl.u32 %v5154_v57, 16  ;;  %v2712_v34 = vshll.u32 %v5155_v37, 16 }
 0x23b   : > { %v2465_v49 = vpop.f32.mrf.mxu0  ;;  %v6981_v18 = vadd.f32 %v2463_v10, %v2274_v46 }
 0x23d   : > { %7765 = vst [vmem:[#allocation5_spill] sm:$0xff] %v6981_v18 }
 0x23e   : > { %v1721_v45 = vpop.f32.mrf.mxu2 }
 0x23f   : > { %v1762_v54 = vadd.f32 %v1721_v45, %v1455_v9  ;;  %v3792_v45 = vrot.slane %v3207_v59, 1 }
 0x240   : > { %v1457_v2 = vpop.f32.mrf.mxu1  ;;  %v6991_v4 = vpop.f32.mrf.mxu3 }
 0x241   : > { %v2275_v10 = vadd.f32 %v6941_v50, %v1762_v54  ;;  %v1458_v46 = vadd.f32 %v1457_v2, %v7768_v47  ;;  %v3203_v50 = vshll.u32 %v6958_v60, 16  ;;  %v2710_v2 = vor.u32 %v2708_v29, %v2706_v19  ;;  %v7769_v47 = vld [vmem:[#allocation8_spill] sm:$0xff] }
 0x242   : > { %v5156_v29 = vld [vmem:[#allocation2 + $0x98] sm:$0xff] }
 0x243   : > { %v2468_v52 = vpop.f32.mrf.mxu0  ;;  %4907 = vmatmul.msk.bf16.gmra.mxu1 %vm957_vm10, %v2707_v0  ;;  %5009 = vmatmul.msk.bf16.gmra.mxu2 %vm957_vm10, %v3198_v7  ;;  %v6995_v13 = vadd.f32 %v2465_v49, %v2275_v10  ;;  %v3793_v54 = vrot.slane %v3203_v50, 2  ;;  %v2714_v7 = vrot.slane %v2712_v34, 1  ;;  %v3201_v10 = vor.u32 %v3199_v53, %v3197_v24 }
 0x244   : > { %v3205_v60 = vrot.slane %v3203_v50, 1 }
 0x245   : > { %7767 = vst [vmem:[#allocation6_spill] sm:$0xff] %v6995_v13  ;;  %5045 = vmatmul.msk.bf16.gmra.mxu3 %vm957_vm10, %v3517_v6 }
 0x246   : > { %5077 = vmatmul.msk.bf16.gmra.mxu0 %vm957_vm10, %v3791_v48  ;;  %v1724_v39 = vpop.f32.mrf.mxu2  ;;  %v7008_v48 = vld [vmem:[#allocation2 + $0xa8] sm:$0xff] }
 0x247   : > { %v1763_v30 = vadd.f32 %v1724_v39, %v1458_v46  ;;  %v3794_v46 = vor.u32 %v3793_v54, %v3792_v45  ;;  %v3518_v18 = vrot.slane %v7008_v48, 1  ;;  %v2716_v45 = vshrl.u32 %v5155_v37, 16 }
 0x248   : > { %v1459_v22 = vpop.f32.mrf.mxu1  ;;  %v7004_v0 = vpop.f32.mrf.mxu3  ;;  %v2720_v54 = vshll.u32 %v5156_v29, 16  ;;  %v3209_v37 = vor.u32 %v3207_v59, %v3205_v60 }
 0x249   : > { %v2276_v49 = vadd.f32 %v6954_v8, %v1763_v30  ;;  %v1460_v6 = vadd.f32 %v1459_v22, %v7769_v47  ;;  %v2715_v8 = vsel %vm2639_vm14, %v2710_v2, %v2714_v7  ;;  %v3206_v30 = vsel %vm2639_vm14, %v3201_v10, %v3205_v60 }
 0x24a   : > { %v3795_v24 = vsel %vm3751_vm15, %v3790_v26, %v3794_v46  ;;  %v3519_v34 = vsel %vm3496_vm13, %v3516_v15, %v3518_v18 }
 0x24b   : > { %v2470_v9 = vpop.f32.mrf.mxu0  ;;  %v7006_v16 = vadd.f32 %v2468_v52, %v2276_v49 }
 0x24e   : > { %v1726_v57 = vpop.f32.mrf.mxu2 }
 0x24f   : > { %v1764_v39 = vadd.f32 %v1726_v57, %v1460_v6 }
 0x250   : > { %v2875_v13 = vpop.f32.mrf.mxu1  ;;  %v7017_v50 = vpop.f32.mrf.mxu3 }
 0x251   : > { %v2277_v52 = vadd.f32 %v6966_v56, %v1764_v39  ;;  %v2965_v19 = vadd.f32 %v2875_v13, %v6592_v51  ;;  %v3211_v56 = vshll.u32 %v6983_v5, 16  ;;  %v3215_v51 = vshrl.u32 %v6983_v5, 16 }
 0x252   : > { %v2718_v39 = vor.u32 %v2716_v45, %v2714_v7 }
 0x253   : > { %v3924_v53 = vpop.f32.mrf.mxu0  ;;  %4908 = vmatmul.msk.bf16.gmra.mxu1 %vm957_vm10, %v2715_v8  ;;  %5010 = vmatmul.msk.bf16.gmra.mxu2 %vm957_vm10, %v3206_v30  ;;  %v7021_v22 = vadd.f32 %v2470_v9, %v2277_v52  ;;  %v7034_v9 = vld [vmem:[%s4050_s10] ss:$0 sm:$0xff]  ;;  %v3796_v47 = vrot.slane %v3215_v51, 1  ;;  %v3797_v5 = vrot.slane %v3211_v56, 2  ;;  %v2722_v8 = vrot.slane %v2720_v54, 1  ;;  %v7039_v52 = vld [vmem:[#allocation2 + $0xb0] sm:$0xff] }
 0x254   : > { %v3213_v30 = vrot.slane %v3211_v56, 1  ;;  %v5157_v54 = vld [vmem:[#allocation2 + $0xa0] sm:$0xff] }
 0x255   : > { %5046 = vmatmul.msk.bf16.gmra.mxu3 %vm957_vm10, %v3519_v34 }
 0x256   : > { %5078 = vmatmul.msk.bf16.gmra.mxu0 %vm957_vm10, %v3795_v24  ;;  %v3366_v13 = vpop.f32.mrf.mxu2 }
 0x257   : > { %v3456_v26 = vadd.f32 %v3366_v13, %v2965_v19  ;;  %v3798_v19 = vor.u32 %v3797_v5, %v3796_v47  ;;  %v2724_v5 = vshrl.u32 %v5156_v29, 16 }
 0x258   : > { %v2877_v49 = vpop.f32.mrf.mxu1  ;;  %v7037_v6 = vpop.f32.mrf.mxu3 }
 0x259   : > { %v3711_v2 = vadd.f32 %v6979_v23, %v3456_v26  ;;  %v2966_v15 = vadd.f32 %v2877_v49, %v6604_v38  ;;  %v2723_v38 = vsel %vm2639_vm14, %v2718_v39, %v2722_v8  ;;  %v3214_v26 = vsel %vm2639_vm14, %v3209_v37, %v3213_v30 }
 0x25a   : > { %v3520_v49 = vrot.slane %v7039_v52, 1 }
 0x25b   : > { %v3926_v10 = vpop.f32.mrf.mxu0  ;;  %v4014_v57 = vadd.f32 %v3924_v53, %v3711_v2  ;;  %v3799_v53 = vsel %vm3751_vm15, %v3794_v46, %v3798_v19 }
 0x25c   : > { %v3521_v2 = vsel %vm3496_vm13, %v3518_v18, %v3520_v49 }
 0x25d   : > { %v7042_v23 = vadd.f32 %v7034_v9, %v4014_v57  ;;  %v2728_v57 = vshll.u32 %v5157_v54, 16 }
 0x25e   : > { %v3368_v24 = vpop.f32.mrf.mxu2 }
 0x25f   : > { %v3457_v34 = vadd.f32 %v3368_v24, %v2966_v15 }
 0x260   : > { %v2880_v13 = vpop.f32.mrf.mxu1  ;;  %v7050_v56 = vpop.f32.mrf.mxu3 }
 0x261   : > { %v3712_v7 = vadd.f32 %v6991_v4, %v3457_v34  ;;  %v2967_v59 = vadd.f32 %v2880_v13, %v6613_v21  ;;  %v3219_v21 = vshll.u32 %v7008_v48, 16  ;;  %v3223_v4 = vshrl.u32 %v7008_v48, 16 }
 0x262   : > { %v3217_v48 = vor.u32 %v3215_v51, %v3213_v30 }
 0x263   : > { %v3929_v60 = vpop.f32.mrf.mxu0  ;;  %v4015_v45 = vadd.f32 %v3926_v10, %v3712_v7  ;;  %4909 = vmatmul.msk.bf16.gmra.mxu1 %vm957_vm10, %v2723_v38  ;;  %5011 = vmatmul.msk.bf16.gmra.mxu2 %vm957_vm10, %v3214_v26  ;;  %v3800_v18 = vrot.slane %v3223_v4, 1  ;;  %v3801_v34 = vrot.slane %v3219_v21, 2  ;;  %v2726_v26 = vor.u32 %v2724_v5, %v2722_v8 }
 0x264   : > { %v2730_v7 = vrot.slane %v2728_v57, 1  ;;  %v5158_v57 = vld [vmem:[#allocation2 + $0xa8] sm:$0xff] }
 0x265   : > { %v7057_v15 = vadd.f32 %v7034_v9, %v4015_v45  ;;  %5047 = vmatmul.msk.bf16.gmra.mxu3 %vm957_vm10, %v3521_v2  ;;  %v3802_v29 = vor.u32 %v3801_v34, %v3800_v18  ;;  %v2732_v34 = vshrl.u32 %v5157_v54, 16 }
 0x266   : > { %5079 = vmatmul.msk.bf16.gmra.mxu0 %vm957_vm10, %v3799_v53  ;;  %v3371_v46 = vpop.f32.mrf.mxu2  ;;  %v3221_v53 = vrot.slane %v3219_v21, 1 }
 0x267   : > { %v3458_v47 = vadd.f32 %v3371_v46, %v2967_v59  ;;  %v7066_v59 = vld [vmem:[#allocation2 + $0xb8] sm:$0xff] }
 0x268   : > { %v2882_v10 = vpop.f32.mrf.mxu1  ;;  %v7064_v13 = vpop.f32.mrf.mxu3 }
 0x269   : > { %v3713_v39 = vadd.f32 %v7004_v0, %v3458_v47  ;;  %v2968_v37 = vadd.f32 %v2882_v10, %v6625_v11  ;;  %v2731_v11 = vsel %vm2639_vm14, %v2726_v26, %v2730_v7  ;;  %v3222_v47 = vsel %vm2639_vm14, %v3217_v48, %v3221_v53 }
 0x26a   : > { %v3522_v10 = vrot.slane %v7066_v59, 1 }
 0x26b   : > { %v3931_v24 = vpop.f32.mrf.mxu0  ;;  %v4016_v38 = vadd.f32 %v3929_v60, %v3713_v39  ;;  %v3803_v60 = vsel %vm3751_vm15, %v3798_v19, %v3802_v29 }
 0x26c   : > { %v3523_v39 = vsel %vm3496_vm13, %v3520_v49, %v3522_v10 }
 0x26d   : > { %v7069_v45 = vadd.f32 %v7034_v9, %v4016_v38  ;;  %v2736_v38 = vshll.u32 %v5158_v57, 16 }
 0x26e   : > { %v3373_v2 = vpop.f32.mrf.mxu2 }
 0x26f   : > { %v3459_v0 = vadd.f32 %v3373_v2, %v2968_v37 }
 0x270   : > { %v2885_v46 = vpop.f32.mrf.mxu1  ;;  %v7077_v21 = vpop.f32.mrf.mxu3 }
 0x271   : > { %v3714_v8 = vadd.f32 %v7017_v50, %v3459_v0  ;;  %v2969_v51 = vadd.f32 %v2885_v46, %v6634_v41  ;;  %v3227_v41 = vshll.u32 %v7039_v52, 16  ;;  %v3231_v50 = vshrl.u32 %v7039_v52, 16 }
 0x272   : > { %v3225_v52 = vor.u32 %v3223_v4, %v3221_v53 }
 0x273   : > { %v3934_v30 = vpop.f32.mrf.mxu0  ;;  %v4017_v5 = vadd.f32 %v3931_v24, %v3714_v8  ;;  %4910 = vmatmul.msk.bf16.gmra.mxu1 %vm957_vm10, %v2731_v11  ;;  %5012 = vmatmul.msk.bf16.gmra.mxu2 %vm957_vm10, %v3222_v47  ;;  %v3804_v49 = vrot.slane %v3231_v50, 1  ;;  %v3805_v0 = vrot.slane %v3227_v41, 2  ;;  %v2734_v47 = vor.u32 %v2732_v34, %v2730_v7 }
 0x274   : > { %v2738_v8 = vrot.slane %v2736_v38, 1  ;;  %v5159_v38 = vld [vmem:[#allocation2 + $0xb0] sm:$0xff] }
 0x275   : > { %v7084_v37 = vadd.f32 %v7034_v9, %v4017_v5  ;;  %5048 = vmatmul.msk.bf16.gmra.mxu3 %vm957_vm10, %v3523_v39  ;;  %v3806_v54 = vor.u32 %v3805_v0, %v3804_v49  ;;  %v2740_v0 = vshrl.u32 %v5158_v57, 16 }
 0x276   : > { %5080 = vmatmul.msk.bf16.gmra.mxu0 %vm957_vm10, %v3803_v60  ;;  %v3376_v19 = vpop.f32.mrf.mxu2  ;;  %v3229_v60 = vrot.slane %v3227_v41, 1 }
 0x277   : > { %v3460_v18 = vadd.f32 %v3376_v19, %v2969_v51  ;;  %v7093_v51 = vld [vmem:[#allocation2 + $0xc0] sm:$0xff] }
 0x278   : > { %v2887_v24 = vpop.f32.mrf.mxu1  ;;  %v7091_v46 = vpop.f32.mrf.mxu3 }
 0x279   : > { %v3715_v26 = vadd.f32 %v7037_v6, %v3460_v18  ;;  %v2970_v48 = vadd.f32 %v2887_v24, %v6646_v55  ;;  %v2739_v55 = vsel %vm2639_vm14, %v2734_v47, %v2738_v8  ;;  %v3230_v18 = vsel %vm2639_vm14, %v3225_v52, %v3229_v60 }
 0x27a   : > { %v3524_v24 = vrot.slane %v7093_v51, 1 }
 0x27b   : > { %v3936_v2 = vpop.f32.mrf.mxu0  ;;  %v4018_v11 = vadd.f32 %v3934_v30, %v3715_v26  ;;  %v3807_v30 = vsel %vm3751_vm15, %v3802_v29, %v3806_v54 }
 0x27c   : > { %v3525_v26 = vsel %vm3496_vm13, %v3522_v10, %v3524_v24 }
 0x27d   : > { %v7096_v5 = vadd.f32 %v7034_v9, %v4018_v11  ;;  %v2744_v11 = vshll.u32 %v5159_v38, 16 }
 0x27e   : > { %v3378_v39 = vpop.f32.mrf.mxu2 }
 0x27f   : > { %v3461_v6 = vadd.f32 %v3378_v39, %v2970_v48 }
 0x280   : > { %v2890_v19 = vpop.f32.mrf.mxu1  ;;  %v7104_v41 = vpop.f32.mrf.mxu3 }
 0x281   : > { %v3716_v7 = vadd.f32 %v7050_v56, %v3461_v6  ;;  %v2971_v4 = vadd.f32 %v2890_v19, %v6657_v17  ;;  %v3235_v17 = vshll.u32 %v7066_v59, 16  ;;  %v3239_v56 = vshrl.u32 %v7066_v59, 16 }
 0x282   : > { %v3233_v59 = vor.u32 %v3231_v50, %v3229_v60 }
 0x283   : > { %v3939_v53 = vpop.f32.mrf.mxu0  ;;  %v4019_v34 = vadd.f32 %v3936_v2, %v3716_v7  ;;  %4911 = vmatmul.msk.bf16.gmra.mxu1 %vm957_vm10, %v2739_v55  ;;  %5013 = vmatmul.msk.bf16.gmra.mxu2 %vm957_vm10, %v3230_v18  ;;  %v3808_v10 = vrot.slane %v3239_v56, 1  ;;  %v3809_v6 = vrot.slane %v3235_v17, 2  ;;  %v2742_v18 = vor.u32 %v2740_v0, %v2738_v8 }
 0x284   : > { %v2746_v7 = vrot.slane %v2744_v11, 1  ;;  %v5160_v11 = vld [vmem:[#allocation2 + $0xb8] sm:$0xff] }
 0x285   : > { %v7111_v48 = vadd.f32 %v7034_v9, %v4019_v34  ;;  %5049 = vmatmul.msk.bf16.gmra.mxu3 %vm957_vm10, %v3525_v26  ;;  %v3810_v57 = vor.u32 %v3809_v6, %v3808_v10  ;;  %v2748_v6 = vshrl.u32 %v5159_v38, 16 }
 0x286   : > { %5081 = vmatmul.msk.bf16.gmra.mxu0 %vm957_vm10, %v3807_v30  ;;  %v3381_v29 = vpop.f32.mrf.mxu2  ;;  %v3237_v30 = vrot.slane %v3235_v17, 1 }
 0x287   : > { %v3462_v49 = vadd.f32 %v3381_v29, %v2971_v4  ;;  %v7120_v4 = vld [vmem:[#allocation2 + $0xc8] sm:$0xff] }
 0x288   : > { %v2892_v2 = vpop.f32.mrf.mxu1  ;;  %v7118_v19 = vpop.f32.mrf.mxu3 }
 0x289   : > { %v3717_v47 = vadd.f32 %v7064_v13, %v3462_v49  ;;  %v2972_v52 = vadd.f32 %v2892_v2, %v6670_v27  ;;  %v2747_v27 = vsel %vm2639_vm14, %v2742_v18, %v2746_v7  ;;  %v3238_v49 = vsel %vm2639_vm14, %v3233_v59, %v3237_v30 }
 0x28a   : > { %v3526_v2 = vrot.slane %v7120_v4, 1 }
 0x28b   : > { %v3941_v39 = vpop.f32.mrf.mxu0  ;;  %v4020_v55 = vadd.f32 %v3939_v53, %v3717_v47  ;;  %v3811_v53 = vsel %vm3751_vm15, %v3806_v54, %v3810_v57 }
 0x28c   : > { %v3527_v47 = vsel %vm3496_vm13, %v3524_v24, %v3526_v2 }
 0x28d   : > { %v7123_v34 = vadd.f32 %v7034_v9, %v4020_v55  ;;  %v2752_v55 = vshll.u32 %v5160_v11, 16 }
 0x28e   : > { %v3383_v26 = vpop.f32.mrf.mxu2 }
 0x28f   : > { %v3463_v13 = vadd.f32 %v3383_v26, %v2972_v52 }
 0x290   : > { %v2895_v29 = vpop.f32.mrf.mxu1  ;;  %v7131_v17 = vpop.f32.mrf.mxu3 }
 0x291   : > { %v3718_v8 = vadd.f32 %v7077_v21, %v3463_v13  ;;  %v2973_v50 = vadd.f32 %v2895_v29, %v6680_v42  ;;  %v3243_v42 = vshll.u32 %v7093_v51, 16  ;;  %v3247_v21 = vshrl.u32 %v7093_v51, 16 }
 0x292   : > { %v3241_v51 = vor.u32 %v3239_v56, %v3237_v30 }
 0x293   : > { %v3944_v60 = vpop.f32.mrf.mxu0  ;;  %v4021_v0 = vadd.f32 %v3941_v39, %v3718_v8  ;;  %4912 = vmatmul.msk.bf16.gmra.mxu1 %vm957_vm10, %v2747_v27  ;;  %5014 = vmatmul.msk.bf16.gmra.mxu2 %vm957_vm10, %v3238_v49  ;;  %v3812_v24 = vrot.slane %v3247_v21, 1  ;;  %v3813_v13 = vrot.slane %v3243_v42, 2  ;;  %v2750_v49 = vor.u32 %v2748_v6, %v2746_v7 }
 0x294   : > { %v2754_v8 = vrot.slane %v2752_v55, 1  ;;  %v5161_v55 = vld [vmem:[#allocation2 + $0xc0] sm:$0xff] }
 0x295   : > { %v7138_v52 = vadd.f32 %v7034_v9, %v4021_v0  ;;  %5050 = vmatmul.msk.bf16.gmra.mxu3 %vm957_vm10, %v3527_v47  ;;  %v3814_v38 = vor.u32 %v3813_v13, %v3812_v24  ;;  %v2756_v13 = vshrl.u32 %v5160_v11, 16 }
 0x296   : > { %5082 = vmatmul.msk.bf16.gmra.mxu0 %vm957_vm10, %v3811_v53  ;;  %v3386_v54 = vpop.f32.mrf.mxu2  ;;  %v3245_v53 = vrot.slane %v3243_v42, 1 }
 0x297   : > { %v3464_v10 = vadd.f32 %v3386_v54, %v2973_v50  ;;  %v7147_v50 = vld [vmem:[#allocation2 + $0xd0] sm:$0xff] }
 0x298   : > { %v2897_v39 = vpop.f32.mrf.mxu1  ;;  %v7145_v29 = vpop.f32.mrf.mxu3 }
 0x299   : > { %v3719_v18 = vadd.f32 %v7091_v46, %v3464_v10  ;;  %v2974_v59 = vadd.f32 %v2897_v39, %v6690_v63  ;;  %v2755_v63 = vsel %vm2639_vm14, %v2750_v49, %v2754_v8  ;;  %v3246_v10 = vsel %vm2639_vm14, %v3241_v51, %v3245_v53 }
 0x29a   : > { %v3528_v39 = vrot.slane %v7147_v50, 1 }
 0x29b   : > { %v3946_v26 = vpop.f32.mrf.mxu0  ;;  %v4022_v27 = vadd.f32 %v3944_v60, %v3719_v18  ;;  %v3815_v60 = vsel %vm3751_vm15, %v3810_v57, %v3814_v38 }
 0x29c   : > { %v3529_v18 = vsel %vm3496_vm13, %v3526_v2, %v3528_v39 }
 0x29d   : > { %v7150_v0 = vadd.f32 %v7034_v9, %v4022_v27  ;;  %v2760_v27 = vshll.u32 %v5161_v55, 16 }
 0x29e   : > { %v3388_v47 = vpop.f32.mrf.mxu2 }
 0x29f   : > { %v3465_v46 = vadd.f32 %v3388_v47, %v2974_v59 }
 0x2a0   : > { %v2900_v54 = vpop.f32.mrf.mxu1  ;;  %v7158_v42 = vpop.f32.mrf.mxu3 }
 0x2a1   : > { %v3720_v7 = vadd.f32 %v7104_v41, %v3465_v46  ;;  %v2975_v56 = vadd.f32 %v2900_v54, %v6699_v35  ;;  %v3251_v35 = vshll.u32 %v7120_v4, 16  ;;  %v3255_v41 = vshrl.u32 %v7120_v4, 16 }
 0x2a2   : > { %v3249_v4 = vor.u32 %v3247_v21, %v3245_v53 }
 0x2a3   : > { %v3949_v30 = vpop.f32.mrf.mxu0  ;;  %v4023_v6 = vadd.f32 %v3946_v26, %v3720_v7  ;;  %4913 = vmatmul.msk.bf16.gmra.mxu1 %vm957_vm10, %v2755_v63  ;;  %5015 = vmatmul.msk.bf16.gmra.mxu2 %vm957_vm10, %v3246_v10  ;;  %v3816_v2 = vrot.slane %v3255_v41, 1  ;;  %v3817_v46 = vrot.slane %v3251_v35, 2  ;;  %v2758_v10 = vor.u32 %v2756_v13, %v2754_v8 }
 0x2a4   : > { %v2762_v7 = vrot.slane %v2760_v27, 1  ;;  %v5162_v27 = vld [vmem:[#allocation2 + $0xc8] sm:$0xff] }
 0x2a5   : > { %v7165_v59 = vadd.f32 %v7034_v9, %v4023_v6  ;;  %5051 = vmatmul.msk.bf16.gmra.mxu3 %vm957_vm10, %v3529_v18  ;;  %v3818_v11 = vor.u32 %v3817_v46, %v3816_v2 }
 0x2a6   : > { %5083 = vmatmul.msk.bf16.gmra.mxu0 %vm957_vm10, %v3815_v60  ;;  %v3391_v57 = vpop.f32.mrf.mxu2  ;;  %v3253_v60 = vrot.slane %v3251_v35, 1 }
 0x2a7   : > { %v3466_v24 = vadd.f32 %v3391_v57, %v2975_v56  ;;  %v7174_v56 = vld [vmem:[#allocation2 + $0xd8] sm:$0xff] }
 0x2a8   : > { %v2902_v26 = vpop.f32.mrf.mxu1  ;;  %v7172_v54 = vpop.f32.mrf.mxu3 }
 0x2a9   : > { %v3721_v49 = vadd.f32 %v7118_v19, %v3466_v24  ;;  %v2976_v51 = vadd.f32 %v2902_v26, %v6712_v33  ;;  %v2763_v33 = vsel %vm2639_vm14, %v2758_v10, %v2762_v7  ;;  %v3254_v24 = vsel %vm2639_vm14, %v3249_v4, %v3253_v60 }
 0x2aa   : > { %v3530_v26 = vrot.slane %v7174_v56, 1  ;;  %v2768_v10 = vshll.u32 %v5162_v27, 16 }
 0x2ab   : > { %v3951_v47 = vpop.f32.mrf.mxu0  ;;  %v4024_v63 = vadd.f32 %v3949_v30, %v3721_v49  ;;  %v3819_v30 = vsel %vm3751_vm15, %v3814_v38, %v3818_v11  ;;  %v3037_v38 = vld [vmem:[#allocation2 + $0xe0] sm:$0x1] }
 0x2ac   : > { %v3531_v49 = vsel %vm3496_vm13, %v3528_v39, %v3530_v26  ;;  %v3111_v4 = vunpack.c.l.b16 %v3037_v38 }
 0x2ad   : > { %v7177_v6 = vadd.f32 %v7034_v9, %v4024_v63 }
 0x2ae   : > { %v3393_v18 = vpop.f32.mrf.mxu2 }
 0x2af   : > { %v3467_v19 = vadd.f32 %v3393_v18, %v2976_v51 }
 0x2b0   : > { %v2905_v57 = vpop.f32.mrf.mxu1  ;;  %v7185_v35 = vpop.f32.mrf.mxu3 }
 0x2b1   : > { %v3722_v8 = vadd.f32 %v7131_v17, %v3467_v19  ;;  %v2977_v21 = vadd.f32 %v2905_v57, %v6721_v62  ;;  %v3259_v62 = vshll.u32 %v7147_v50, 16  ;;  %v3263_v17 = vshrl.u32 %v7147_v50, 16 }
 0x2b3   : > { %v3954_v53 = vpop.f32.mrf.mxu0  ;;  %v4025_v13 = vadd.f32 %v3951_v47, %v3722_v8  ;;  %4914 = vmatmul.msk.bf16.gmra.mxu1 %vm957_vm10, %v2763_v33  ;;  %5016 = vmatmul.msk.bf16.gmra.mxu2 %vm957_vm10, %v3254_v24  ;;  %v2764_v47 = vshrl.u32 %v5161_v55, 16  ;;  %v3820_v57 = vrot.slane %v3263_v17, 1  ;;  %v3821_v33 = vrot.slane %v3259_v62, 2 }
 0x2b4   : > { %v7201_v55 = vpack.c.b16 %v3111_v4, %v3111_v4 }
 0x2b5   : > { %v7192_v51 = vadd.f32 %v7034_v9, %v4025_v13  ;;  %5052 = vmatmul.msk.bf16.gmra.mxu3 %vm957_vm10, %v3531_v49  ;;  %v2766_v50 = vor.u32 %v2764_v47, %v2762_v7  ;;  %v3257_v13 = vor.u32 %v3255_v41, %v3253_v60  ;;  %v3822_v38 = vor.u32 %v3821_v33, %v3820_v57 }
 0x2b6   : > { %5084 = vmatmul.msk.bf16.gmra.mxu0 %vm957_vm10, %v3819_v30  ;;  %v3396_v2 = vpop.f32.mrf.mxu2  ;;  %v2770_v30 = vrot.slane %v2768_v10, 1  ;;  %v5163_v10 = vld [vmem:[#allocation2 + $0xd0] sm:$0xff]  ;;  %v2772_v57 = vshrl.u32 %v5162_v27, 16 }
 0x2b7   : > { %7770 = vst [vmem:[#allocation7_spill] sm:$0xff] %v7192_v51  ;;  %v3468_v46 = vadd.f32 %v3396_v2, %v2977_v21  ;;  %v3261_v21 = vrot.slane %v3259_v62, 1  ;;  %v3532_v51 = vrot.slane %v7201_v55, 1  ;;  %v2776_v33 = vshll.u32 %v5163_v10, 16 }
 0x2b8   : > { %v2907_v63 = vpop.f32.mrf.mxu1  ;;  %v7199_v24 = vpop.f32.mrf.mxu3 }
 0x2b9   : > { %v3723_v18 = vadd.f32 %v7145_v29, %v3468_v46  ;;  %v2978_v39 = vadd.f32 %v2907_v63, %v6731_v25  ;;  %v2771_v25 = vsel %vm2639_vm14, %v2766_v50, %v2770_v30  ;;  %v3262_v63 = vsel %vm2639_vm14, %v3257_v13, %v3261_v21 }
 0x2ba   : > { %v3533_v4 = vsel %vm3496_vm13, %v3530_v26, %v3532_v51 }
 0x2bb   : > { %v3956_v19 = vpop.f32.mrf.mxu0  ;;  %v4026_v8 = vadd.f32 %v3954_v53, %v3723_v18  ;;  %v3823_v53 = vsel %vm3751_vm15, %v3818_v11, %v3822_v38 }
 0x2bd   : > { %v7204_v49 = vadd.f32 %v7034_v9, %v4026_v8 }
 0x2be   : > { %v3398_v2 = vpop.f32.mrf.mxu2 }
 0x2bf   : > { %v3469_v29 = vadd.f32 %v3398_v2, %v2978_v39 }
 0x2c0   : > { %v2910_v46 = vpop.f32.mrf.mxu1  ;;  %v7212_v62 = vpop.f32.mrf.mxu3 }
 0x2c1   : > { %v3724_v7 = vadd.f32 %v7158_v42, %v3469_v29  ;;  %v2979_v41 = vadd.f32 %v2910_v46, %v6740_v1  ;;  %v3267_v1 = vshll.u32 %v7174_v56, 16  ;;  %v3271_v42 = vshrl.u32 %v7174_v56, 16  ;;  %v3747_v29 = vld [vmem:[#allocation2 + $0xe0] sm:$0x3] }
 0x2c2   : > { %v2778_v56 = vrot.slane %v2776_v33, 1 }
 0x2c3   : > { %v3959_v60 = vpop.f32.mrf.mxu0  ;;  %v4027_v47 = vadd.f32 %v3956_v19, %v3724_v7  ;;  %4915 = vmatmul.msk.bf16.gmra.mxu1 %vm957_vm10, %v2771_v25  ;;  %5017 = vmatmul.msk.bf16.gmra.mxu2 %vm957_vm10, %v3262_v63  ;;  %v3824_v26 = vrot.slane %v3271_v42, 1  ;;  %v3825_v51 = vrot.slane %v3267_v1, 2  ;;  %v2774_v25 = vor.u32 %v2772_v57, %v2770_v30 }
 0x2c4   : > { %v3265_v63 = vor.u32 %v3263_v17, %v3261_v21  ;;  %v3269_v7 = vrot.slane %v3267_v1, 1 }
 0x2c5   : > { %v7219_v18 = vadd.f32 %v7034_v9, %v4027_v47  ;;  %5053 = vmatmul.msk.bf16.gmra.mxu3 %vm957_vm10, %v3533_v4  ;;  %v3826_v27 = vor.u32 %v3825_v51, %v3824_v26  ;;  %v3749_v47 = vunpack.c.l.b16 %v3747_v29 }
 0x2c6   : > { %5085 = vmatmul.msk.bf16.gmra.mxu0 %vm957_vm10, %v3823_v53  ;;  %v3401_v11 = vpop.f32.mrf.mxu2  ;;  %v2545_v53 = vld [vmem:[#allocation2 + $0xd8] sm:$0x1] }
 0x2c7   : > { %v3470_v39 = vadd.f32 %v3401_v11, %v2979_v41  ;;  %v2779_v11 = vsel %vm2639_vm14, %v2774_v25, %v2778_v56  ;;  %v3827_v21 = vsel %vm3751_vm15, %v3822_v38, %v3826_v27  ;;  %v3750_v1 = vpack.c.b16 %v3749_v47, %v3749_v47 }
 0x2c8   : > { %v2912_v19 = vpop.f32.mrf.mxu1  ;;  %v7226_v2 = vpop.f32.mrf.mxu3  ;;  %v3275_v25 = vshll.u32 %v7201_v55, 16 }
 0x2c9   : > { %v3725_v8 = vadd.f32 %v7172_v54, %v3470_v39  ;;  %v2980_v50 = vadd.f32 %v2912_v19, %v6757_v36  ;;  %v3270_v39 = vsel %vm2639_vm14, %v3265_v63, %v3269_v7  ;;  %v2619_v19 = vunpack.c.l.b16 %v2545_v53 }
 0x2ca   : > { %v3829_v26 = vshrl.u32 %v3750_v1, 16 }
 0x2cb   : > { %v3961_v13 = vpop.f32.mrf.mxu0  ;;  %v4028_v46 = vadd.f32 %v3959_v60, %v3725_v8  ;;  %v2638_v8 = vpack.c.b16 %v2619_v19, %v2619_v19  ;;  %v3273_v19 = vor.u32 %v3271_v42, %v3269_v7 }
 0x2cc   : > { %v3831_v47 = vrot.slane %v3829_v26, 1 }
 0x2cd   : > { %v7229_v41 = vadd.f32 %v7034_v9, %v4028_v46  ;;  %v2780_v46 = vshrl.u32 %v5163_v10, 16  ;;  %v2784_v38 = vshll.u32 %v2638_v8, 16 }
 0x2ce   : > { %v3403_v54 = vpop.f32.mrf.mxu2 }
 0x2cf   : > { %v3471_v4 = vadd.f32 %v3403_v54, %v2980_v50 }
 0x2d0   : > { %v2915_v36 = vpop.f32.mrf.mxu1  ;;  %v3668_v57 = vpop.f32.mrf.mxu3 }
 0x2d1   : > { %v3726_v60 = vadd.f32 %v7185_v35, %v3471_v4  ;;  %v2981_v30 = vadd.f32 %v2915_v36, %v6767_v58  ;;  %v3832_v35 = vshll.u32 %v3750_v1, 16 }
 0x2d3   : > { %v3964_v17 = vpop.f32.mrf.mxu0  ;;  %v4029_v33 = vadd.f32 %v3961_v13, %v3726_v60  ;;  %4916 = vmatmul.msk.bf16.gmra.mxu1 %vm957_vm10, %v2779_v11  ;;  %5018 = vmatmul.msk.bf16.gmra.mxu2 %vm957_vm10, %v3270_v39  ;;  %v3834_v54 = vrot.slane %v3832_v35, 2  ;;  %v2782_v11 = vor.u32 %v2780_v46, %v2778_v56  ;;  %v2786_v39 = vrot.slane %v2784_v38, 1 }
 0x2d4   : > { %v3277_v60 = vrot.slane %v3275_v25, 1 }
 0x2d5   : > { %v7240_v50 = vadd.f32 %v7034_v9, %v4029_v33  ;;  %v3835_v10 = vor.u32 %v3834_v54, %v3831_v47 }
 0x2d6   : > { %5086 = vmatmul.msk.bf16.gmra.mxu0 %vm957_vm10, %v3827_v21  ;;  %v3406_v51 = vpop.f32.mrf.mxu2 }
 0x2d7   : > { %v3472_v58 = vadd.f32 %v3406_v51, %v2981_v30  ;;  %v3836_v56 = vsel %vm3751_vm15, %v3826_v27, %v3835_v10 }
 0x2d8   : > { %v2917_v29 = vpop.f32.mrf.mxu1  ;;  %v3671_v4 = vpop.f32.mrf.mxu3 }
 0x2d9   : > { %v3727_v13 = vadd.f32 %v7199_v24, %v3472_v58  ;;  %v2982_v63 = vadd.f32 %v2917_v29, %v6780_v43  ;;  %v2787_v24 = vsel %vm2639_vm14, %v2782_v11, %v2786_v39  ;;  %v3278_v43 = vsel %vm2639_vm14, %v3273_v19, %v3277_v60 }
 0x2db   : > { %v3966_v53 = vpop.f32.mrf.mxu0  ;;  %v4030_v36 = vadd.f32 %v3964_v17, %v3727_v13 }
 0x2dd   : > { %v7246_v30 = vadd.f32 %v7034_v9, %v4030_v36 }
 0x2de   : > { %v3408_v21 = vpop.f32.mrf.mxu2 }
 0x2df   : > { %v3473_v1 = vadd.f32 %v3408_v21, %v2982_v63 }
 0x2e0   : > { %v2920_v55 = vpop.f32.mrf.mxu1  ;;  %v3673_v7 = vpop.f32.mrf.mxu3 }
 0x2e1   : > { %v3728_v33 = vadd.f32 %v7212_v62, %v3473_v1  ;;  %v2983_v8 = vadd.f32 %v2920_v55, %v6799_v40 }
 0x2e3   : > { %v3969_v17 = vpop.f32.mrf.mxu0  ;;  %v4031_v42 = vadd.f32 %v3966_v53, %v3728_v33  ;;  %4917 = vmatmul.msk.bf16.gmra.mxu1 %vm957_vm10, %v2787_v24  ;;  %5019 = vmatmul.msk.bf16.gmra.mxu2 %vm957_vm10, %v3278_v43 }
 0x2e5   : > { %v7257_v26 = vadd.f32 %v7034_v9, %v4031_v42 }
 0x2e6   : > { %5087 = vmatmul.msk.bf16.gmra.mxu0 %vm957_vm10, %v3836_v56  ;;  %v3411_v35 = vpop.f32.mrf.mxu2 }
 0x2e7   : > { %v3474_v51 = vadd.f32 %v3411_v35, %v2983_v8 }
 0x2e8   : > { %v2922_v58 = vpop.f32.mrf.mxu1  ;;  %v3676_v25 = vpop.f32.mrf.mxu3 }
 0x2e9   : > { %v3729_v62 = vadd.f32 %v7226_v2, %v3474_v51  ;;  %v2984_v40 = vadd.f32 %v2922_v58, %v6813_v28 }
 0x2eb   : > { %v3971_v29 = vpop.f32.mrf.mxu0  ;;  %v4032_v27 = vadd.f32 %v3969_v17, %v3729_v62 }
 0x2ed   : > { %v7262_v46 = vadd.f32 %v7034_v9, %v4032_v27 }
 0x2ee   : > { %v3413_v38 = vpop.f32.mrf.mxu2 }
 0x2ef   : > { %v3475_v13 = vadd.f32 %v3413_v38, %v2984_v40 }
 0x2f0   : > { %v2925_v63 = vpop.f32.mrf.mxu1  ;;  %v3678_v19 = vpop.f32.mrf.mxu3 }
 0x2f1   : > { %v3730_v53 = vadd.f32 %v3668_v57, %v3475_v13  ;;  %v2985_v47 = vadd.f32 %v2925_v63, %v6829_v12 }
 0x2f3   : > { %v3974_v54 = vpop.f32.mrf.mxu0  ;;  %v4033_v36 = vadd.f32 %v3971_v29, %v3730_v53 }
 0x2f5   : > { %v7266_v11 = vadd.f32 %v7034_v9, %v4033_v36 }
 0x2f6   : > { %v3416_v2 = vpop.f32.mrf.mxu2 }
 0x2f7   : > { %v3476_v39 = vadd.f32 %v3416_v2, %v2985_v47 }
 0x2f8   : > { %v2927_v28 = vpop.f32.mrf.mxu1  ;;  %v3681_v17 = vpop.f32.mrf.mxu3 }
 0x2f9   : > { %v3731_v60 = vadd.f32 %v3671_v4, %v3476_v39  ;;  %v2986_v10 = vadd.f32 %v2927_v28, %v6845_v3 }
 0x2fb   : > { %v3976_v21 = vpop.f32.mrf.mxu0  ;;  %v4034_v1 = vadd.f32 %v3974_v54, %v3731_v60 }
 0x2fd   : > { %v7270_v55 = vadd.f32 %v7034_v9, %v4034_v1 }
 0x2fe   : > { %v3418_v57 = vpop.f32.mrf.mxu2 }
 0x2ff   : > { %v3477_v24 = vadd.f32 %v3418_v57, %v2986_v10 }
 0x300   : > { %v2930_v12 = vpop.f32.mrf.mxu1  ;;  %v3683_v29 = vpop.f32.mrf.mxu3 }
 0x301   : > { %v3732_v43 = vadd.f32 %v3673_v7, %v3477_v24  ;;  %v2987_v33 = vadd.f32 %v2930_v12, %v6856_v31 }
 0x303   : > { %v3979_v8 = vpop.f32.mrf.mxu0  ;;  %v4035_v56 = vadd.f32 %v3976_v21, %v3732_v43 }
 0x305   : > { %v7274_v42 = vadd.f32 %v7034_v9, %v4035_v56 }
 0x306   : > { %v3421_v4 = vpop.f32.mrf.mxu2 }
 0x307   : > { %v3478_v35 = vadd.f32 %v3421_v4, %v2987_v33 }
 0x308   : > { %v2932_v3 = vpop.f32.mrf.mxu1  ;;  %v3686_v36 = vpop.f32.mrf.mxu3 }
 0x309   : > { %v3733_v51 = vadd.f32 %v3676_v25, %v3478_v35  ;;  %v2988_v58 = vadd.f32 %v2932_v3, %v6870_v61 }
 0x30b   : > { %v3981_v62 = vpop.f32.mrf.mxu0  ;;  %v4036_v40 = vadd.f32 %v3979_v8, %v3733_v51 }
 0x30d   : > { %v7278_v27 = vadd.f32 %v7034_v9, %v4036_v40 }
 0x30e   : > { %v3423_v7 = vpop.f32.mrf.mxu2 }
 0x30f   : > { %v3479_v31 = vadd.f32 %v3423_v7, %v2988_v58 }
 0x310   : > { %v2935_v38 = vpop.f32.mrf.mxu1  ;;  %v3688_v57 = vpop.f32.mrf.mxu3 }
 0x311   : > { %v3734_v13 = vadd.f32 %v3678_v19, %v3479_v31  ;;  %v2989_v63 = vadd.f32 %v2935_v38, %v6881_v20 }
 0x313   : > { %v3984_v53 = vpop.f32.mrf.mxu0  ;;  %v4037_v47 = vadd.f32 %v3981_v62, %v3734_v13 }
 0x315   : > { %v7282_v54 = vadd.f32 %v7034_v9, %v4037_v47 }
 0x316   : > { %v3426_v25 = vpop.f32.mrf.mxu2 }
 0x317   : > { %v3480_v61 = vadd.f32 %v3426_v25, %v2989_v63 }
 0x318   : > { %v2937_v2 = vpop.f32.mrf.mxu1  ;;  %v3691_v51 = vpop.f32.mrf.mxu3 }
 0x319   : > { %v3735_v39 = vadd.f32 %v3681_v17, %v3480_v61  ;;  %v2990_v28 = vadd.f32 %v2937_v2, %v6895_v14 }
 0x31b   : > { %v3986_v60 = vpop.f32.mrf.mxu0  ;;  %v4038_v10 = vadd.f32 %v3984_v53, %v3735_v39  ;;  %v7771_v53 = vld [vmem:[#allocation9_spill] sm:$0xff] }
 0x31d   : > { %v7286_v21 = vadd.f32 %v7034_v9, %v4038_v10 }
 0x31e   : > { %v3428_v19 = vpop.f32.mrf.mxu2 }
 0x31f   : > { %v3481_v1 = vadd.f32 %v3428_v19, %v2990_v28 }
 0x320   : > { %v2940_v20 = vpop.f32.mrf.mxu1  ;;  %v3693_v13 = vpop.f32.mrf.mxu3 }
 0x321   : > { %v3736_v24 = vadd.f32 %v3683_v29, %v3481_v1  ;;  %v2991_v12 = vadd.f32 %v2940_v20, %v6906_v32 }
 0x323   : > { %v3989_v43 = vpop.f32.mrf.mxu0  ;;  %v4039_v33 = vadd.f32 %v3986_v60, %v3736_v24  ;;  %v7772_v60 = vld [vmem:[#allocation10_spill] sm:$0xff] }
 0x325   : > { %v7290_v8 = vadd.f32 %v7034_v9, %v4039_v33 }
 0x326   : > { %v3431_v17 = vpop.f32.mrf.mxu2 }
 0x327   : > { %v3482_v56 = vadd.f32 %v3431_v17, %v2991_v12  ;;  %v7773_v17 = vld [vmem:[#allocation3_spill] sm:$0xff] }
 0x328   : > { %v2942_v14 = vpop.f32.mrf.mxu1  ;;  %v3696_v1 = vpop.f32.mrf.mxu3 }
 0x329   : > { %v3737_v4 = vadd.f32 %v3686_v36, %v3482_v56  ;;  %v2992_v35 = vadd.f32 %v2942_v14, %v6920_v44 }
 0x32b   : > { %v3991_v3 = vpop.f32.mrf.mxu0  ;;  %v4040_v58 = vadd.f32 %v3989_v43, %v3737_v4 }
 0x32d   : > { %v7294_v62 = vadd.f32 %v7034_v9, %v4040_v58 }
 0x32e   : > { %v3433_v40 = vpop.f32.mrf.mxu2 }
 0x32f   : > { %v3483_v29 = vadd.f32 %v3433_v40, %v2992_v35 }
 0x330   : > { %v2945_v32 = vpop.f32.mrf.mxu1 }
 0x331   : > { %v3738_v7 = vadd.f32 %v3688_v57, %v3483_v29  ;;  %v2993_v47 = vadd.f32 %v2945_v32, %v7771_v53  ;;  %v7774_v32 = vld [vmem:[#allocation4_spill] sm:$0xff] }
 0x333   : > { %v3994_v31 = vpop.f32.mrf.mxu0  ;;  %v4041_v38 = vadd.f32 %v3991_v3, %v3738_v7  ;;  %v3698_v3 = vpop.f32.mrf.mxu3 }
 0x335   : > { %v7297_v63 = vadd.f32 %v7034_v9, %v4041_v38 }
 0x336   : > { %v3436_v25 = vpop.f32.mrf.mxu2 }
 0x337   : > { %v3484_v44 = vadd.f32 %v3436_v25, %v2993_v47 }
 0x338   : > { %v2947_v36 = vpop.f32.mrf.mxu1 }
 0x339   : > { %v3739_v61 = vadd.f32 %v3691_v51, %v3484_v44  ;;  %v2994_v10 = vadd.f32 %v2947_v36, %v7772_v60 }
 0x33b   : > { %v3996_v2 = vpop.f32.mrf.mxu0  ;;  %v4042_v39 = vadd.f32 %v3994_v31, %v3739_v61  ;;  %v3701_v47 = vpop.f32.mrf.mxu3  ;;  %v7775_v61 = vld [vmem:[#allocation5_spill] sm:$0xff] }
 0x33d   : > { %v7301_v28 = vadd.f32 %v7034_v9, %v4042_v39 }
 0x33e   : > { %v3438_v19 = vpop.f32.mrf.mxu2 }
 0x33f   : > { %v3485_v20 = vadd.f32 %v3438_v19, %v2994_v10 }
 0x340   : > { %v2950_v57 = vpop.f32.mrf.mxu1 }
 0x341   : > { %v3740_v24 = vadd.f32 %v3693_v13, %v3485_v20  ;;  %v2995_v56 = vadd.f32 %v2950_v57, %v7773_v17 }
 0x343   : > { %v3999_v12 = vpop.f32.mrf.mxu0  ;;  %v4043_v43 = vadd.f32 %v3996_v2, %v3740_v24  ;;  %v3703_v20 = vpop.f32.mrf.mxu3  ;;  %v7776_v24 = vld [vmem:[#allocation6_spill] sm:$0xff] }
 0x345   : > { %v7305_v33 = vadd.f32 %v7034_v9, %v4043_v43 }
 0x346   : > { %v3441_v14 = vpop.f32.mrf.mxu2 }
 0x347   : > { %v3486_v4 = vadd.f32 %v3441_v14, %v2995_v56 }
 0x348   : > { %v2952_v35 = vpop.f32.mrf.mxu1 }
 0x349   : > { %v3741_v51 = vadd.f32 %v3696_v1, %v3486_v4  ;;  %v2996_v7 = vadd.f32 %v2952_v35, %v7774_v32 }
 0x34b   : > { %v4001_v58 = vpop.f32.mrf.mxu0  ;;  %v4044_v40 = vadd.f32 %v3999_v12, %v3741_v51 }
 0x34d   : > { %v7309_v29 = vadd.f32 %v7034_v9, %v4044_v40 }
 0x34e   : > { %v3443_v31 = vpop.f32.mrf.mxu2 }
 0x34f   : > { %v3487_v38 = vadd.f32 %v3443_v31, %v2996_v7 }
 0x350   : > { %v2955_v13 = vpop.f32.mrf.mxu1 }
 0x351   : > { %v3742_v53 = vadd.f32 %v3698_v3, %v3487_v38  ;;  %v2997_v2 = vadd.f32 %v2955_v13, %v7775_v61 }
 0x353   : > { %v4045_v25 = vadd.f32 %v4001_v58, %v3742_v53  ;;  %v4004_v44 = vpop.f32.mrf.mxu0  ;;  %v3706_v58 = vpop.f32.mrf.mxu3 }
 0x355   : > { %v7313_v36 = vadd.f32 %v7034_v9, %v4045_v25 }
 0x356   : > { %v3446_v39 = vpop.f32.mrf.mxu2 }
 0x357   : > { %v3488_v60 = vadd.f32 %v3446_v39, %v2997_v2 }
 0x358   : > { %v2957_v10 = vpop.f32.mrf.mxu1 }
 0x359   : > { %v3743_v19 = vadd.f32 %v3701_v47, %v3488_v60  ;;  %v2998_v12 = vadd.f32 %v2957_v10, %v7776_v24 }
 0x35b   : > { %v4046_v1 = vadd.f32 %v4004_v44, %v3743_v19  ;;  %v4006_v43 = vpop.f32.mrf.mxu0  ;;  %v3708_v61 = vpop.f32.mrf.mxu3 }
 0x35d   : > { %v7317_v57 = vadd.f32 %v7034_v9, %v4046_v1 }
 0x35e   : > { %v3448_v17 = vpop.f32.mrf.mxu2 }
 0x35f   : > { %v3489_v56 = vadd.f32 %v3448_v17, %v2998_v12 }
 0x360   : > { %v2960_v14 = vpop.f32.mrf.mxu1 }
 0x361   : > { %v3744_v4 = vadd.f32 %v3703_v20, %v3489_v56  ;;  %v2999_v51 = vadd.f32 %v2960_v14, %v7006_v16 }
 0x363   : > { %v4047_v35 = vadd.f32 %v4006_v43, %v3744_v4  ;;  %v4009_v7 = vpop.f32.mrf.mxu0 }
 0x365   : > { %v7321_v3 = vadd.f32 %v7034_v9, %v4047_v35 }
 0x366   : > { %v3451_v40 = vpop.f32.mrf.mxu2 }
 0x367   : > { %v3490_v32 = vadd.f32 %v3451_v40, %v2999_v51 }
 0x368   : > { %v2962_v38 = vpop.f32.mrf.mxu1 }
 0x369   : > { %v3745_v31 = vadd.f32 %v3706_v58, %v3490_v32  ;;  %v3000_v47 = vadd.f32 %v2962_v38, %v7021_v22 }
 0x36b   : > { %v4048_v13 = vadd.f32 %v4009_v7, %v3745_v31  ;;  %v4011_v39 = vpop.f32.mrf.mxu0 }
 0x36d   : > { %v7325_v53 = vadd.f32 %v7034_v9, %v4048_v13 }
 0x36e   : > { %v3453_v25 = vpop.f32.mrf.mxu2 }
 0x36f   : > { %v3491_v44 = vadd.f32 %v3453_v25, %v3000_v47 }
 0x371   : > { %v3746_v2 = vadd.f32 %v3708_v61, %v3491_v44  ;;  %4094 = sbr.rel (%p5088_p7) target bundleno = 965 (0x3c5), region = 44 }
 0x373   : > { %v4049_v60 = vadd.f32 %v4011_v39, %v3746_v2 }
 0x375   : > { %v7329_v16 = vadd.f32 %v7034_v9, %v4049_v60 }
 0x376   : > { %vm4095_vm1 = vcmp.gt.f32.partialorder %v7042_v23, 0.0  ;;  %v4131_v10 = vmul.f32 0.2, %v7042_v23  ;;  %v5258_v22 = vld [vmem:[%s7663_s3] sm:$0xff]   ;;  %vm4419_vm2 = vcmask 519168   ;;  %vm4096_vm3 = vcmp.gt.f32.partialorder %v7057_v15, 0.0 }
 0x377   : > { %v5259_v19 = vunpack.c.l.bf16 %v5258_v22  ;;  %v4132_v1 = vmul.f32 0.2, %v7057_v15  ;;  %v5260_v20 = vunpack.c.h.bf16 %v5258_v22  ;;  %vm4097_vm4 = vcmp.gt.f32.partialorder %v7069_v45, 0.0  ;;  %v5351_v9 = vld [vmem:[%s7663_s3 + $0x8] sm:$0xff]   ;;  %v5352_v17 = vld [vmem:[%s7663_s3 + $0x10] sm:$0xff]  }
 0x378   : > { %v4167_v24 = vsel %vm4095_vm1, %v7042_v23, %v4131_v10  ;;  %v4133_v12 = vmul.f32 0.2, %v7069_v45  ;;  %v5263_v43 = vunpack.c.l.bf16 %v5351_v9  ;;  %vm4098_vm5 = vcmp.gt.f32.partialorder %v7084_v37, 0.0 }
 0x379   : > { %v4203_v56 = vpack.c.bf16 %v4167_v24, %v4167_v24  ;;  %v4168_v14 = vsel %vm4096_vm3, %v7057_v15, %v4132_v1  ;;  %v4134_v4 = vmul.f32 0.2, %v7084_v37  ;;  %v5264_v35 = vunpack.c.h.bf16 %v5351_v9 }
 0x37a   : > { %v4204_v51 = vpack.c.bf16 %v4168_v14, %v4168_v14  ;;  %v4169_v58 = vsel %vm4097_vm4, %v7069_v45, %v4133_v12  ;;  %vm4099_vm6 = vcmp.gt.f32.partialorder %v7096_v5, 0.0  ;;  %v4135_v40 = vmul.f32 0.2, %v7096_v5 }
 0x37b   : > { %v4275_v32 = vunpack.c.l.bf16 %v4203_v56  ;;  %v4205_v7 = vpack.c.bf16 %v4169_v58, %v4169_v58  ;;  %v4170_v31 = vsel %vm4098_vm5, %v7084_v37, %v4134_v4  ;;  %v5267_v38 = vunpack.c.l.bf16 %v5352_v17 }
 0x37c   : > { %v4276_v13 = vunpack.c.l.bf16 %v4204_v51  ;;  %v4206_v47 = vpack.c.bf16 %v4170_v31, %v4170_v31  ;;  %v4171_v25 = vsel %vm4099_vm6, %v7096_v5, %v4135_v40  ;;  %vm4100_vm7 = vcmp.gt.f32.partialorder %v7111_v48, 0.0 }
 0x37d   : > { %v4347_v44 = vmul.f32 %v5259_v19, %v4275_v32  ;;  %v4277_v61 = vunpack.c.l.bf16 %v4205_v7  ;;  %v4207_v2 = vpack.c.bf16 %v4171_v25, %v4171_v25  ;;  %v4136_v39 = vmul.f32 0.2, %v7111_v48  ;;  %v5353_v19 = vld [vmem:[%s7663_s3 + $0x18] sm:$0xff]  }
 0x37e   : > { %v4348_v60 = vmul.f32 %v5260_v20, %v4276_v13  ;;  %v4278_v10 = vunpack.c.l.bf16 %v4206_v47  ;;  %v5268_v22 = vunpack.c.h.bf16 %v5352_v17  ;;  %vm4101_vm8 = vcmp.gt.f32.partialorder %v7123_v34, 0.0 }
 0x37f   : > { %v4383_v1 = vpack.c.bf16 %v4347_v44, %v4347_v44  ;;  %v4349_v9 = vmul.f32 %v5263_v43, %v4277_v61  ;;  %v4279_v24 = vunpack.c.l.bf16 %v4207_v2  ;;  %v4172_v12 = vsel %vm4100_vm7, %v7111_v48, %v4136_v39 }
 0x380   : > { %v4384_v56 = vpack.c.bf16 %v4348_v60, %v4348_v60  ;;  %v4350_v14 = vmul.f32 %v5264_v35, %v4278_v10  ;;  %v4208_v4 = vpack.c.bf16 %v4172_v12, %v4172_v12  ;;  %v4137_v51 = vmul.f32 0.2, %v7123_v34 }
 0x381   : > { %4420 = vst.msk [vmem:[#allocation2 + $0x48] sm:$0xf] %vm4419_vm2, %v4383_v1  ;;  %v4385_v20 = vpack.c.bf16 %v4349_v9, %v4349_v9  ;;  %v4351_v17 = vmul.f32 %v5267_v38, %v4279_v24  ;;  %vm4102_vm9 = vcmp.gt.f32.partialorder %v7138_v52, 0.0  ;;  %v4138_v40 = vmul.f32 0.2, %v7138_v52  ;;  %v5354_v38 = vld [vmem:[%s7663_s3 + $0x20] sm:$0xff]  }
 0x382   : > { %4421 = vst.msk [vmem:[#allocation2 + $0x4c] sm:$0xf] %vm4419_vm2, %v4384_v56  ;;  %v4386_v43 = vpack.c.bf16 %v4350_v14, %v4350_v14  ;;  %v4280_v58 = vunpack.c.l.bf16 %v4208_v4  ;;  %v4173_v35 = vsel %vm4101_vm8, %v7123_v34, %v4137_v51  ;;  %v5271_v31 = vunpack.c.l.bf16 %v5353_v19  ;;  %v5355_v56 = vld [vmem:[%s7663_s3 + $0x28] sm:$0xff]  }
 0x383   : > { %4422 = vst.msk [vmem:[#allocation2 + $0x50] sm:$0xf] %vm4419_vm2, %v4385_v20  ;;  %v4387_v32 = vpack.c.bf16 %v4351_v17, %v4351_v17  ;;  %v4209_v7 = vpack.c.bf16 %v4173_v35, %v4173_v35  ;;  %vm4103_vm0 = vcmp.gt.f32.partialorder %v7150_v0, 0.0  ;;  %v4174_v47 = vsel %vm4102_vm9, %v7138_v52, %v4138_v40 }
 0x384   : > { %4423 = vst.msk [vmem:[#allocation2 + $0x54] sm:$0xf] %vm4419_vm2, %v4386_v43  ;;  %v4352_v13 = vmul.f32 %v5268_v22, %v4280_v58  ;;  %v5272_v25 = vunpack.c.h.bf16 %v5353_v19  ;;  %v4139_v44 = vmul.f32 0.2, %v7150_v0  ;;  %v4210_v2 = vpack.c.bf16 %v4174_v47, %v4174_v47  ;;  %v7777_v19 = vld [vmem:[#allocation7_spill] sm:$0xff] }
 0x385   : > { %4424 = vst.msk [vmem:[#allocation2 + $0x58] sm:$0xf] %vm4419_vm2, %v4387_v32  ;;  %v4281_v61 = vunpack.c.l.bf16 %v4209_v7  ;;  %vm4104_vm11 = vcmp.gt.f32.partialorder %v7165_v59, 0.0  ;;  %v4140_v39 = vmul.f32 0.2, %v7165_v59  ;;  %v5275_v1 = vunpack.c.l.bf16 %v5354_v38  ;;  %v5356_v47 = vld [vmem:[%s7663_s3 + $0x30] sm:$0xff]  }
 0x386   : > { %v4388_v60 = vpack.c.bf16 %v4352_v13, %v4352_v13  ;;  %v4175_v10 = vsel %vm4103_vm0, %v7150_v0, %v4139_v44  ;;  %vm4105_vm12 = vcmp.gt.f32.partialorder %v7177_v6, 0.0  ;;  %v4282_v9 = vunpack.c.l.bf16 %v4210_v2 }
 0x387   : > { %v4353_v22 = vmul.f32 %v5271_v31, %v4281_v61  ;;  %v4211_v24 = vpack.c.bf16 %v4175_v10, %v4175_v10  ;;  %v4176_v12 = vsel %vm4104_vm11, %v7165_v59, %v4140_v39  ;;  %v5276_v4 = vunpack.c.h.bf16 %v5354_v38 }
 0x388   : > { %4425 = vst.msk [vmem:[#allocation2 + $0x5c] sm:$0xf] %vm4419_vm2, %v4388_v60  ;;  %v4212_v14 = vpack.c.bf16 %v4176_v12, %v4176_v12  ;;  %v4141_v51 = vmul.f32 0.2, %v7177_v6  ;;  %vm4106_vm13 = vcmp.gt.f32.partialorder %v7777_v19, 0.0  ;;  %v4354_v17 = vmul.f32 %v5272_v25, %v4282_v9 }
 0x389   : > { %v4389_v20 = vpack.c.bf16 %v4353_v22, %v4353_v22  ;;  %v4283_v43 = vunpack.c.l.bf16 %v4211_v24  ;;  %v4142_v58 = vmul.f32 0.2, %v7777_v19  ;;  %v5279_v32 = vunpack.c.l.bf16 %v5355_v56 }
 0x38a   : > { %v4284_v35 = vunpack.c.l.bf16 %v4212_v14  ;;  %v4177_v40 = vsel %vm4105_vm12, %v7177_v6, %v4141_v51  ;;  %vm4107_vm14 = vcmp.gt.f32.partialorder %v7204_v49, 0.0  ;;  %v4390_v7 = vpack.c.bf16 %v4354_v17, %v4354_v17 }
 0x38b   : > { %4426 = vst.msk [vmem:[#allocation2 + $0x60] sm:$0xf] %vm4419_vm2, %v4389_v20  ;;  %v4355_v31 = vmul.f32 %v5275_v1, %v4283_v43  ;;  %v4213_v38 = vpack.c.bf16 %v4177_v40, %v4177_v40  ;;  %v4178_v13 = vsel %vm4106_vm13, %v7777_v19, %v4142_v58  ;;  %v5280_v61 = vunpack.c.h.bf16 %v5355_v56 }
 0x38c   : > { %v4356_v25 = vmul.f32 %v5276_v4, %v4284_v35  ;;  %v4214_v44 = vpack.c.bf16 %v4178_v13, %v4178_v13  ;;  %v4143_v2 = vmul.f32 0.2, %v7204_v49  ;;  %4427 = vst.msk [vmem:[#allocation2 + $0x64] sm:$0xf] %vm4419_vm2, %v4390_v7  ;;  %vm4108_vm15 = vcmp.gt.f32.partialorder %v7219_v18, 0.0  ;;  %v5357_v4 = vld [vmem:[%s7663_s3 + $0x38] sm:$0xff]  }
 0x38d   : > { %v4391_v39 = vpack.c.bf16 %v4355_v31, %v4355_v31  ;;  %v4285_v60 = vunpack.c.l.bf16 %v4213_v38  ;;  %v4144_v10 = vmul.f32 0.2, %v7219_v18  ;;  %v5283_v24 = vunpack.c.l.bf16 %v5356_v47 }
 0x38e   : > { %v4392_v1 = vpack.c.bf16 %v4356_v25, %v4356_v25  ;;  %v4286_v22 = vunpack.c.l.bf16 %v4214_v44  ;;  %v4179_v9 = vsel %vm4107_vm14, %v7204_v49, %v4143_v2  ;;  %vm4109_vm1 = vcmp.gt.f32.partialorder %v7229_v41, 0.0 }
 0x38f   : > { %4428 = vst.msk [vmem:[#allocation2 + $0x68] sm:$0xf] %vm4419_vm2, %v4391_v39  ;;  %v4357_v12 = vmul.f32 %v5279_v32, %v4285_v60  ;;  %v4215_v56 = vpack.c.bf16 %v4179_v9, %v4179_v9  ;;  %v4180_v14 = vsel %vm4108_vm15, %v7219_v18, %v4144_v10  ;;  %v5284_v20 = vunpack.c.h.bf16 %v5356_v47  ;;  %v5358_v47 = vld [vmem:[%s7663_s3 + $0x40] sm:$0xff]  }
 0x390   : > { %4429 = vst.msk [vmem:[#allocation2 + $0x6c] sm:$0xf] %vm4419_vm2, %v4392_v1  ;;  %v4358_v51 = vmul.f32 %v5280_v61, %v4286_v22  ;;  %v4216_v19 = vpack.c.bf16 %v4180_v14, %v4180_v14  ;;  %v4145_v17 = vmul.f32 0.2, %v7229_v41  ;;  %vm4110_vm3 = vcmp.gt.f32.partialorder %v7240_v50, 0.0 }
 0x391   : > { %v4393_v43 = vpack.c.bf16 %v4357_v12, %v4357_v12  ;;  %v4287_v58 = vunpack.c.l.bf16 %v4215_v56  ;;  %v4146_v35 = vmul.f32 0.2, %v7240_v50  ;;  %v5287_v31 = vunpack.c.l.bf16 %v5357_v4 }
 0x392   : > { %v4394_v40 = vpack.c.bf16 %v4358_v51, %v4358_v51  ;;  %v4288_v32 = vunpack.c.l.bf16 %v4216_v19  ;;  %v4181_v7 = vsel %vm4109_vm1, %v7229_v41, %v4145_v17  ;;  %vm4111_vm4 = vcmp.gt.f32.partialorder %v7246_v30, 0.0 }
 0x393   : > { %4430 = vst.msk [vmem:[#allocation2 + $0x70] sm:$0xf] %vm4419_vm2, %v4393_v43  ;;  %v4359_v38 = vmul.f32 %v5283_v24, %v4287_v58  ;;  %v4217_v13 = vpack.c.bf16 %v4181_v7, %v4181_v7  ;;  %v4182_v25 = vsel %vm4110_vm3, %v7240_v50, %v4146_v35  ;;  %v5288_v2 = vunpack.c.h.bf16 %v5357_v4  ;;  %v5359_v4 = vld [vmem:[%s7663_s3 + $0x48] sm:$0xff]  }
 0x394   : > { %4431 = vst.msk [vmem:[#allocation2 + $0x74] sm:$0xf] %vm4419_vm2, %v4394_v40  ;;  %v4360_v44 = vmul.f32 %v5284_v20, %v4288_v32  ;;  %v4218_v61 = vpack.c.bf16 %v4182_v25, %v4182_v25  ;;  %v4147_v39 = vmul.f32 0.2, %v7246_v30  ;;  %vm4112_vm5 = vcmp.gt.f32.partialorder %v7257_v26, 0.0 }
 0x395   : > { %v4395_v60 = vpack.c.bf16 %v4359_v38, %v4359_v38  ;;  %v4289_v10 = vunpack.c.l.bf16 %v4217_v13  ;;  %v4148_v1 = vmul.f32 0.2, %v7257_v26  ;;  %v5291_v12 = vunpack.c.l.bf16 %v5358_v47 }
 0x396   : > { %v4396_v22 = vpack.c.bf16 %v4360_v44, %v4360_v44  ;;  %v4290_v9 = vunpack.c.l.bf16 %v4218_v61  ;;  %v4183_v24 = vsel %vm4111_vm4, %v7246_v30, %v4147_v39  ;;  %vm4113_vm6 = vcmp.gt.f32.partialorder %v7262_v46, 0.0 }
 0x397   : > { %4432 = vst.msk [vmem:[#allocation2 + $0x78] sm:$0xf] %vm4419_vm2, %v4395_v60  ;;  %v4361_v56 = vmul.f32 %v5287_v31, %v4289_v10  ;;  %v4219_v14 = vpack.c.bf16 %v4183_v24, %v4183_v24  ;;  %v4184_v51 = vsel %vm4112_vm5, %v7257_v26, %v4148_v1  ;;  %v5292_v17 = vunpack.c.h.bf16 %v5358_v47  ;;  %v5360_v47 = vld [vmem:[%s7663_s3 + $0x50] sm:$0xff]  }
 0x398   : > { %4433 = vst.msk [vmem:[#allocation2 + $0x7c] sm:$0xf] %vm4419_vm2, %v4396_v22  ;;  %v4362_v19 = vmul.f32 %v5288_v2, %v4290_v9  ;;  %v4220_v20 = vpack.c.bf16 %v4184_v51, %v4184_v51  ;;  %v4149_v43 = vmul.f32 0.2, %v7262_v46  ;;  %vm4114_vm7 = vcmp.gt.f32.partialorder %v7266_v11, 0.0 }
 0x399   : > { %v4397_v58 = vpack.c.bf16 %v4361_v56, %v4361_v56  ;;  %v4291_v35 = vunpack.c.l.bf16 %v4219_v14  ;;  %v4150_v40 = vmul.f32 0.2, %v7266_v11  ;;  %v5295_v38 = vunpack.c.l.bf16 %v5359_v4 }
 0x39a   : > { %v4398_v32 = vpack.c.bf16 %v4362_v19, %v4362_v19  ;;  %v4292_v7 = vunpack.c.l.bf16 %v4220_v20  ;;  %v4185_v31 = vsel %vm4113_vm6, %v7262_v46, %v4149_v43  ;;  %vm4115_vm8 = vcmp.gt.f32.partialorder %v7270_v55, 0.0 }
 0x39b   : > { %4434 = vst.msk [vmem:[#allocation2 + $0x80] sm:$0xf] %vm4419_vm2, %v4397_v58  ;;  %v4363_v13 = vmul.f32 %v5291_v12, %v4291_v35  ;;  %v4221_v25 = vpack.c.bf16 %v4185_v31, %v4185_v31  ;;  %v4186_v44 = vsel %vm4114_vm7, %v7266_v11, %v4150_v40  ;;  %v5296_v39 = vunpack.c.h.bf16 %v5359_v4  ;;  %v5361_v4 = vld [vmem:[%s7663_s3 + $0x58] sm:$0xff]  }
 0x39c   : > { %4435 = vst.msk [vmem:[#allocation2 + $0x84] sm:$0xf] %vm4419_vm2, %v4398_v32  ;;  %v4364_v61 = vmul.f32 %v5292_v17, %v4292_v7  ;;  %v4222_v2 = vpack.c.bf16 %v4186_v44, %v4186_v44  ;;  %v4151_v60 = vmul.f32 0.2, %v7270_v55  ;;  %vm4116_vm9 = vcmp.gt.f32.partialorder %v7274_v42, 0.0 }
 0x39d   : > { %v4399_v10 = vpack.c.bf16 %v4363_v13, %v4363_v13  ;;  %v4293_v1 = vunpack.c.l.bf16 %v4221_v25  ;;  %v4152_v22 = vmul.f32 0.2, %v7274_v42  ;;  %v5299_v56 = vunpack.c.l.bf16 %v5360_v47 }
 0x39e   : > { %v4400_v9 = vpack.c.bf16 %v4364_v61, %v4364_v61  ;;  %v4294_v24 = vunpack.c.l.bf16 %v4222_v2  ;;  %v4187_v12 = vsel %vm4115_vm8, %v7270_v55, %v4151_v60  ;;  %vm4117_vm0 = vcmp.gt.f32.partialorder %v7278_v27, 0.0 }
 0x39f   : > { %4436 = vst.msk [vmem:[#allocation2 + $0x88] sm:$0xf] %vm4419_vm2, %v4399_v10  ;;  %v4365_v14 = vmul.f32 %v5295_v38, %v4293_v1  ;;  %v4223_v51 = vpack.c.bf16 %v4187_v12, %v4187_v12  ;;  %v4188_v19 = vsel %vm4116_vm9, %v7274_v42, %v4152_v22  ;;  %v5300_v43 = vunpack.c.h.bf16 %v5360_v47  ;;  %v5362_v47 = vld [vmem:[%s7663_s3 + $0x60] sm:$0xff]  }
 0x3a0   : > { %4437 = vst.msk [vmem:[#allocation2 + $0x8c] sm:$0xf] %vm4419_vm2, %v4400_v9  ;;  %v4366_v20 = vmul.f32 %v5296_v39, %v4294_v24  ;;  %v4224_v17 = vpack.c.bf16 %v4188_v19, %v4188_v19  ;;  %v4153_v58 = vmul.f32 0.2, %v7278_v27  ;;  %vm4118_vm11 = vcmp.gt.f32.partialorder %v7282_v54, 0.0 }
 0x3a1   : > { %v4401_v35 = vpack.c.bf16 %v4365_v14, %v4365_v14  ;;  %v4295_v40 = vunpack.c.l.bf16 %v4223_v51  ;;  %v4154_v32 = vmul.f32 0.2, %v7282_v54  ;;  %v5303_v13 = vunpack.c.l.bf16 %v5361_v4 }
 0x3a2   : > { %v4402_v7 = vpack.c.bf16 %v4366_v20, %v4366_v20  ;;  %v4296_v31 = vunpack.c.l.bf16 %v4224_v17  ;;  %v4189_v38 = vsel %vm4117_vm0, %v7278_v27, %v4153_v58  ;;  %vm4119_vm12 = vcmp.gt.f32.partialorder %v7286_v21, 0.0 }
 0x3a3   : > { %4438 = vst.msk [vmem:[#allocation2 + $0x90] sm:$0xf] %vm4419_vm2, %v4401_v35  ;;  %v4367_v25 = vmul.f32 %v5299_v56, %v4295_v40  ;;  %v4225_v44 = vpack.c.bf16 %v4189_v38, %v4189_v38  ;;  %v4190_v61 = vsel %vm4118_vm11, %v7282_v54, %v4154_v32  ;;  %v5304_v60 = vunpack.c.h.bf16 %v5361_v4  ;;  %v5363_v4 = vld [vmem:[%s7663_s3 + $0x68] sm:$0xff]  }
 0x3a4   : > { %4439 = vst.msk [vmem:[#allocation2 + $0x94] sm:$0xf] %vm4419_vm2, %v4402_v7  ;;  %v4368_v2 = vmul.f32 %v5300_v43, %v4296_v31  ;;  %v4226_v39 = vpack.c.bf16 %v4190_v61, %v4190_v61  ;;  %v4155_v10 = vmul.f32 0.2, %v7286_v21  ;;  %vm4120_vm13 = vcmp.gt.f32.partialorder %v7290_v8, 0.0 }
 0x3a5   : > { %v4403_v1 = vpack.c.bf16 %v4367_v25, %v4367_v25  ;;  %v4297_v22 = vunpack.c.l.bf16 %v4225_v44  ;;  %v4156_v9 = vmul.f32 0.2, %v7290_v8  ;;  %v5307_v14 = vunpack.c.l.bf16 %v5362_v47 }
 0x3a6   : > { %v4404_v24 = vpack.c.bf16 %v4368_v2, %v4368_v2  ;;  %v4298_v12 = vunpack.c.l.bf16 %v4226_v39  ;;  %v4191_v56 = vsel %vm4119_vm12, %v7286_v21, %v4155_v10  ;;  %vm4121_vm14 = vcmp.gt.f32.partialorder %v7294_v62, 0.0 }
 0x3a7   : > { %4440 = vst.msk [vmem:[#allocation2 + $0x98] sm:$0xf] %vm4419_vm2, %v4403_v1  ;;  %v4369_v51 = vmul.f32 %v5303_v13, %v4297_v22  ;;  %v4227_v19 = vpack.c.bf16 %v4191_v56, %v4191_v56  ;;  %v4192_v20 = vsel %vm4120_vm13, %v7290_v8, %v4156_v9  ;;  %v5308_v58 = vunpack.c.h.bf16 %v5362_v47  ;;  %v5364_v47 = vld [vmem:[%s7663_s3 + $0x70] sm:$0xff]  }
 0x3a8   : > { %4441 = vst.msk [vmem:[#allocation2 + $0x9c] sm:$0xf] %vm4419_vm2, %v4404_v24  ;;  %v4370_v17 = vmul.f32 %v5304_v60, %v4298_v12  ;;  %v4228_v43 = vpack.c.bf16 %v4192_v20, %v4192_v20  ;;  %v4157_v35 = vmul.f32 0.2, %v7294_v62  ;;  %vm4122_vm15 = vcmp.gt.f32.partialorder %v7297_v63, 0.0 }
 0x3a9   : > { %v4405_v40 = vpack.c.bf16 %v4369_v51, %v4369_v51  ;;  %v4299_v32 = vunpack.c.l.bf16 %v4227_v19  ;;  %v4158_v7 = vmul.f32 0.2, %v7297_v63  ;;  %v5311_v25 = vunpack.c.l.bf16 %v5363_v4 }
 0x3aa   : > { %v4406_v31 = vpack.c.bf16 %v4370_v17, %v4370_v17  ;;  %v4300_v38 = vunpack.c.l.bf16 %v4228_v43  ;;  %v4193_v13 = vsel %vm4121_vm14, %v7294_v62, %v4157_v35  ;;  %vm4123_vm1 = vcmp.gt.f32.partialorder %v7301_v28, 0.0 }
 0x3ab   : > { %4442 = vst.msk [vmem:[#allocation2 + $0xa0] sm:$0xf] %vm4419_vm2, %v4405_v40  ;;  %v4371_v44 = vmul.f32 %v5307_v14, %v4299_v32  ;;  %v4229_v61 = vpack.c.bf16 %v4193_v13, %v4193_v13  ;;  %v4194_v2 = vsel %vm4122_vm15, %v7297_v63, %v4158_v7  ;;  %v5312_v10 = vunpack.c.h.bf16 %v5363_v4  ;;  %v5365_v4 = vld [vmem:[%s7663_s3 + $0x78] sm:$0xff]  }
 0x3ac   : > { %4443 = vst.msk [vmem:[#allocation2 + $0xa4] sm:$0xf] %vm4419_vm2, %v4406_v31  ;;  %v4372_v39 = vmul.f32 %v5308_v58, %v4300_v38  ;;  %v4230_v60 = vpack.c.bf16 %v4194_v2, %v4194_v2  ;;  %v4159_v1 = vmul.f32 0.2, %v7301_v28  ;;  %vm4124_vm3 = vcmp.gt.f32.partialorder %v7305_v33, 0.0 }
 0x3ad   : > { %v4407_v22 = vpack.c.bf16 %v4371_v44, %v4371_v44  ;;  %v4301_v9 = vunpack.c.l.bf16 %v4229_v61  ;;  %v4160_v24 = vmul.f32 0.2, %v7305_v33  ;;  %v5315_v51 = vunpack.c.l.bf16 %v5364_v47 }
 0x3ae   : > { %v4408_v12 = vpack.c.bf16 %v4372_v39, %v4372_v39  ;;  %v4302_v56 = vunpack.c.l.bf16 %v4230_v60  ;;  %v4195_v14 = vsel %vm4123_vm1, %v7301_v28, %v4159_v1  ;;  %vm4125_vm4 = vcmp.gt.f32.partialorder %v7309_v29, 0.0 }
 0x3af   : > { %4444 = vst.msk [vmem:[#allocation2 + $0xa8] sm:$0xf] %vm4419_vm2, %v4407_v22  ;;  %v4373_v19 = vmul.f32 %v5311_v25, %v4301_v9  ;;  %v4231_v20 = vpack.c.bf16 %v4195_v14, %v4195_v14  ;;  %v4196_v17 = vsel %vm4124_vm3, %v7305_v33, %v4160_v24  ;;  %v5316_v35 = vunpack.c.h.bf16 %v5364_v47  ;;  %v5366_v47 = vld [vmem:[%s7663_s3 + $0x80] sm:$0xff]  }
 0x3b0   : > { %4445 = vst.msk [vmem:[#allocation2 + $0xac] sm:$0xf] %vm4419_vm2, %v4408_v12  ;;  %v4374_v43 = vmul.f32 %v5312_v10, %v4302_v56  ;;  %v4232_v58 = vpack.c.bf16 %v4196_v17, %v4196_v17  ;;  %v4161_v40 = vmul.f32 0.2, %v7309_v29  ;;  %vm4126_vm5 = vcmp.gt.f32.partialorder %v7313_v36, 0.0 }
 0x3b1   : > { %v4409_v32 = vpack.c.bf16 %v4373_v19, %v4373_v19  ;;  %v4303_v7 = vunpack.c.l.bf16 %v4231_v20  ;;  %v4162_v31 = vmul.f32 0.2, %v7313_v36  ;;  %v5319_v44 = vunpack.c.l.bf16 %v5365_v4 }
 0x3b2   : > { %v4410_v38 = vpack.c.bf16 %v4374_v43, %v4374_v43  ;;  %v4304_v13 = vunpack.c.l.bf16 %v4232_v58  ;;  %v4197_v25 = vsel %vm4125_vm4, %v7309_v29, %v4161_v40  ;;  %vm4127_vm6 = vcmp.gt.f32.partialorder %v7317_v57, 0.0 }
 0x3b3   : > { %4446 = vst.msk [vmem:[#allocation2 + $0xb0] sm:$0xf] %vm4419_vm2, %v4409_v32  ;;  %v4375_v61 = vmul.f32 %v5315_v51, %v4303_v7  ;;  %v4233_v2 = vpack.c.bf16 %v4197_v25, %v4197_v25  ;;  %v4198_v39 = vsel %vm4126_vm5, %v7313_v36, %v4162_v31  ;;  %v5320_v1 = vunpack.c.h.bf16 %v5365_v4  ;;  %v5367_v32 = vld [vmem:[%s7663_s3 + $0x88] sm:$0xff]  }
 0x3b4   : > { %4447 = vst.msk [vmem:[#allocation2 + $0xb4] sm:$0xf] %vm4419_vm2, %v4410_v38  ;;  %v4376_v60 = vmul.f32 %v5316_v35, %v4304_v13  ;;  %v4234_v10 = vpack.c.bf16 %v4198_v39, %v4198_v39  ;;  %v4163_v22 = vmul.f32 0.2, %v7317_v57  ;;  %vm4128_vm7 = vcmp.gt.f32.partialorder %v7321_v3, 0.0 }
 0x3b5   : > { %v4411_v9 = vpack.c.bf16 %v4375_v61, %v4375_v61  ;;  %v4305_v24 = vunpack.c.l.bf16 %v4233_v2  ;;  %v4164_v12 = vmul.f32 0.2, %v7321_v3  ;;  %v5323_v19 = vunpack.c.l.bf16 %v5366_v47 }
 0x3b6   : > { %v4412_v56 = vpack.c.bf16 %v4376_v60, %v4376_v60  ;;  %v4306_v14 = vunpack.c.l.bf16 %v4234_v10  ;;  %v4199_v51 = vsel %vm4127_vm6, %v7317_v57, %v4163_v22  ;;  %vm4129_vm8 = vcmp.gt.f32.partialorder %v7325_v53, 0.0 }
 0x3b7   : > { %4448 = vst.msk [vmem:[#allocation2 + $0xb8] sm:$0xf] %vm4419_vm2, %v4411_v9  ;;  %v4377_v20 = vmul.f32 %v5319_v44, %v4305_v24  ;;  %v4235_v17 = vpack.c.bf16 %v4199_v51, %v4199_v51  ;;  %v4200_v43 = vsel %vm4128_vm7, %v7321_v3, %v4164_v12  ;;  %v5324_v35 = vunpack.c.h.bf16 %v5366_v47 }
 0x3b8   : > { %4449 = vst.msk [vmem:[#allocation2 + $0xbc] sm:$0xf] %vm4419_vm2, %v4412_v56  ;;  %v4378_v4 = vmul.f32 %v5320_v1, %v4306_v14  ;;  %v4236_v58 = vpack.c.bf16 %v4200_v43, %v4200_v43  ;;  %v4165_v40 = vmul.f32 0.2, %v7325_v53  ;;  %vm4130_vm9 = vcmp.gt.f32.partialorder %v7329_v16, 0.0 }
 0x3b9   : > { %v4413_v7 = vpack.c.bf16 %v4377_v20, %v4377_v20  ;;  %v4307_v31 = vunpack.c.l.bf16 %v4235_v17  ;;  %v4166_v38 = vmul.f32 0.2, %v7329_v16  ;;  %v5327_v39 = vunpack.c.l.bf16 %v5367_v32 }
 0x3ba   : > { %v4414_v13 = vpack.c.bf16 %v4378_v4, %v4378_v4  ;;  %v4308_v25 = vunpack.c.l.bf16 %v4236_v58  ;;  %v4201_v44 = vsel %vm4129_vm8, %v7325_v53, %v4165_v40  ;;  %v5328_v1 = vunpack.c.h.bf16 %v5367_v32 }
 0x3bb   : > { %4450 = vst.msk [vmem:[#allocation2 + $0xc0] sm:$0xf] %vm4419_vm2, %v4413_v7  ;;  %v4379_v61 = vmul.f32 %v5323_v19, %v4307_v31  ;;  %v4237_v2 = vpack.c.bf16 %v4201_v44, %v4201_v44  ;;  %v4202_v47 = vsel %vm4130_vm9, %v7329_v16, %v4166_v38 }
 0x3bc   : > { %4451 = vst.msk [vmem:[#allocation2 + $0xc4] sm:$0xf] %vm4419_vm2, %v4414_v13  ;;  %v4380_v60 = vmul.f32 %v5324_v35, %v4308_v25  ;;  %v4238_v10 = vpack.c.bf16 %v4202_v47, %v4202_v47 }
 0x3bd   : > { %v4415_v22 = vpack.c.bf16 %v4379_v61, %v4379_v61  ;;  %v4309_v9 = vunpack.c.l.bf16 %v4237_v2 }
 0x3be   : > { %v4416_v24 = vpack.c.bf16 %v4380_v60, %v4380_v60  ;;  %v4310_v12 = vunpack.c.l.bf16 %v4238_v10 }
 0x3bf   : > { %4452 = vst.msk [vmem:[#allocation2 + $0xc8] sm:$0xf] %vm4419_vm2, %v4415_v22  ;;  %v4381_v56 = vmul.f32 %v5327_v39, %v4309_v9 }
 0x3c0   : > { %4453 = vst.msk [vmem:[#allocation2 + $0xcc] sm:$0xf] %vm4419_vm2, %v4416_v24  ;;  %v4382_v14 = vmul.f32 %v5328_v1, %v4310_v12 }
 0x3c1   : > { %v4417_v51 = vpack.c.bf16 %v4381_v56, %v4381_v56 }
 0x3c2   : > { %v4418_v19 = vpack.c.bf16 %v4382_v14, %v4382_v14 }
 0x3c3   : > { %4454 = vst.msk [vmem:[#allocation2 + $0xd0] sm:$0xf] %vm4419_vm2, %v4417_v51 }
 0x3c4   : > { %4455 = vst.msk [vmem:[#allocation2 + $0xd4] sm:$0xf] %vm4419_vm2, %v4418_v19 }
 0x3c5 PF: > { %p5089_p8 = scmp.ne.s32.totalorder %s5572_s15, 2 }
 0x3c7   : > { %4459 = sbr.rel (%p5089_p8) target bundleno = 1008 (0x3f0), region = 48 }
 0x3cc   : > { %4460 = vst.msk [vmem:[%s5655_s29] sm:$0xff] %vm957_vm10, %v7042_v23  ;;  %v7778_v23 = vld [vmem:[#allocation7_spill] sm:$0xff] }
 0x3cd   : > { %4461 = vst.msk [vmem:[%s5655_s29 + $0x8] sm:$0xff] %vm957_vm10, %v7057_v15 }
 0x3ce   : > { %4462 = vst.msk [vmem:[%s5655_s29 + $0x10] sm:$0xff] %vm957_vm10, %v7069_v45 }
 0x3cf   : > { %4463 = vst.msk [vmem:[%s5655_s29 + $0x18] sm:$0xff] %vm957_vm10, %v7084_v37 }
 0x3d0   : > { %4464 = vst.msk [vmem:[%s5655_s29 + $0x20] sm:$0xff] %vm957_vm10, %v7096_v5 }
 0x3d1   : > { %4465 = vst.msk [vmem:[%s5655_s29 + $0x28] sm:$0xff] %vm957_vm10, %v7111_v48 }
 0x3d2   : > { %4466 = vst.msk [vmem:[%s5655_s29 + $0x30] sm:$0xff] %vm957_vm10, %v7123_v34 }
 0x3d3   : > { %4467 = vst.msk [vmem:[%s5655_s29 + $0x38] sm:$0xff] %vm957_vm10, %v7138_v52 }
 0x3d4   : > { %4468 = vst.msk [vmem:[%s5655_s29 + $0x40] sm:$0xff] %vm957_vm10, %v7150_v0 }
 0x3d5   : > { %4469 = vst.msk [vmem:[%s5655_s29 + $0x48] sm:$0xff] %vm957_vm10, %v7165_v59 }
 0x3d6   : > { %4470 = vst.msk [vmem:[%s5655_s29 + $0x50] sm:$0xff] %vm957_vm10, %v7177_v6 }
 0x3d7   : > { %4471 = vst.msk [vmem:[%s5655_s29 + $0x58] sm:$0xff] %vm957_vm10, %v7778_v23 }
 0x3d8   : > { %4472 = vst.msk [vmem:[%s5655_s29 + $0x60] sm:$0xff] %vm957_vm10, %v7204_v49 }
 0x3d9   : > { %4473 = vst.msk [vmem:[%s5655_s29 + $0x68] sm:$0xff] %vm957_vm10, %v7219_v18 }
 0x3da   : > { %4474 = vst.msk [vmem:[%s5655_s29 + $0x70] sm:$0xff] %vm957_vm10, %v7229_v41 }
 0x3db   : > { %4475 = vst.msk [vmem:[%s5655_s29 + $0x78] sm:$0xff] %vm957_vm10, %v7240_v50 }
 0x3dc   : > { %4476 = vst.msk [vmem:[%s5655_s29 + $0x80] sm:$0xff] %vm957_vm10, %v7246_v30 }
 0x3dd   : > { %4477 = vst.msk [vmem:[%s5655_s29 + $0x88] sm:$0xff] %vm957_vm10, %v7257_v26 }
 0x3de   : > { %4478 = vst.msk [vmem:[%s5655_s29 + $0x90] sm:$0xff] %vm957_vm10, %v7262_v46 }
 0x3df   : > { %4479 = vst.msk [vmem:[%s5655_s29 + $0x98] sm:$0xff] %vm957_vm10, %v7266_v11 }
 0x3e0   : > { %4480 = vst.msk [vmem:[%s5655_s29 + $0xa0] sm:$0xff] %vm957_vm10, %v7270_v55 }
 0x3e1   : > { %4481 = vst.msk [vmem:[%s5655_s29 + $0xa8] sm:$0xff] %vm957_vm10, %v7274_v42 }
 0x3e2   : > { %4482 = vst.msk [vmem:[%s5655_s29 + $0xb0] sm:$0xff] %vm957_vm10, %v7278_v27 }
 0x3e3   : > { %4483 = vst.msk [vmem:[%s5655_s29 + $0xb8] sm:$0xff] %vm957_vm10, %v7282_v54 }
 0x3e4   : > { %4484 = vst.msk [vmem:[%s5655_s29 + $0xc0] sm:$0xff] %vm957_vm10, %v7286_v21 }
 0x3e5   : > { %4485 = vst.msk [vmem:[%s5655_s29 + $0xc8] sm:$0xff] %vm957_vm10, %v7290_v8 }
 0x3e6   : > { %4486 = vst.msk [vmem:[%s5655_s29 + $0xd0] sm:$0xff] %vm957_vm10, %v7294_v62 }
 0x3e7   : > { %4487 = vst.msk [vmem:[%s5655_s29 + $0xd8] sm:$0xff] %vm957_vm10, %v7297_v63 }
 0x3e8   : > { %4488 = vst.msk [vmem:[%s5655_s29 + $0xe0] sm:$0xff] %vm957_vm10, %v7301_v28 }
 0x3e9   : > { %4489 = vst.msk [vmem:[%s5655_s29 + $0xe8] sm:$0xff] %vm957_vm10, %v7305_v33 }
 0x3ea   : > { %4490 = vst.msk [vmem:[%s5655_s29 + $0xf0] sm:$0xff] %vm957_vm10, %v7309_v29 }
 0x3eb   : > { %4491 = vst.msk [vmem:[%s5655_s29 + $0xf8] sm:$0xff] %vm957_vm10, %v7313_v36 }
 0x3ec   : > { %4492 = vst.msk [vmem:[%s5655_s29 + $0x100] sm:$0xff] %vm957_vm10, %v7317_v57 }
 0x3ed   : > { %4493 = vst.msk [vmem:[%s5655_s29 + $0x108] sm:$0xff] %vm957_vm10, %v7321_v3 }
 0x3ee   : > { %4494 = vst.msk [vmem:[%s5655_s29 + $0x110] sm:$0xff] %vm957_vm10, %v7325_v53 }
 0x3ef   : > { %4495 = vst.msk [vmem:[%s5655_s29 + $0x118] sm:$0xff] %vm957_vm10, %v7329_v16 }
 0x3f0 PF: > { %s14_s19 = sadd.s32 1, %s5588_s19   ;;  %s7779_s15 = smov %s5580_s17 }
 0x3f1   : > { %p11_p9 = scmp.ge.s32.totalorder %s14_s19, 8   ;;  %s7780_s16 = smov %s5584_s18 }
 0x3f2   : > { %s7781_s17 = smov %s7784_s20  ;;  %s7782_s18 = smov %s7788_s21 }
 0x3f3   :  { %13 = sbr.rel (!%p11_p9) target bundleno = 3 (0x3), region = 80 }

</bundles_post_ra>
